<compile_context>
chip_gen: v5e
topology: v5e:2x2
jax: 0.10.0
libtpu: 0.0.40
codegen_flags: <defaults>
</compile_context>

<pallas_src>
import functools

import jax
import jax.numpy as jnp
from jax.experimental import pallas as pl
from jax.experimental.pallas import tpu as pltpu


# --------------------------------------------------------------------------- #
# helpers
# --------------------------------------------------------------------------- #
def _round_up(x, m):
    return (x + m - 1) // m * m


def _pick_tile(dim, cands, align=128, max_waste=1.125):
    """Largest candidate <= round_up(dim, align) with acceptable padding waste."""
    dim = max(int(dim), 1)
    target = _round_up(dim, align)
    fallback = None
    for c in cands:                                   # descending order
        if c > target:
            continue
        padded = _round_up(dim, c)
        if padded <= max_waste * dim:
            return c
        if fallback is None or padded < _round_up(dim, fallback):
            fallback = c
    return fallback if fallback is not None else target


_VMEM_LIMIT = 32 * 1024 * 1024   # safe on v5e/v6e/v7x; working sets stay << limit


# --------------------------------------------------------------------------- #
# Pallas kernels
# --------------------------------------------------------------------------- #
def _mm1_kernel(a_ref, w_ref, b_ref, o_ref, *, relu):
    # Single K step: no f32 scratch, no zero-init -- out = relu(A @ W + shift).
    y = jnp.dot(a_ref[...], w_ref[...], preferred_element_type=jnp.float32)
    y = y + b_ref[...]
    if relu:
        y = jnp.maximum(y, 0.0)
    o_ref[...] = y.astype(o_ref.dtype)


def _mm1_res_kernel(a_ref, w_ref, b_ref, r_ref, o_ref, *, relu):
    y = jnp.dot(a_ref[...], w_ref[...], preferred_element_type=jnp.float32)
    y = y + b_ref[...] + r_ref[...].astype(jnp.float32)
    if relu:
        y = jnp.maximum(y, 0.0)
    o_ref[...] = y.astype(o_ref.dtype)


def _mm_kernel(a_ref, w_ref, b_ref, o_ref, acc_ref, *, relu):
    # Multi K step: f32 VMEM accumulator, epilogue on last K step.
    @pl.when(pl.program_id(2) == 0)
    def _():
        acc_ref[...] = jnp.zeros_like(acc_ref)

    acc_ref[...] += jnp.dot(a_ref[...], w_ref[...],
                            preferred_element_type=jnp.float32)

    @pl.when(pl.program_id(2) == pl.num_programs(2) - 1)
    def _():
        y = acc_ref[...] + b_ref[...]
        if relu:
            y = jnp.maximum(y, 0.0)
        o_ref[...] = y.astype(o_ref.dtype)


def _mm_res_kernel(a_ref, w_ref, b_ref, r_ref, o_ref, acc_ref, *, relu):
    # Residual + shift folded into the k==0 accumulator init.
    @pl.when(pl.program_id(2) == 0)
    def _():
        acc_ref[...] = r_ref[...].astype(jnp.float32) + b_ref[...]

    acc_ref[...] += jnp.dot(a_ref[...], w_ref[...],
                            preferred_element_type=jnp.float32)

    @pl.when(pl.program_id(2) == pl.num_programs(2) - 1)
    def _():
        y = acc_ref[...]
        if relu:
            y = jnp.maximum(y, 0.0)
        o_ref[...] = y.astype(o_ref.dtype)


def _conv3x3_s1_kernel(x_ref, w_ref, b_ref, o_ref, acc_ref, *, wp, mo, relu):
    # Direct 3x3/s1/p1 conv on one image, one cin tile:
    #   x_ref: (1, L, tcin)  flattened padded image (L = (H+3)*(W+2))
    #   w_ref: (9, tcin, tcout), b_ref: (1, tcout)
    #   o_ref: (1, mo, tcout) with mo = H*(W+2) (2 garbage cols/row sliced later)
    # Tap (di, dj) is the flat window starting at offset di*wp + dj -> nine
    # shifted matmuls, zero HBM im2col traffic.
    @pl.when(pl.program_id(2) == 0)
    def _():
        acc_ref[...] = jnp.zeros_like(acc_ref)

    part = None
    for di in range(3):
        for dj in range(3):
            a = x_ref[0, pl.ds(di * wp + dj, mo), :]
            p = jnp.dot(a, w_ref[di * 3 + dj],
                        preferred_element_type=jnp.float32)
            part = p if part is None else part + p
    acc_ref[...] += part

    @pl.when(pl.program_id(2) == pl.num_programs(2) - 1)
    def _():
        y = acc_ref[...] + b_ref[...]
        if relu:
            y = jnp.maximum(y, 0.0)
        o_ref[...] = y[None].astype(o_ref.dtype)


def _maxpool_kernel(p00_ref, p01_ref, p10_ref, p11_ref, o_ref, *, ho, wo):
    # 3x3/s2/p1 max pool from four polyphase (even/odd row x col) views.
    refs = ((p00_ref, p01_ref), (p10_ref, p11_ref))
    res = None
    for di in range(3):
        for dj in range(3):
            r = refs[di % 2][dj % 2]
            v = r[0, di // 2:di // 2 + ho, dj // 2:dj // 2 + wo, :]
            res = v if res is None else jnp.maximum(res, v)
    o_ref[...] = res[None]


def _avgpool_kernel(x_ref, o_ref):
    o_ref[...] = jnp.mean(x_ref[...].astype(jnp.float32),
                          axis=1, keepdims=True).astype(o_ref.dtype)


# --------------------------------------------------------------------------- #
# Tiled fused matmul (matmul + BN shift + optional residual + ReLU)
# --------------------------------------------------------------------------- #
def _fused_matmul(a, w, shift, *, relu, residual=None, out_dtype=jnp.bfloat16):
    """out = [relu]( A @ W + shift [+ residual] ); A:(M,K), W:(K,N), bf16 MXU."""
    m, k = a.shape
    k2, n = w.shape
    assert k == k2

    # Prefer full (pad-free, lane-dense) blocks; fall back to the tile picker.
    if m <= 1024:
        tm, mp = m, m
    else:
        tm = _pick_tile(m, (1024, 512, 256, 128), max_waste=1.3)
        mp = _round_up(m, tm)
    if n <= 512:
        tn, np_ = n, n
    else:
        tn = _pick_tile(n, (512, 256, 128))
        np_ = _round_up(n, tn)
    if k <= 512:
        tk, kp = k, k
    else:
        tk = _pick_tile(k, (512, 256, 128))
        kp = _round_up(k, tk)

    # v7x has 2 TensorCores sharded over the parallel grid axes: avoid a 1x1
    # (M, N) grid when the problem is big enough to be worth splitting.
    if mp // tm == 1 and np_ // tn == 1 and m >= 256:
        tm = _round_up((m + 1) // 2, 8)
        mp = _round_up(m, tm)

    a = a.astype(jnp.bfloat16)
    w = w.astype(jnp.bfloat16)
    if (mp, kp) != (m, k):
        a = jnp.pad(a, ((0, mp - m), (0, kp - k)))
    if (kp, np_) != (k, n):
        w = jnp.pad(w, ((0, kp - k), (0, np_ - n)))
    s = shift.reshape(1, n).astype(jnp.float32)
    if np_ != n:
        s = jnp.pad(s, ((0, 0), (0, np_ - n)))
    r = None
    if residual is not None:
        r = residual.astype(jnp.bfloat16)
        if (mp, np_) != (m, n):
            r = jnp.pad(r, ((0, mp - m), (0, np_ - n)))

    single_k = (kp == tk)

    if single_k:
        in_specs = [pl.BlockSpec((tm, kp), lambda i, j: (i, 0)),
                    pl.BlockSpec((kp, tn), lambda i, j: (0, j)),
                    pl.BlockSpec((1, tn), lambda i, j: (0, j))]
        args = [a, w, s]
        if r is None:
            kern = functools.partial(_mm1_kernel, relu=relu)
        else:
            in_specs.append(pl.BlockSpec((tm, tn), lambda i, j: (i, j)))
            args.append(r)
            kern = functools.partial(_mm1_res_kernel, relu=relu)
        out = pl.pallas_call(
            kern,
            out_shape=jax.ShapeDtypeStruct((mp, np_), out_dtype),
            grid_spec=pltpu.PrefetchScalarGridSpec(
                num_scalar_prefetch=0,
                grid=(mp // tm, np_ // tn),
                in_specs=in_specs,
                out_specs=pl.BlockSpec((tm, tn), lambda i, j: (i, j))),
            compiler_params=pltpu.CompilerParams(
                dimension_semantics=("parallel", "parallel"),
                vmem_limit_bytes=_VMEM_LIMIT),
        )(*args)
    else:
        in_specs = [pl.BlockSpec((tm, tk), lambda i, j, kk: (i, kk)),
                    pl.BlockSpec((tk, tn), lambda i, j, kk: (kk, j)),
                    pl.BlockSpec((1, tn), lambda i, j, kk: (0, j))]
        args = [a, w, s]
        if r is None:
            kern = functools.partial(_mm_kernel, relu=relu)
        else:
            in_specs.append(pl.BlockSpec((tm, tn), lambda i, j, kk: (i, j)))
            args.append(r)
            kern = functools.partial(_mm_res_kernel, relu=relu)
        out = pl.pallas_call(
            kern,
            out_shape=jax.ShapeDtypeStruct((mp, np_), out_dtype),
            grid_spec=pltpu.PrefetchScalarGridSpec(
                num_scalar_prefetch=0,
                grid=(mp // tm, np_ // tn, kp // tk),
                in_specs=in_specs,
                out_specs=pl.BlockSpec((tm, tn), lambda i, j, kk: (i, j)),
                scratch_shapes=[pltpu.VMEM((tm, tn), jnp.float32)]),
            compiler_params=pltpu.CompilerParams(
                dimension_semantics=("parallel", "parallel", "arbitrary"),
                vmem_limit_bytes=_VMEM_LIMIT),
        )(*args)

    if (mp, np_) != (m, n):
        out = out[:m, :n]
    return out


# --------------------------------------------------------------------------- #
# Conv / pool / linear wrappers
# --------------------------------------------------------------------------- #
@functools.partial(jax.jit, static_argnames=("stride", "relu"))
def conv1x1_bn(x, wmat, shift, residual=None, *, stride=1, relu=True):
    """1x1 conv + folded BN (+ residual + ReLU).  wmat: (Cin, Cout) bf16."""
    n, h, w, cin = x.shape
    cout = wmat.shape[1]
    xs = x[:, ::stride, ::stride, :] if stride > 1 else x
    ho, wo = xs.shape[1], xs.shape[2]
    a = xs.reshape(n * ho * wo, cin)
    res = None if residual is None else residual.reshape(n * ho * wo, cout)
    out = _fused_matmul(a, wmat, shift, relu=relu, residual=res)
    return out.reshape(n, ho, wo, cout)


@functools.partial(jax.jit, static_argnames=("relu",))
def conv3x3_s1_bn(x, w9, shift, *, relu=True):
    """Direct 3x3/s1/p1 conv + folded BN (+ReLU), no HBM im2col."""
    n, h, w, cin = x.shape
    cout = w9.shape[-1]
    wp = w + 2
    # pad: 1 row top, 2 rows bottom (1 for the conv + 1 so the over-read of the
    # two garbage columns at each row end stays in bounds), 1 col left/right.
    xp = jnp.pad(x.astype(jnp.bfloat16), ((0, 0), (1, 2), (1, 1), (0, 0)))
    L = (h + 3) * wp
    xf = xp.reshape(n, L, cin)              # contiguous reshape (free)
    mo = h * wp                             # flat output rows per image

    tcin = cin if cin <= 256 else 256
    tcout = min(cout, 256)
    grid = (n, cout // tcout, cin // tcin)

    out = pl.pallas_call(
        functools.partial(_conv3x3_s1_kernel, wp=wp, mo=mo, relu=relu),
        out_shape=jax.ShapeDtypeStruct((n, mo, cout), jnp.bfloat16),
        grid_spec=pltpu.PrefetchScalarGridSpec(
            num_scalar_prefetch=0,
            grid=grid,
            in_specs=[
                pl.BlockSpec((1, L, tcin), lambda i, j, k: (i, 0, k)),
                pl.BlockSpec((9, tcin, tcout), lambda i, j, k: (0, k, j)),
                pl.BlockSpec((1, tcout), lambda i, j, k: (0, j)),
            ],
            out_specs=pl.BlockSpec((1, mo, tcout), lambda i, j, k: (i, 0, j)),
            scratch_shapes=[pltpu.VMEM((mo, tcout), jnp.float32)],
        ),
        compiler_params=pltpu.CompilerParams(
            dimension_semantics=("parallel", "parallel", "arbitrary"),
            vmem_limit_bytes=_VMEM_LIMIT),
    )(xf, w9, shift)
    # drop the two garbage columns per row and restore NHWC
    return out.reshape(n, h, wp, cout)[:, :, :w, :]


@functools.partial(jax.jit, static_argnames=("stride", "relu"))
def conv3x3_im2col_bn(x, w9, shift, *, stride, relu=True):
    # TODO(synk): the three stride-2 3x3 convs still use a small HBM im2col
    # (2.25x expansion); all stride-1 3x3 convs use the direct Pallas path.
    n, h, wd, cin = x.shape
    cout = w9.shape[-1]
    ho = (h + 2 - 3) // stride + 1
    wo = (wd + 2 - 3) // stride + 1
    xp = jnp.pad(x, ((0, 0), (1, 1), (1, 1), (0, 0)))
    cols = [xp[:, di:di + stride * (ho - 1) + 1:stride,
               dj:dj + stride * (wo - 1) + 1:stride, :]
            for di in range(3) for dj in range(3)]
    a = jnp.concatenate(cols, axis=-1).reshape(n * ho * wo, 9 * cin)
    out = _fused_matmul(a, w9.reshape(9 * cin, cout), shift, relu=relu)
    return out.reshape(n, ho, wo, cout)


def conv3x3_bn(x, w9, shift, *, stride=1, relu=True):
    if stride == 1:
        return conv3x3_s1_bn(x, w9, shift, relu=relu)
    return conv3x3_im2col_bn(x, w9, shift, stride=stride, relu=relu)


@jax.jit
def maxpool_3x3_s2_p1(x):
    n, h, w, c = x.shape
    ho = (h - 1) // 2 + 1
    wo = (w - 1) // 2 + 1
    hp = _round_up(h + 2, 2)
    wp = _round_up(w + 2, 2)
    xp = jnp.pad(x, ((0, 0), (1, hp - h - 1), (1, wp - w - 1), (0, 0)),
                 constant_values=-jnp.inf)
    hh, wh = hp // 2, wp // 2
    # polyphase (even/odd row x col) views: ~1x copy instead of a 9x stack
    phases = [xp[:, a::2, b::2, :] for a in (0, 1) for b in (0, 1)]
    return pl.pallas_call(
        functools.partial(_maxpool_kernel, ho=ho, wo=wo),
        out_shape=jax.ShapeDtypeStruct((n, ho, wo, c), x.dtype),
        grid=(n,),
        in_specs=[pl.BlockSpec((1, hh, wh, c), lambda i: (i, 0, 0, 0))] * 4,
        out_specs=pl.BlockSpec((1, ho, wo, c), lambda i: (i, 0, 0, 0)),
        compiler_params=pltpu.CompilerParams(
            dimension_semantics=("parallel",),
            vmem_limit_bytes=_VMEM_LIMIT),
    )(*phases)


@jax.jit
def global_avgpool(x):
    n, h, w, c = x.shape
    hw = h * w
    xr = x.reshape(n, hw, c)
    out = pl.pallas_call(
        _avgpool_kernel,
        out_shape=jax.ShapeDtypeStruct((n, 1, c), jnp.float32),
        grid=(n,),
        in_specs=[pl.BlockSpec((1, hw, c), lambda i: (i, 0, 0))],
        out_specs=pl.BlockSpec((1, 1, c), lambda i: (i, 0, 0)),
        compiler_params=pltpu.CompilerParams(
            dimension_semantics=("parallel",)),
    )(xr)
    return out.reshape(n, c)


@jax.jit
def linear(x, w, b):
    # x: (N, Cin); w: (Cin, Cout) pre-transposed; b: (Cout,)
    return _fused_matmul(x, w, b, relu=False, out_dtype=jnp.float32)


# --------------------------------------------------------------------------- #
# Deterministic parameter construction (synthetic, no checkpoint loading)
# --------------------------------------------------------------------------- #
EXPANSION = 4
LAYERS = (3, 4, 23, 3)          # ResNet-101
PLANES = (64, 128, 256, 512)
STRIDES = (1, 2, 2, 2)


class KeyGen:
    def __init__(self, key):
        self._key = key

    def __call__(self):
        self._key, k = jax.random.split(self._key)
        return k


def _fold_bn(gamma, beta, mean, var, eps=1e-5):
    scale = gamma / jnp.sqrt(var + eps)
    shift = beta - mean * scale
    return scale, shift


def _conv_bn_params(kg, cin, cout, ksize):
    """Conv (torch layout) + BN stats, folded + pre-transposed once at init.

    Returns ((k*k, cin, cout) or (cin, cout) bf16 weight, (1, cout) f32 shift).
    """
    fan_in = cin * ksize * ksize
    w = jax.random.normal(kg(), (cout, cin, ksize, ksize), jnp.float32) \
        * jnp.sqrt(2.0 / fan_in)
    gamma = 1.0 + 0.1 * jax.random.normal(kg(), (cout,), jnp.float32)
    beta = 0.1 * jax.random.normal(kg(), (cout,), jnp.float32)
    mean = 0.1 * jax.random.normal(kg(), (cout,), jnp.float32)
    var = 1.0 + 0.1 * jnp.abs(jax.random.normal(kg(), (cout,), jnp.float32))
    scale, shift = _fold_bn(gamma, beta, mean, var)
    wmat = jnp.transpose(w, (2, 3, 1, 0)).reshape(ksize * ksize, cin, cout)
    wmat = (wmat * scale.reshape(1, 1, cout)).astype(jnp.bfloat16)
    if ksize == 1:
        wmat = wmat.reshape(cin, cout)
    return wmat, shift.reshape(1, cout).astype(jnp.float32)


def init_resnet101_params(key, num_classes):
    # TODO(synk): training-mode BatchNorm (per-batch statistics) not implemented;
    # BN is folded into conv weights (inference / running-stats mode).
    kg = KeyGen(key)
    params = {}
    # replaced stem: 3x3, stride 1, padding 1, no bias
    params["stem_w"], params["stem_b"] = _conv_bn_params(kg, 3, 64, 3)
    inplanes = 64
    layers = []
    for planes, nblocks, stride in zip(PLANES, LAYERS, STRIDES):
        blocks = []
        for b in range(nblocks):
            s = stride if b == 0 else 1
            blk = {"stride": s}
            blk["w1"], blk["b1"] = _conv_bn_params(kg, inplanes, planes, 1)
            blk["w2"], blk["b2"] = _conv_bn_params(kg, planes, planes, 3)
            blk["w3"], blk["b3"] = _conv_bn_params(kg, planes,
                                                   planes * EXPANSION, 1)
            if s != 1 or inplanes != planes * EXPANSION:
                blk["wd"], blk["bd"] = _conv_bn_params(kg, inplanes,
                                                       planes * EXPANSION, 1)
            blocks.append(blk)
            inplanes = planes * EXPANSION
        layers.append(blocks)
    params["layers"] = layers
    params["fc_w"] = jax.random.normal(
        kg(), (512 * EXPANSION, num_classes), jnp.float32) * 0.01
    params["fc_b"] = jnp.zeros((num_classes,), jnp.float32)
    return params


# --------------------------------------------------------------------------- #
# Forward pass
# --------------------------------------------------------------------------- #
def bottleneck_forward(x, blk):
    out = conv1x1_bn(x, blk["w1"], blk["b1"], relu=True)
    out = conv3x3_bn(out, blk["w2"], blk["b2"],
                     stride=blk["stride"], relu=True)
    if "wd" in blk:
        identity = conv1x1_bn(x, blk["wd"], blk["bd"],
                              stride=blk["stride"], relu=False)
    else:
        identity = x
    # conv3 + bn3 + residual add + relu fused into one tiled Pallas matmul
    return conv1x1_bn(out, blk["w3"], blk["b3"], identity, relu=True)


def resnet101_forward(params, x_nchw):
    x = jnp.transpose(x_nchw, (0, 2, 3, 1)).astype(jnp.bfloat16)  # NCHW -> NHWC
    x = conv3x3_bn(x, params["stem_w"], params["stem_b"], stride=1, relu=True)
    x = maxpool_3x3_s2_p1(x)
    for blocks in params["layers"]:
        for blk in blocks:
            x = bottleneck_forward(x, blk)
    x = global_avgpool(x)                                         # (N, 2048) f32
    return linear(x, params["fc_w"], params["fc_b"])              # (N, classes)


# --------------------------------------------------------------------------- #
if __name__ == "__main__":
    num_classes = 10
    key = jax.random.PRNGKey(0)
    pkey, xkey = jax.random.split(key)

    params = init_resnet101_params(pkey, num_classes)
    x = jax.random.normal(xkey, (2, 3, 16, 16), jnp.float32)      # NCHW, like PyTorch

    logits = resnet101_forward(params, x)
    logits = jax.block_until_ready(logits)

    assert logits.shape == (2, num_classes), logits.shape
    assert bool(jnp.all(jnp.isfinite(logits)))
    print("KERNEL_OK")
</pallas_src>

<mosaic_0001>
module attributes {stable_mosaic.version = 11 : i64} {
  func.func @_conv3x3_s1_kernel(%arg0: i32, %arg1: i32, %arg2: i32, %arg3: memref<1x342x3xbf16, #tpu.memory_space<vmem>>, %arg4: memref<9x3x64xbf16, #tpu.memory_space<vmem>>, %arg5: memref<1x64xf32, #tpu.memory_space<vmem>>, %arg6: memref<1x288x64xbf16, #tpu.memory_space<vmem>>, %arg7: memref<288x64xf32, #tpu.memory_space<vmem>>) attributes {dimension_semantics = [#tpu.dimension_semantics<parallel>, #tpu.dimension_semantics<parallel>, #tpu.dimension_semantics<arbitrary>], iteration_bounds = array<i64: 2, 1, 1>, scalar_prefetch = 0 : i64, scratch_operands = 1 : i64, tpu.core_type = #tpu.core_type<tc>, window_params = [{transform_indices = @transform_0, window_bounds = array<i64: 1, 342, 3>}, {transform_indices = @transform_1, window_bounds = array<i64: 9, 3, 64>}, {transform_indices = @transform_2, window_bounds = array<i64: 1, 64>}, {transform_indices = @transform_3, window_bounds = array<i64: 1, 288, 64>}]} {
    %c0_i32 = arith.constant 0 : i32
    %0 = arith.cmpi eq, %arg2, %c0_i32 : i32
    %1 = arith.extui %0 : i1 to i32
    %c0_i32_0 = arith.constant 0 : i32
    %2 = arith.cmpi ne, %1, %c0_i32_0 : i32
    scf.if %2 {
      %cst_54 = arith.constant 0.000000e+00 : f32
      %62 = vector.broadcast %cst_54 : f32 to vector<288x64xf32>
      %c0_55 = arith.constant 0 : index
      %c0_56 = arith.constant 0 : index
      %63 = vector.load %arg7[%c0_55, %c0_56] : memref<288x64xf32, #tpu.memory_space<vmem>>, vector<288x64xf32>
      tpu.vector_store %arg7[%c0_55, %c0_56], %62 {strides = array<i32>} : memref<288x64xf32, #tpu.memory_space<vmem>>, vector<288x64xf32>,
    } else {
    }
    %c0 = arith.constant 0 : index
    %c0_1 = arith.constant 0 : index
    %c0_2 = arith.constant 0 : index
    %3 = vector.load %arg3[%c0, %c0_1, %c0_2] : memref<1x342x3xbf16, #tpu.memory_space<vmem>>, vector<1x288x3xbf16>
    %4 = vector.shape_cast %3 : vector<1x288x3xbf16> to vector<288x3xbf16>
    %c0_3 = arith.constant 0 : index
    %c0_4 = arith.constant 0 : index
    %c0_5 = arith.constant 0 : index
    %5 = vector.load %arg4[%c0_3, %c0_4, %c0_5] : memref<9x3x64xbf16, #tpu.memory_space<vmem>>, vector<1x3x64xbf16>
    %6 = vector.shape_cast %5 : vector<1x3x64xbf16> to vector<3x64xbf16>
    %cst = arith.constant dense<0.000000e+00> : vector<288x64xf32>
    %7 = tpu.matmul %4, %6, %cst {dimension_numbers = #tpu.dot_dimension_numbers<[1], [0], [0], [1], [0, 0, 1, 1], [], []>} : vector<288x3xbf16>, vector<3x64xbf16>, vector<288x64xf32> -> vector<288x64xf32>
    %c0_6 = arith.constant 0 : index
    %c1 = arith.constant 1 : index
    %c0_7 = arith.constant 0 : index
    %8 = vector.load %arg3[%c0_6, %c1, %c0_7] : memref<1x342x3xbf16, #tpu.memory_space<vmem>>, vector<1x288x3xbf16>
    %9 = vector.shape_cast %8 : vector<1x288x3xbf16> to vector<288x3xbf16>
    %c1_8 = arith.constant 1 : index
    %c0_9 = arith.constant 0 : index
    %c0_10 = arith.constant 0 : index
    %10 = vector.load %arg4[%c1_8, %c0_9, %c0_10] : memref<9x3x64xbf16, #tpu.memory_space<vmem>>, vector<1x3x64xbf16>
    %11 = vector.shape_cast %10 : vector<1x3x64xbf16> to vector<3x64xbf16>
    %cst_11 = arith.constant dense<0.000000e+00> : vector<288x64xf32>
    %12 = tpu.matmul %9, %11, %cst_11 {dimension_numbers = #tpu.dot_dimension_numbers<[1], [0], [0], [1], [0, 0, 1, 1], [], []>} : vector<288x3xbf16>, vector<3x64xbf16>, vector<288x64xf32> -> vector<288x64xf32>
    %13 = arith.addf %7, %12 : vector<288x64xf32>
    %c0_12 = arith.constant 0 : index
    %c2 = arith.constant 2 : index
    %c0_13 = arith.constant 0 : index
    %14 = vector.load %arg3[%c0_12, %c2, %c0_13] : memref<1x342x3xbf16, #tpu.memory_space<vmem>>, vector<1x288x3xbf16>
    %15 = vector.shape_cast %14 : vector<1x288x3xbf16> to vector<288x3xbf16>
    %c2_14 = arith.constant 2 : index
    %c0_15 = arith.constant 0 : index
    %c0_16 = arith.constant 0 : index
    %16 = vector.load %arg4[%c2_14, %c0_15, %c0_16] : memref<9x3x64xbf16, #tpu.memory_space<vmem>>, vector<1x3x64xbf16>
    %17 = vector.shape_cast %16 : vector<1x3x64xbf16> to vector<3x64xbf16>
    %cst_17 = arith.constant dense<0.000000e+00> : vector<288x64xf32>
    %18 = tpu.matmul %15, %17, %cst_17 {dimension_numbers = #tpu.dot_dimension_numbers<[1], [0], [0], [1], [0, 0, 1, 1], [], []>} : vector<288x3xbf16>, vector<3x64xbf16>, vector<288x64xf32> -> vector<288x64xf32>
    %19 = arith.addf %13, %18 : vector<288x64xf32>
    %c0_18 = arith.constant 0 : index
    %c18 = arith.constant 18 : index
    %c0_19 = arith.constant 0 : index
    %20 = vector.load %arg3[%c0_18, %c18, %c0_19] : memref<1x342x3xbf16, #tpu.memory_space<vmem>>, vector<1x288x3xbf16>
    %21 = vector.shape_cast %20 : vector<1x288x3xbf16> to vector<288x3xbf16>
    %c3 = arith.constant 3 : index
    %c0_20 = arith.constant 0 : index
    %c0_21 = arith.constant 0 : index
    %22 = vector.load %arg4[%c3, %c0_20, %c0_21] : memref<9x3x64xbf16, #tpu.memory_space<vmem>>, vector<1x3x64xbf16>
    %23 = vector.shape_cast %22 : vector<1x3x64xbf16> to vector<3x64xbf16>
    %cst_22 = arith.constant dense<0.000000e+00> : vector<288x64xf32>
    %24 = tpu.matmul %21, %23, %cst_22 {dimension_numbers = #tpu.dot_dimension_numbers<[1], [0], [0], [1], [0, 0, 1, 1], [], []>} : vector<288x3xbf16>, vector<3x64xbf16>, vector<288x64xf32> -> vector<288x64xf32>
    %25 = arith.addf %19, %24 : vector<288x64xf32>
    %c0_23 = arith.constant 0 : index
    %c19 = arith.constant 19 : index
    %c0_24 = arith.constant 0 : index
    %26 = vector.load %arg3[%c0_23, %c19, %c0_24] : memref<1x342x3xbf16, #tpu.memory_space<vmem>>, vector<1x288x3xbf16>
    %27 = vector.shape_cast %26 : vector<1x288x3xbf16> to vector<288x3xbf16>
    %c4 = arith.constant 4 : index
    %c0_25 = arith.constant 0 : index
    %c0_26 = arith.constant 0 : index
    %28 = vector.load %arg4[%c4, %c0_25, %c0_26] : memref<9x3x64xbf16, #tpu.memory_space<vmem>>, vector<1x3x64xbf16>
    %29 = vector.shape_cast %28 : vector<1x3x64xbf16> to vector<3x64xbf16>
    %cst_27 = arith.constant dense<0.000000e+00> : vector<288x64xf32>
    %30 = tpu.matmul %27, %29, %cst_27 {dimension_numbers = #tpu.dot_dimension_numbers<[1], [0], [0], [1], [0, 0, 1, 1], [], []>} : vector<288x3xbf16>, vector<3x64xbf16>, vector<288x64xf32> -> vector<288x64xf32>
    %31 = arith.addf %25, %30 : vector<288x64xf32>
    %c0_28 = arith.constant 0 : index
    %c20 = arith.constant 20 : index
    %c0_29 = arith.constant 0 : index
    %32 = vector.load %arg3[%c0_28, %c20, %c0_29] : memref<1x342x3xbf16, #tpu.memory_space<vmem>>, vector<1x288x3xbf16>
    %33 = vector.shape_cast %32 : vector<1x288x3xbf16> to vector<288x3xbf16>
    %c5 = arith.constant 5 : index
    %c0_30 = arith.constant 0 : index
    %c0_31 = arith.constant 0 : index
    %34 = vector.load %arg4[%c5, %c0_30, %c0_31] : memref<9x3x64xbf16, #tpu.memory_space<vmem>>, vector<1x3x64xbf16>
    %35 = vector.shape_cast %34 : vector<1x3x64xbf16> to vector<3x64xbf16>
    %cst_32 = arith.constant dense<0.000000e+00> : vector<288x64xf32>
    %36 = tpu.matmul %33, %35, %cst_32 {dimension_numbers = #tpu.dot_dimension_numbers<[1], [0], [0], [1], [0, 0, 1, 1], [], []>} : vector<288x3xbf16>, vector<3x64xbf16>, vector<288x64xf32> -> vector<288x64xf32>
    %37 = arith.addf %31, %36 : vector<288x64xf32>
    %c0_33 = arith.constant 0 : index
    %c36 = arith.constant 36 : index
    %c0_34 = arith.constant 0 : index
    %38 = vector.load %arg3[%c0_33, %c36, %c0_34] : memref<1x342x3xbf16, #tpu.memory_space<vmem>>, vector<1x288x3xbf16>
    %39 = vector.shape_cast %38 : vector<1x288x3xbf16> to vector<288x3xbf16>
    %c6 = arith.constant 6 : index
    %c0_35 = arith.constant 0 : index
    %c0_36 = arith.constant 0 : index
    %40 = vector.load %arg4[%c6, %c0_35, %c0_36] : memref<9x3x64xbf16, #tpu.memory_space<vmem>>, vector<1x3x64xbf16>
    %41 = vector.shape_cast %40 : vector<1x3x64xbf16> to vector<3x64xbf16>
    %cst_37 = arith.constant dense<0.000000e+00> : vector<288x64xf32>
    %42 = tpu.matmul %39, %41, %cst_37 {dimension_numbers = #tpu.dot_dimension_numbers<[1], [0], [0], [1], [0, 0, 1, 1], [], []>} : vector<288x3xbf16>, vector<3x64xbf16>, vector<288x64xf32> -> vector<288x64xf32>
    %43 = arith.addf %37, %42 : vector<288x64xf32>
    %c0_38 = arith.constant 0 : index
    %c37 = arith.constant 37 : index
    %c0_39 = arith.constant 0 : index
    %44 = vector.load %arg3[%c0_38, %c37, %c0_39] : memref<1x342x3xbf16, #tpu.memory_space<vmem>>, vector<1x288x3xbf16>
    %45 = vector.shape_cast %44 : vector<1x288x3xbf16> to vector<288x3xbf16>
    %c7 = arith.constant 7 : index
    %c0_40 = arith.constant 0 : index
    %c0_41 = arith.constant 0 : index
    %46 = vector.load %arg4[%c7, %c0_40, %c0_41] : memref<9x3x64xbf16, #tpu.memory_space<vmem>>, vector<1x3x64xbf16>
    %47 = vector.shape_cast %46 : vector<1x3x64xbf16> to vector<3x64xbf16>
    %cst_42 = arith.constant dense<0.000000e+00> : vector<288x64xf32>
    %48 = tpu.matmul %45, %47, %cst_42 {dimension_numbers = #tpu.dot_dimension_numbers<[1], [0], [0], [1], [0, 0, 1, 1], [], []>} : vector<288x3xbf16>, vector<3x64xbf16>, vector<288x64xf32> -> vector<288x64xf32>
    %49 = arith.addf %43, %48 : vector<288x64xf32>
    %c0_43 = arith.constant 0 : index
    %c38 = arith.constant 38 : index
    %c0_44 = arith.constant 0 : index
    %50 = vector.load %arg3[%c0_43, %c38, %c0_44] : memref<1x342x3xbf16, #tpu.memory_space<vmem>>, vector<1x288x3xbf16>
    %51 = vector.shape_cast %50 : vector<1x288x3xbf16> to vector<288x3xbf16>
    %c8 = arith.constant 8 : index
    %c0_45 = arith.constant 0 : index
    %c0_46 = arith.constant 0 : index
    %52 = vector.load %arg4[%c8, %c0_45, %c0_46] : memref<9x3x64xbf16, #tpu.memory_space<vmem>>, vector<1x3x64xbf16>
    %53 = vector.shape_cast %52 : vector<1x3x64xbf16> to vector<3x64xbf16>
    %cst_47 = arith.constant dense<0.000000e+00> : vector<288x64xf32>
    %54 = tpu.matmul %51, %53, %cst_47 {dimension_numbers = #tpu.dot_dimension_numbers<[1], [0], [0], [1], [0, 0, 1, 1], [], []>} : vector<288x3xbf16>, vector<3x64xbf16>, vector<288x64xf32> -> vector<288x64xf32>
    %55 = arith.addf %49, %54 : vector<288x64xf32>
    %c0_48 = arith.constant 0 : index
    %c0_49 = arith.constant 0 : index
    %56 = vector.load %arg7[%c0_48, %c0_49] : memref<288x64xf32, #tpu.memory_space<vmem>>, vector<288x64xf32>
    %57 = arith.addf %56, %55 : vector<288x64xf32>
    %c0_50 = arith.constant 0 : index
    %c0_51 = arith.constant 0 : index
    %58 = vector.load %arg7[%c0_50, %c0_51] : memref<288x64xf32, #tpu.memory_space<vmem>>, vector<288x64xf32>
    tpu.vector_store %arg7[%c0_50, %c0_51], %57 {strides = array<i32>} : memref<288x64xf32, #tpu.memory_space<vmem>>, vector<288x64xf32>,
    %c0_i32_52 = arith.constant 0 : i32
    %59 = arith.cmpi eq, %arg2, %c0_i32_52 : i32
    %60 = arith.extui %59 : i1 to i32
    %c0_i32_53 = arith.constant 0 : i32
    %61 = arith.cmpi ne, %60, %c0_i32_53 : i32
    scf.if %61 {
      %c0_54 = arith.constant 0 : index
      %c0_55 = arith.constant 0 : index
      %62 = vector.load %arg7[%c0_54, %c0_55] : memref<288x64xf32, #tpu.memory_space<vmem>>, vector<288x64xf32>
      %c0_56 = arith.constant 0 : index
      %c0_57 = arith.constant 0 : index
      %63 = vector.load %arg5[%c0_56, %c0_57] : memref<1x64xf32, #tpu.memory_space<vmem>>, vector<1x64xf32>
      %64 = vector.broadcast %63 : vector<1x64xf32> to vector<288x64xf32>
      %65 = arith.addf %62, %64 : vector<288x64xf32>
      %cst_58 = arith.constant 0.000000e+00 : f32
      %66 = vector.broadcast %cst_58 : f32 to vector<288x64xf32>
      %67 = arith.maximumf %65, %66 : vector<288x64xf32>
      %68 = vector.shape_cast %67 : vector<288x64xf32> to vector<1x288x64xf32>
      %69 = arith.truncf %68 : vector<1x288x64xf32> to vector<1x288x64xbf16>
      %c0_59 = arith.constant 0 : index
      %c0_60 = arith.constant 0 : index
      %c0_61 = arith.constant 0 : index
      %70 = vector.load %arg6[%c0_59, %c0_60, %c0_61] : memref<1x288x64xbf16, #tpu.memory_space<vmem>>, vector<1x288x64xbf16>
      tpu.vector_store %arg6[%c0_59, %c0_60, %c0_61], %69 {strides = array<i32>} : memref<1x288x64xbf16, #tpu.memory_space<vmem>>, vector<1x288x64xbf16>,
    } else {
    }
    return
  }
  func.func @transform_0(%arg0: i32, %arg1: i32, %arg2: i32) -> (i32, i32, i32) {
    %c0_i32 = arith.constant 0 : i32
    %c0_i32_0 = arith.constant 0 : i32
    return %arg0, %c0_i32, %arg2 : i32, i32, i32
  }
  func.func @transform_1(%arg0: i32, %arg1: i32, %arg2: i32) -> (i32, i32, i32) {
    %c0_i32 = arith.constant 0 : i32
    %c0_i32_0 = arith.constant 0 : i32
    return %c0_i32, %arg2, %arg1 : i32, i32, i32
  }
  func.func @transform_2(%arg0: i32, %arg1: i32, %arg2: i32) -> (i32, i32) {
    %c0_i32 = arith.constant 0 : i32
    %c0_i32_0 = arith.constant 0 : i32
    return %c0_i32, %arg1 : i32, i32
  }
  func.func @transform_3(%arg0: i32, %arg1: i32, %arg2: i32) -> (i32, i32, i32) {
    %c0_i32 = arith.constant 0 : i32
    %c0_i32_0 = arith.constant 0 : i32
    return %arg0, %c0_i32, %arg1 : i32, i32, i32
  }
}

</mosaic_0001>

<bundles_post_ra>
// kernel: conv3x3_s1_bn.1
= control target key start
LH: loop header
LB: loop body
LE: loop exit
PB: predicated region body
PF: predicated region fallthrough
CT: control target
= control target key end

     0   :  { %s3998_s12 = smov 0   ;;  %s4000_s13 = smov 0   ;;  %s5387_s0 = inlined_call_operand.vmem [shape: bf16[2,342,3], index: 0, kind: input, shape index: {}]   ;;  %s5388_s1 = inlined_call_operand.vmem [shape: bf16[9,3,64], index: 1, kind: input, shape index: {}]   ;;  %s5389_s2 = inlined_call_operand.vmem [shape: f32[1,64], index: 2, kind: input, shape index: {}]   ;;  %s5390_s3 = inlined_call_operand.vmem [shape: bf16[2,288,64], index: 3, kind: output, shape index: {}]  }
   0x1   :  { %s4002_s14 = smov 0  }
   0x2 LB: > { %s32_s15 = sadd.s32 1, %s3970_s13  ;;  %p3462_p0 = scmp.ge.s32.totalorder %s3974_s14, 1  ;;  %s3974_s14 = sphi %s4002_s14, %s13_s14   ;;  %s3970_s13 = sphi %s4000_s13, %s5416_s13   ;;  %s3966_s12 = sphi %s3998_s12, %s5415_s12  }
   0x3   : > { %p34_p1 = scmp.ge.s32.totalorder %s32_s15, 2  ;;  %p185_p2 = scmp.lt.s32.totalorder %s3974_s14, 3 }
   0x5   : > { %s5418_s15 = smov (%p34_p1, %s32_s15), 0  ;;  %p186_p3 = pnand %p3462_p0, %p185_p2 }
   0x7   : > { %189 = sbr.rel (%p186_p3) target bundleno = 830 (0x33e), region = 32 }
   0xc   : > { %v3465_v0 = vld [vmem:[%s5388_s1 + $0x2] sm:$0x3]  ;;  %vm630_vm0 = vcmask 1040384   ;;  %vm631_vm1 = vcmask 1041408   ;;  %p225_p4 = scmp.lt.s32.totalorder %s3966_s12, 1  ;;  %v3976_v1 = vmov 65535  }
   0xd   : > { %v632_v2 = vsel %vm630_vm0, 4294967295, %v3976_v1  ;;  %v3570_v3 = vld [vmem:[%s5388_s1 + $0x4] sm:$0x3]  ;;  %v329_v5 = vld [vmem:[%s5388_s1] sm:$0x3]  ;;  %vm575_vm3 = vcmask 23552  }
   0xe   : > { %v4022_v4 = vsel %vm631_vm1, %v632_v2, 0  ;;  %s5420_s12 = smov (!%p225_p4, %s3966_s12), 1  ;;  %v3676_v6 = vld [vmem:[%s5388_s1 + $0x8] sm:$0x3]  ;;  %vm426_vm2 = vsmask.f32 7424 }
   0xf   : > { %v635_v7 = vand.u32 %v3465_v0, %v4022_v4  ;;  %v973_v8 = vand.u32 %v3570_v3, %v4022_v4  ;;  %v773_v9 = vand.u32 %v4022_v4, %v329_v5  ;;  %v1703_v10 = vand.u32 %v3676_v6, %v4022_v4  ;;  %s3902_s24 = smul.u32 172, %s5420_s12  ;;  %v3589_v48 = vld [vmem:[%s5388_s1 + $0x6] sm:$0x3] }
  0x10   : > { %v1334_v56 = vand.u32 %v3589_v48, %v4022_v4  ;;  %vm880_vm4 = vcmask 1046528   ;;  %vm1477_vm5 = vsmask.f32 6400  ;;  %vm2443_vm6 = vsmask.f32 5376  ;;  %s3903_s17 = smul.u32 144, %s5420_s12 }
  0x11   : > { %3899 = vmatpush.bf16.msra.mxu1 %v635_v7  ;;  %3900 = vmatpush.bf16.msra.mxu2 %v635_v7  ;;  %s4040_s27 = scalar_lea.vmem %s5387_s0, %s3902_s24  ;;  %vm1846_vm7 = vcmask 1045504   ;;  %vm2812_vm8 = vcmask 1044480   ;;  %vm256_vm9 = vcmask 523264   ;;  %vm3302_vm10 = vcmask 519168  }
  0x12   : > { %644 = vmatpush.bf16.msra.mxu0 %v635_v7  ;;  %v4043_v11 = vld [vmem:[%s4040_s27 + $0x28] sm:$0xff]  ;;  %v4046_v12 = vld [vmem:[%s4040_s27 + $0x30] sm:$0xff]  ;;  %v4052_v14 = vld [vmem:[%s4040_s27 + $0x58] sm:$0xff]  ;;  %3901 = vmatpush.bf16.msra.mxu3 %v635_v7  ;;  %s4939_s19 = scalar_lea.vmem %s5390_s3, %s3903_s17 }
  0x13   : > { %v4049_v13 = vld [vmem:[%s4040_s27 + $0x50] sm:$0xff]  ;;  %v4055_v15 = vld [vmem:[%s4040_s27] sm:$0xff]   ;;  %v4058_v16 = vld [vmem:[%s4040_s27 + $0x8] sm:$0xff]  ;;  %v467_v17 = vshll.u32 %v4043_v11, 16  ;;  %v471_v18 = vshrl.u32 %v4043_v11, 16  ;;  %v475_v19 = vshll.u32 %v4046_v12, 16 }
  0x14   : > { %v507_v20 = vshll.u32 %v4049_v13, 16  ;;  %v511_v21 = vshrl.u32 %v4049_v13, 16  ;;  %v515_v22 = vshll.u32 %v4052_v14, 16  ;;  %v428_v23 = vshrl.u32 %v4055_v15, 16  ;;  %v4076_v34 = vld [vmem:[%s4040_s27 + $0x78] sm:$0xff]  ;;  %v3856_v35 = vld [vmem:[%s4040_s27 + $0x80] sm:$0xff] }
  0x15   : > { %982 = vmatpush.bf16.msrb.mxu2 %v973_v8  ;;  %782 = vmatpush.bf16.msrb.mxu1 %v773_v9  ;;  %v430_v24 = vshll.u32 %v4055_v15, 16  ;;  %v4068_v25 = vrot.slane %v467_v17, 1  ;;  %v477_v26 = vrot.slane %v475_v19, 1  ;;  %v435_v28 = vshll.u32 %v4058_v16, 16  ;;  %v4085_v40 = vld [vmem:[%s4040_s27 + $0x38] sm:$0xff]  ;;  %v4089_v41 = vld [vmem:[%s4040_s27 + $0x60] sm:$0xff] }
  0x16   : > { %1712 = vmatpush.bf16.msrb.mxu0 %v1703_v10  ;;  %v4070_v27 = vrot.slane %v507_v20, 1  ;;  %v517_v29 = vrot.slane %v515_v22, 1  ;;  %v547_v42 = vshll.u32 %v4076_v34, 16  ;;  %v551_v43 = vshrl.u32 %v4076_v34, 16  ;;  %v4094_v45 = vld [vmem:[%s4040_s27 + $0x10] sm:$0xff]  ;;  %1343 = vmatpush.bf16.msrb.mxu3 %v1334_v56  ;;  %v3857_v62 = vld [vmem:[%s4040_s27 + $0x88] sm:$0xff] }
  0x17   : > { %v432_v30 = vrot.slane %v430_v24, 1  ;;  %v473_v31 = vor.u32 %v471_v18, %v4068_v25  ;;  %v437_v33 = vrot.slane %v435_v28, 1  ;;  %v555_v44 = vshll.u32 %v3856_v35, 16  ;;  %v4113_v63 = vld [vmem:[%s4040_s27 + $0x48] sm:$0xff]  ;;  %v4122_v9 = vld [vmem:[%s4040_s27 + $0x40] sm:$0xff]  ;;  %v4160_v56 = vld [vmem:[%s4040_s27 + $0x70] sm:$0xff] }
  0x18   : > { %v513_v32 = vor.u32 %v511_v21, %v4070_v27  ;;  %v4096_v46 = vrot.slane %v547_v42, 1  ;;  %v479_v49 = vshrl.u32 %v4046_v12, 16  ;;  %v483_v50 = vshll.u32 %v4085_v40, 16  ;;  %v4125_v10 = vld [vmem:[%s4040_s27 + $0x68] sm:$0xff]  ;;  %v4130_v21 = vld [vmem:[%s4040_s27 + $0x18] sm:$0xff] }
  0x19   : > { %v433_v36 = vor.u32 %v432_v30, %v428_v23  ;;  %v478_v37 = vsel %vm426_vm2, %v473_v31, %v477_v26  ;;  %v557_v47 = vrot.slane %v555_v44, 1  ;;  %v519_v51 = vshrl.u32 %v4052_v14, 16  ;;  %v330_v22 = vld [vmem:[%s4040_s27 + $0x90] sm:$0x1]  ;;  %v4139_v31 = vld [vmem:[%s4040_s27 + $0x20] sm:$0xff] }
  0x1a   : > { %v518_v38 = vsel %vm426_vm2, %v513_v32, %v517_v29  ;;  %3539 = vmatmul.msk.bf16.vlgmr.msra.gmra.mxu1 %vm575_vm3, %v478_v37  ;;  %v523_v52 = vshll.u32 %v4089_v41, 16  ;;  %v553_v53 = vor.u32 %v551_v43, %v4096_v46  ;;  %v439_v54 = vshrl.u32 %v4058_v16, 16 }
  0x1b   : > { %3544 = vmatmul.msk.bf16.vlgmr.msra.gmra.mxu2 %vm575_vm3, %v518_v38  ;;  %v438_v39 = vsel %vm426_vm2, %v433_v36, %v437_v33  ;;  %v443_v55 = vshll.u32 %v4094_v45, 16  ;;  %v481_v58 = vor.u32 %v479_v49, %v477_v26  ;;  %v485_v59 = vrot.slane %v483_v50, 1 }
  0x1c   : > { %3534 = vmatmul.msk.bf16.vlgmr.msra.gmra.mxu0 %vm575_vm3, %v438_v39  ;;  %v558_v57 = vsel %vm426_vm2, %v553_v53, %v557_v47  ;;  %v521_v60 = vor.u32 %v519_v51, %v517_v29  ;;  %v525_v61 = vrot.slane %v523_v52, 1  ;;  %v441_v0 = vor.u32 %v439_v54, %v437_v33 }
  0x1d   : > { %3549 = vmatmul.msk.bf16.vlgmr.msra.gmra.mxu3 %vm575_vm3, %v558_v57  ;;  %v445_v1 = vrot.slane %v443_v55, 1  ;;  %v486_v2 = vsel %vm426_vm2, %v481_v58, %v485_v59  ;;  %v559_v5 = vshrl.u32 %v3856_v35, 16  ;;  %v563_v6 = vshll.u32 %v3857_v62, 16 }
  0x1e   : > { %v526_v3 = vsel %vm426_vm2, %v521_v60, %v525_v61  ;;  %v499_v7 = vshll.u32 %v4113_v63, 16  ;;  %v503_v20 = vshrl.u32 %v4113_v63, 16  ;;  %v487_v24 = vshrl.u32 %v4085_v40, 16 }
  0x1f   : > { %v446_v8 = vsel %vm426_vm2, %v441_v0, %v445_v1  ;;  %v561_v17 = vor.u32 %v559_v5, %v557_v47  ;;  %v565_v18 = vrot.slane %v563_v6, 1  ;;  %v491_v26 = vshll.u32 %v4122_v9, 16 }
  0x20   : > { %v501_v19 = vrot.slane %v499_v7, 1  ;;  %v527_v28 = vshrl.u32 %v4089_v41, 16  ;;  %v531_v29 = vshll.u32 %v4125_v10, 16  ;;  %v406_v32 = vunpack.c.l.b16 %v330_v22  ;;  %v3858_v22 = vld [vmem:[%s4040_s27 + $0x10] sm:$0xff] }
  0x21   : > { %v566_v30 = vsel %vm426_vm2, %v561_v17, %v565_v18  ;;  %v447_v35 = vshrl.u32 %v4094_v45, 16  ;;  %v451_v36 = vshll.u32 %v4130_v21, 16  ;;  %v489_v37 = vor.u32 %v487_v24, %v485_v59 }
  0x22   : > { %v505_v23 = vor.u32 %v503_v20, %v501_v19  ;;  %v493_v38 = vrot.slane %v491_v26, 1  ;;  %v529_v39 = vor.u32 %v527_v28, %v525_v61  ;;  %v533_v42 = vrot.slane %v531_v29, 1  ;;  %v3714_v26 = vld [vmem:[%s5388_s1 + $0xc] sm:$0x3] }
  0x23   : > { %v459_v43 = vshll.u32 %v4139_v31, 16  ;;  %v4149_v44 = vpack.c.b16 %v406_v32, %v406_v32  ;;  %v449_v47 = vor.u32 %v447_v35, %v445_v1  ;;  %v453_v48 = vrot.slane %v451_v36, 1  ;;  %v3695_v32 = vld [vmem:[%s5388_s1 + $0xa] sm:$0x3] }
  0x24   : > { %v4143_v33 = vsel %vm426_vm2, %v505_v23, %v4070_v27  ;;  %v494_v27 = vsel %vm426_vm2, %v489_v37, %v493_v38  ;;  %v534_v49 = vsel %vm426_vm2, %v529_v39, %v533_v42  ;;  %v567_v51 = vshrl.u32 %v3857_v62, 16  ;;  %v3820_v37 = vld [vmem:[%s5388_s1 + $0x10] sm:$0x3] }
  0x25   : > { %v461_v50 = vrot.slane %v459_v43, 1  ;;  %v571_v52 = vshll.u32 %v4149_v44, 16  ;;  %v463_v53 = vshrl.u32 %v4139_v31, 16  ;;  %v454_v54 = vsel %vm426_vm2, %v449_v47, %v453_v48 }
  0x26   : > { %v569_v57 = vor.u32 %v567_v51, %v565_v18  ;;  %v495_v60 = vshrl.u32 %v4122_v9, 16  ;;  %v535_v61 = vshrl.u32 %v4125_v10, 16  ;;  %v539_v62 = vshll.u32 %v4160_v56, 16 }
  0x27   : > { %v465_v55 = vor.u32 %v463_v53, %v461_v50  ;;  %v573_v58 = vrot.slane %v571_v52, 1  ;;  %v455_v1 = vshrl.u32 %v4130_v21, 16  ;;  %v2300_v29 = vand.u32 %v3714_v26, %v4022_v4 }
  0x28   : > { %v497_v5 = vor.u32 %v495_v60, %v493_v38  ;;  %v537_v6 = vor.u32 %v535_v61, %v533_v42  ;;  %v541_v7 = vrot.slane %v539_v62, 1  ;;  %v1939_v36 = vand.u32 %v3695_v32, %v4022_v4 }
  0x29   : > { %v470_v59 = vsel %vm426_vm2, %v465_v55, %v4068_v25  ;;  %v574_v0 = vsel %vm426_vm2, %v569_v57, %v573_v58  ;;  %v457_v17 = vor.u32 %v455_v1, %v453_v48  ;;  %2309 = vmatpush.bf16.msra.mxu2 %v2300_v29  ;;  %v2905_v38 = vand.u32 %v3820_v37, %v4022_v4  ;;  %v3859_v48 = vld [vmem:[%s4040_s27 + $0x18] sm:$0xff]  ;;  %v3860_v1 = vld [vmem:[%s4040_s27 + $0x20] sm:$0xff] }
  0x2a   : > { %3540 = vmatmul.msk.bf16.gmra.mxu1 %vm575_vm3, %v486_v2  ;;  %v1110_v2 = vld [vmem:[%s4040_s27 + $0x8] sm:$0xe]  ;;  %v502_v18 = vsel %vm426_vm2, %v497_v5, %v501_v19  ;;  %v542_v20 = vsel %vm426_vm2, %v537_v6, %v541_v7  ;;  %v1243_v19 = vrot.slane %v3858_v22, 1  ;;  %v543_v39 = vshrl.u32 %v4160_v56, 16 }
  0x2b   : > { %3545 = vmatmul.msk.bf16.gmra.mxu2 %vm575_vm3, %v526_v3  ;;  %v4171_v3 = vld [vmem:[%s4040_s27 + $0xc] sm:$0xf]  ;;  %v1186_v25 = vunpack.c.l.b16 %v1110_v2  ;;  %v462_v24 = vsel %vm426_vm2, %v457_v17, %v461_v50  ;;  %1948 = vmatpush.bf16.msra.mxu1 %v1939_v36  ;;  %v1487_v52 = vshrl.u32 %v3858_v22, 16  ;;  %v1490_v53 = vshll.u32 %v3858_v22, 16 }
  0x2c   : > { %3535 = vmatmul.msk.bf16.gmra.mxu0 %vm575_vm3, %v446_v8  ;;  %v5391_v8 = vunpack.c.l.b16 %v4171_v3  ;;  %v545_v43 = vor.u32 %v543_v39, %v541_v7  ;;  %v1247_v5 = vrot.slane %v3860_v1, 1  ;;  %v1496_v6 = vshrl.u32 %v3859_v48, 16 }
  0x2d   : > { %3550 = vmatmul.msk.bf16.gmra.mxu3 %vm575_vm3, %v566_v30  ;;  %v3801_v30 = vld [vmem:[%s5388_s1 + $0xe] sm:$0x3]  ;;  %2914 = vmatpush.bf16.msra.mxu0 %v2905_v38  ;;  %v1489_v58 = vrot.slane %v1487_v52, 1  ;;  %v1492_v60 = vrot.slane %v1490_v53, 2  ;;  %v1499_v7 = vshll.u32 %v3859_v48, 16  ;;  %v3862_v38 = vld [vmem:[%s4040_s27 + $0x30] sm:$0xff] }
  0x2e   : > { %v1223_v23 = vpack.c.b16 %v5391_v8, %v1186_v25  ;;  %v2669_v35 = vand.u32 %v3801_v30, %v4022_v4  ;;  %v550_v47 = vsel %vm426_vm2, %v545_v43, %v4096_v46  ;;  %v3896_v4 = vld [vmem:[%s4040_s27] sm:$0xf0]  ;;  %v1498_v17 = vrot.slane %v1496_v6, 1 }
  0x2f   : > { %v1493_v62 = vor.u32 %v1492_v60, %v1489_v58  ;;  %v1251_v39 = vrot.slane %v3862_v38, 1  ;;  %v3864_v6 = vld [vmem:[%s4040_s27 + $0x40] sm:$0xff] }
  0x30   : > { %v1242_v28 = vrot.slane %v1223_v23, 1  ;;  %2678 = vmatpush.bf16.msra.mxu3 %v2669_v35  ;;  %v1479_v50 = vshrl.u32 %v1223_v23, 16  ;;  %v1482_v51 = vshll.u32 %v1223_v23, 16  ;;  %v886_v35 = vrot.slane %v4130_v21, 1  ;;  %v3868_v8 = vld [vmem:[%s4040_s27 + $0x60] sm:$0xff] }
  0x32   : > { %v1244_v42 = vsel %vm880_vm4, %v1242_v28, %v1243_v19  ;;  %v1481_v46 = vrot.slane %v1479_v50, 1  ;;  %v1484_v57 = vrot.slane %v1482_v51, 2  ;;  %v1505_v28 = vshrl.u32 %v3860_v1, 16  ;;  %v3863_v51 = vld [vmem:[%s4040_s27 + $0x38] sm:$0xff] }
  0x34   : > { %v1485_v61 = vor.u32 %v1484_v57, %v1481_v46  ;;  %v1507_v30 = vrot.slane %v1505_v28, 1  ;;  %v1526_v46 = vshll.u32 %v3862_v38, 16 }
  0x36   : > { %v1494_v2 = vsel %vm1477_vm5, %v1485_v61, %v1493_v62  ;;  %v1528_v61 = vrot.slane %v1526_v46, 2 }
  0x3a   : > { %3541 = vmatmul.msk.bf16.gmra.mxu1 %vm575_vm3, %v494_v27  ;;  %v1245_v27 = vrot.slane %v3859_v48, 1 }
  0x3b   : > { %3546 = vmatmul.msk.bf16.gmra.mxu2 %vm575_vm3, %v534_v49  ;;  %v3897_v49 = vld [vmem:[%s4040_s27] sm:$0xe] }
  0x3c   : > { %3536 = vmatmul.msk.bf16.gmra.mxu0 %vm575_vm3, %v454_v54  ;;  %v3898_v54 = vor.u32 %v3897_v49, %v3896_v4  ;;  %v1246_v55 = vsel %vm880_vm4, %v1243_v19, %v1245_v27  ;;  %v1248_v25 = vsel %vm880_vm4, %v1245_v27, %v1247_v5  ;;  %v1508_v19 = vshll.u32 %v3860_v1, 16 }
  0x3d   : > { %3551 = vmatmul.msk.bf16.gmra.mxu3 %vm575_vm3, %v574_v0  ;;  %v888_v27 = vrot.slane %v4139_v31, 1 }
  0x3e   : > { %v1510_v32 = vrot.slane %v1508_v19, 2  ;;  %v892_v19 = vrot.slane %v4046_v12, 1 }
  0x40   : > { %v1511_v36 = vor.u32 %v1510_v32, %v1507_v30 }
  0x4a   : > { %3542 = vmatmul.msk.bf16.gmra.mxu1 %vm575_vm3, %v502_v18  ;;  %v1501_v18 = vrot.slane %v1499_v7, 2 }
  0x4b   : > { %3547 = vmatmul.msk.bf16.gmra.mxu2 %vm575_vm3, %v542_v20  ;;  %v884_v20 = vrot.slane %v4094_v45, 1 }
  0x4c   : > { %3537 = vmatmul.msk.bf16.gmra.mxu0 %vm575_vm3, %v462_v24  ;;  %v1502_v22 = vor.u32 %v1501_v18, %v1498_v17  ;;  %v1255_v17 = vrot.slane %v3864_v6, 1  ;;  %v1532_v18 = vshrl.u32 %v3863_v51, 16 }
  0x4d   : > { %3658 = vmatmul.msk.bf16.vlgmr.msrb.gmra.mxu3 %vm575_vm3, %v1244_v42  ;;  %v887_v37 = vsel %vm880_vm4, %v884_v20, %v886_v35 }
  0x4e   : > { %v1503_v24 = vsel %vm1477_vm5, %v1493_v62, %v1502_v22  ;;  %v1534_v28 = vrot.slane %v1532_v18, 1 }
  0x5a   : > { %3543 = vmatmul.msk.bf16.gmra.mxu1 %vm575_vm3, %v4143_v33  ;;  %v881_v33 = vrot.slane %v3898_v54, 1  ;;  %v1253_v54 = vrot.slane %v3863_v51, 1 }
  0x5b   : > { %3548 = vmatmul.msk.bf16.gmra.mxu2 %vm575_vm3, %v550_v47 }
  0x5c   : > { %3538 = vmatmul.msk.bf16.gmra.mxu0 %vm575_vm3, %v470_v59  ;;  %v882_v59 = vrot.slane %v4058_v16, 1  ;;  %v1254_v60 = vsel %vm880_vm4, %v1251_v39, %v1253_v54 }
  0x5d   : > { %3659 = vmatmul.msk.bf16.gmra.mxu3 %vm575_vm3, %v1246_v55  ;;  %v1523_v55 = vshrl.u32 %v3862_v38, 16 }
  0x5e   : > { %v883_v0 = vsel %vm880_vm4, %v881_v33, %v882_v59  ;;  %v885_v23 = vsel %vm880_vm4, %v882_v59, %v884_v20  ;;  %v1535_v20 = vshll.u32 %v3863_v51, 16  ;;  %v894_v51 = vrot.slane %v4085_v40, 1 }
  0x5f   : > { %v1525_v59 = vrot.slane %v1523_v55, 1 }
  0x61   : > { %v1529_v62 = vor.u32 %v1528_v61, %v1525_v59  ;;  %v3866_v59 = vld [vmem:[%s4040_s27 + $0x50] sm:$0xff] }
  0x6a   : > { %3552 = vmatmul.msk.bf16.vlgmr.msrb.gmra.mxu1 %vm575_vm3, %v4055_v15  ;;  %v3861_v15 = vld [vmem:[%s4040_s27 + $0x28] sm:$0xff] }
  0x6b   : > { %3571 = vmatmul.msk.bf16.vlgmr.msrb.gmra.mxu2 %vm575_vm3, %v883_v0  ;;  %v1249_v26 = vrot.slane %v3861_v15, 1  ;;  %v1514_v42 = vshrl.u32 %v3861_v15, 16  ;;  %v1517_v43 = vshll.u32 %v3861_v15, 16 }
  0x6c   : > { %3677 = vmatmul.msk.bf16.vlgmr.msrb.gmra.mxu0 %vm575_vm3, %v1494_v2 }
  0x6d   : > { %3660 = vmatmul.msk.bf16.gmra.mxu3 %vm575_vm3, %v1248_v25  ;;  %v1250_v29 = vsel %vm880_vm4, %v1247_v5, %v1249_v26  ;;  %v1252_v47 = vsel %vm880_vm4, %v1249_v26, %v1251_v39  ;;  %v1516_v48 = vrot.slane %v1514_v42, 1  ;;  %v1519_v4 = vrot.slane %v1517_v43, 2 }
  0x6e   : > { %v1541_v42 = vshrl.u32 %v3864_v6, 16  ;;  %v1544_v43 = vshll.u32 %v3864_v6, 16 }
  0x6f   : > { %v1520_v49 = vor.u32 %v1519_v4, %v1516_v48 }
  0x71   : > { %v1521_v53 = vsel %vm1477_vm5, %v1511_v36, %v1520_v49  ;;  %v1530_v25 = vsel %vm1477_vm5, %v1520_v49, %v1529_v62 }
  0x7a   : > { %3553 = vmatmul.msk.bf16.gmra.mxu1 %vm575_vm3, %v4058_v16  ;;  %v1512_v16 = vsel %vm1477_vm5, %v1502_v22, %v1511_v36 }
  0x7b   : > { %3572 = vmatmul.msk.bf16.gmra.mxu2 %vm575_vm3, %v885_v23 }
  0x7c   : > { %3678 = vmatmul.msk.bf16.gmra.mxu0 %vm575_vm3, %v1503_v24  ;;  %v1256_v24 = vsel %vm880_vm4, %v1253_v54, %v1255_v17 }
  0x7d   : > { %3661 = vmatmul.msk.bf16.gmra.mxu3 %vm575_vm3, %v1250_v29 }
  0x8a   : > { %3554 = vmatmul.msk.bf16.gmra.mxu1 %vm575_vm3, %v4094_v45  ;;  %v889_v45 = vsel %vm880_vm4, %v886_v35, %v888_v27 }
  0x8b   : > { %3573 = vmatmul.msk.bf16.gmra.mxu2 %vm575_vm3, %v887_v37  ;;  %v3865_v37 = vld [vmem:[%s4040_s27 + $0x48] sm:$0xff] }
  0x8c   : > { %3679 = vmatmul.msk.bf16.gmra.mxu0 %vm575_vm3, %v1512_v16  ;;  %v1257_v39 = vrot.slane %v3865_v37, 1  ;;  %v1553_v6 = vshll.u32 %v3865_v37, 16 }
  0x8d   : > { %3662 = vmatmul.msk.bf16.gmra.mxu3 %vm575_vm3, %v1252_v47 }
  0x97   : > { %v4245_v50 = vpop.f32.mrf.mxu1 }
  0x99   : > { %v4249_v52 = vpop.f32.mrf.mxu0 }
  0x9a   : > { %3555 = vmatmul.msk.bf16.gmra.mxu1 %vm575_vm3, %v4130_v21  ;;  %v890_v21 = vrot.slane %v4043_v11, 1 }
  0x9b   : > { %3574 = vmatmul.msk.bf16.gmra.mxu2 %vm575_vm3, %v889_v45  ;;  %v1543_v45 = vrot.slane %v1541_v42, 1  ;;  %v3867_v42 = vld [vmem:[%s4040_s27 + $0x58] sm:$0xff] }
  0x9c   : > { %3680 = vmatmul.msk.bf16.gmra.mxu0 %vm575_vm3, %v1521_v53  ;;  %v891_v5 = vsel %vm880_vm4, %v888_v27, %v890_v21  ;;  %v893_v36 = vsel %vm880_vm4, %v890_v21, %v892_v19  ;;  %v1258_v27 = vsel %vm880_vm4, %v1255_v17, %v1257_v39 }
  0x9d   : > { %3663 = vmatmul.msk.bf16.gmra.mxu3 %vm575_vm3, %v1254_v60  ;;  %v895_v60 = vsel %vm880_vm4, %v892_v19, %v894_v51 }
  0x9e   : > { %v4256_v57 = vpop.f32.mrf.mxu2 }
  0x9f   : > { %v4258_v58 = vpop.f32.mrf.mxu1 }
  0xa0   : > { %v4267_v1 = vpop.f32.mrf.mxu3 }
  0xa1   : > { %v4261_v33 = vpop.f32.mrf.mxu0  ;;  %5393 = vst [vmem:[#allocation3_spill] sm:$0xff] %v4267_v1 }
  0xa6   : > { %v4265_v0 = vpop.f32.mrf.mxu2 }
  0xa7   : > { %v4269_v2 = vpop.f32.mrf.mxu1 }
  0xa8   : > { %v4282_v23 = vpop.f32.mrf.mxu3 }
  0xa9   : > { %v4273_v7 = vpop.f32.mrf.mxu0  ;;  %5394 = vst [vmem:[#allocation4_spill] sm:$0xff] %v4282_v23 }
  0xaa   : > { %3556 = vmatmul.msk.bf16.gmra.mxu1 %vm575_vm3, %v4139_v31  ;;  %v1537_v31 = vrot.slane %v1535_v20, 2 }
  0xab   : > { %3575 = vmatmul.msk.bf16.gmra.mxu2 %vm575_vm3, %v891_v5  ;;  %v1550_v5 = vshrl.u32 %v3865_v37, 16 }
  0xac   : > { %3681 = vmatmul.msk.bf16.gmra.mxu0 %vm575_vm3, %v1530_v25  ;;  %v1538_v29 = vor.u32 %v1537_v31, %v1534_v28  ;;  %v896_v31 = vrot.slane %v4122_v9, 1 }
  0xad   : > { %3664 = vmatmul.msk.bf16.gmra.mxu3 %vm575_vm3, %v1256_v24  ;;  %v1552_v28 = vrot.slane %v1550_v5, 1 }
  0xae   : > { %v4280_v22 = vpop.f32.mrf.mxu2  ;;  %v1539_v16 = vsel %vm1477_vm5, %v1529_v62, %v1538_v29  ;;  %v1259_v62 = vrot.slane %v3866_v59, 1 }
  0xaf   : > { %v4284_v15 = vpop.f32.mrf.mxu1 }
  0xb0   : > { %v4293_v32 = vpop.f32.mrf.mxu3  ;;  %v1260_v20 = vsel %vm880_vm4, %v1257_v39, %v1259_v62 }
  0xb1   : > { %v4287_v26 = vpop.f32.mrf.mxu0  ;;  %5395 = vst [vmem:[#allocation5_spill] sm:$0xff] %v4293_v32 }
  0xb6   : > { %v4291_v30 = vpop.f32.mrf.mxu2 }
  0xb7   : > { %v4295_v35 = vpop.f32.mrf.mxu1 }
  0xb8   : > { %v4308_v48 = vpop.f32.mrf.mxu3 }
  0xb9   : > { %v4299_v38 = vpop.f32.mrf.mxu0  ;;  %5396 = vst [vmem:[#allocation6_spill] sm:$0xff] %v4308_v48 }
  0xba   : > { %3557 = vmatmul.msk.bf16.gmra.mxu1 %vm575_vm3, %v4043_v11  ;;  %v1546_v11 = vrot.slane %v1544_v43, 2 }
  0xbb   : > { %3576 = vmatmul.msk.bf16.gmra.mxu2 %vm575_vm3, %v893_v36 }
  0xbc   : > { %3682 = vmatmul.msk.bf16.gmra.mxu0 %vm575_vm3, %v1539_v16  ;;  %v1547_v53 = vor.u32 %v1546_v11, %v1543_v45  ;;  %v897_v16 = vsel %vm880_vm4, %v894_v51, %v896_v31  ;;  %v1559_v45 = vshrl.u32 %v3866_v59, 16  ;;  %v1562_v11 = vshll.u32 %v3866_v59, 16 }
  0xbd   : > { %3665 = vmatmul.msk.bf16.gmra.mxu3 %vm575_vm3, %v1258_v27  ;;  %v1261_v27 = vrot.slane %v3867_v42, 1 }
  0xbe   : > { %v4306_v47 = vpop.f32.mrf.mxu2  ;;  %v1548_v21 = vsel %vm1477_vm5, %v1538_v29, %v1547_v53 }
  0xbf   : > { %v4310_v4 = vpop.f32.mrf.mxu1  ;;  %v1262_v5 = vsel %vm880_vm4, %v1259_v62, %v1261_v27  ;;  %v1263_v62 = vrot.slane %v3868_v8, 1 }
  0xc0   : > { %v4319_v55 = vpop.f32.mrf.mxu3 }
  0xc1   : > { %v4313_v49 = vpop.f32.mrf.mxu0  ;;  %5397 = vst [vmem:[#allocation7_spill] sm:$0xff] %v4319_v55  ;;  %v1264_v32 = vsel %vm880_vm4, %v1261_v27, %v1263_v62  ;;  %v3869_v27 = vld [vmem:[%s4040_s27 + $0x68] sm:$0xff] }
  0xc6   : > { %v4317_v54 = vpop.f32.mrf.mxu2 }
  0xc7   : > { %v4321_v46 = vpop.f32.mrf.mxu1 }
  0xc8   : > { %v4334_v17 = vpop.f32.mrf.mxu3 }
  0xc9   : > { %v4325_v61 = vpop.f32.mrf.mxu0  ;;  %5398 = vst [vmem:[#allocation8_spill] sm:$0xff] %v4334_v17 }
  0xca   : > { %3558 = vmatmul.msk.bf16.gmra.mxu1 %vm575_vm3, %v4046_v12  ;;  %v1555_v12 = vrot.slane %v1553_v6, 2 }
  0xcb   : > { %3577 = vmatmul.msk.bf16.gmra.mxu2 %vm575_vm3, %v895_v60 }
  0xcc   : > { %3683 = vmatmul.msk.bf16.gmra.mxu0 %vm575_vm3, %v1548_v21  ;;  %v1556_v19 = vor.u32 %v1555_v12, %v1552_v28 }
  0xcd   : > { %3666 = vmatmul.msk.bf16.gmra.mxu3 %vm575_vm3, %v1260_v20  ;;  %v1564_v20 = vrot.slane %v1562_v11, 2  ;;  %v1568_v11 = vshrl.u32 %v3867_v42, 16 }
  0xce   : > { %v4332_v25 = vpop.f32.mrf.mxu2  ;;  %v1557_v39 = vsel %vm1477_vm5, %v1547_v53, %v1556_v19  ;;  %v1561_v53 = vrot.slane %v1559_v45, 1 }
  0xcf   : > { %v4336_v18 = vpop.f32.mrf.mxu1  ;;  %v1570_v1 = vrot.slane %v1568_v11, 1 }
  0xd0   : > { %v1345_v36 = vpop.f32.mrf.mxu3  ;;  %v1565_v28 = vor.u32 %v1564_v20, %v1561_v53 }
  0xd1   : > { %v4339_v24 = vpop.f32.mrf.mxu0 }
  0xd2   : > { %v1566_v55 = vsel %vm1477_vm5, %v1556_v19, %v1565_v28 }
  0xd6   : > { %v4343_v29 = vpop.f32.mrf.mxu2 }
  0xd7   : > { %v4345_v37 = vpop.f32.mrf.mxu1 }
  0xd8   : > { %v1347_v21 = vpop.f32.mrf.mxu3 }
  0xd9   : > { %v4349_v43 = vpop.f32.mrf.mxu0 }
  0xda   : > { %3559 = vmatmul.msk.bf16.gmra.mxu1 %vm575_vm3, %v4085_v40  ;;  %v898_v40 = vrot.slane %v4113_v63, 1 }
  0xdb   : > { %3578 = vmatmul.msk.bf16.gmra.mxu2 %vm575_vm3, %v897_v16 }
  0xdc   : > { %3684 = vmatmul.msk.bf16.gmra.mxu0 %vm575_vm3, %v1557_v39  ;;  %v899_v39 = vsel %vm880_vm4, %v896_v31, %v898_v40 }
  0xdd   : > { %3667 = vmatmul.msk.bf16.gmra.mxu3 %vm575_vm3, %v1262_v5  ;;  %v1571_v5 = vshll.u32 %v3867_v42, 16 }
  0xde   : > { %v4356_v60 = vpop.f32.mrf.mxu2 }
  0xdf   : > { %5399 = vst [vmem:[#allocation9_spill] sm:$0xff] %v4356_v60  ;;  %v4358_v51 = vpop.f32.mrf.mxu1 }
  0xe0   : > { %v1350_v16 = vpop.f32.mrf.mxu3 }
  0xe1   : > { %v4361_v6 = vpop.f32.mrf.mxu0 }
  0xe6   : > { %v4365_v12 = vpop.f32.mrf.mxu2 }
  0xe7   : > { %5400 = vst [vmem:[#allocation10_spill] sm:$0xff] %v4365_v12  ;;  %v784_v59 = vpop.f32.mrf.mxu1 }
  0xe8   : > { %v785_v45 = vadd.f32 %v784_v59, %v4249_v52  ;;  %v1352_v20 = vpop.f32.mrf.mxu3 }
  0xe9   : > { %v1714_v17 = vpop.f32.mrf.mxu0 }
  0xea   : > { %3560 = vmatmul.msk.bf16.gmra.mxu1 %vm575_vm3, %v4122_v9  ;;  %v1573_v9 = vrot.slane %v1571_v5, 2  ;;  %v1580_v5 = vshll.u32 %v3868_v8, 16 }
  0xeb   : > { %3579 = vmatmul.msk.bf16.gmra.mxu2 %vm575_vm3, %v899_v39 }
  0xec   : > { %3685 = vmatmul.msk.bf16.gmra.mxu0 %vm575_vm3, %v1566_v55  ;;  %v900_v55 = vrot.slane %v4049_v13, 1  ;;  %v1574_v42 = vor.u32 %v1573_v9, %v1570_v1 }
  0xed   : > { %3668 = vmatmul.msk.bf16.gmra.mxu3 %vm575_vm3, %v1264_v32 }
  0xee   : > { %v984_v53 = vpop.f32.mrf.mxu2  ;;  %v901_v60 = vsel %vm880_vm4, %v898_v40, %v900_v55  ;;  %v1575_v11 = vsel %vm1477_vm5, %v1565_v28, %v1574_v42 }
  0xef   : > { %v1074_v48 = vadd.f32 %v984_v53, %v785_v45  ;;  %v786_v31 = vpop.f32.mrf.mxu1 }
  0xf0   : > { %v787_v52 = vadd.f32 %v786_v31, %v4261_v33  ;;  %v1355_v12 = vpop.f32.mrf.mxu3  ;;  %v1265_v33 = vrot.slane %v3869_v27, 1 }
  0xf1   : > { %v1435_v19 = vadd.f32 %v1345_v36, %v1074_v48  ;;  %v1716_v23 = vpop.f32.mrf.mxu0 }
  0xf2   : > { %v1266_v28 = vsel %vm880_vm4, %v1263_v62, %v1265_v33  ;;  %v3870_v62 = vld [vmem:[%s4040_s27 + $0x70] sm:$0xff] }
  0xf3   : > { %v4377_v39 = vadd.f32 %v1714_v17, %v1435_v19  ;;  %v1577_v17 = vshrl.u32 %v3868_v8, 16 }
  0xf6   : > { %v986_v59 = vpop.f32.mrf.mxu2 }
  0xf7   : > { %v1075_v45 = vadd.f32 %v986_v59, %v787_v52  ;;  %v789_v53 = vpop.f32.mrf.mxu1  ;;  %v1579_v52 = vrot.slane %v1577_v17, 1  ;;  %v902_v59 = vrot.slane %v4052_v14, 1 }
  0xf8   : > { %v790_v1 = vadd.f32 %v789_v53, %v4273_v7  ;;  %v1357_v31 = vpop.f32.mrf.mxu3 }
  0xf9   : > { %v1436_v48 = vadd.f32 %v1347_v21, %v1075_v45  ;;  %v1719_v36 = vpop.f32.mrf.mxu0 }
  0xfa   : > { %3561 = vmatmul.msk.bf16.gmra.mxu1 %vm575_vm3, %v4113_v63 }
  0xfb   : > { %3580 = vmatmul.msk.bf16.gmra.mxu2 %vm575_vm3, %v901_v60  ;;  %v4387_v32 = vadd.f32 %v1716_v23, %v1436_v48  ;;  %v1582_v60 = vrot.slane %v1580_v5, 2 }
  0xfc   : > { %3686 = vmatmul.msk.bf16.gmra.mxu0 %vm575_vm3, %v1575_v11 }
  0xfd   : > { %3669 = vmatmul.msk.bf16.gmra.mxu3 %vm575_vm3, %v1266_v28  ;;  %v1583_v8 = vor.u32 %v1582_v60, %v1579_v52 }
  0xfe   : > { %v989_v40 = vpop.f32.mrf.mxu2 }
  0xff   : > { %v1076_v21 = vadd.f32 %v989_v40, %v790_v1  ;;  %v791_v19 = vpop.f32.mrf.mxu1  ;;  %v903_v1 = vsel %vm880_vm4, %v900_v55, %v902_v59  ;;  %v1584_v17 = vsel %vm1477_vm5, %v1574_v42, %v1583_v8 }
 0x100   : > { %v792_v7 = vadd.f32 %v791_v19, %v4287_v26  ;;  %v1360_v53 = vpop.f32.mrf.mxu3  ;;  %v1267_v26 = vrot.slane %v3870_v62, 1  ;;  %v1589_v19 = vshll.u32 %v3869_v27, 16 }
 0x101   : > { %v1437_v9 = vadd.f32 %v1350_v16, %v1076_v21  ;;  %v1721_v63 = vpop.f32.mrf.mxu0  ;;  %v1586_v21 = vshrl.u32 %v3869_v27, 16 }
 0x102   : > { %v1268_v42 = vsel %vm880_vm4, %v1265_v33, %v1267_v26  ;;  %v3871_v33 = vld [vmem:[%s4040_s27 + $0x78] sm:$0xff] }
 0x103   : > { %v4393_v23 = vadd.f32 %v1719_v36, %v1437_v9  ;;  %v1588_v60 = vrot.slane %v1586_v21, 1 }
 0x106   : > { %v991_v45 = vpop.f32.mrf.mxu2 }
 0x107   : > { %v1077_v48 = vadd.f32 %v991_v45, %v792_v7  ;;  %v794_v11 = vpop.f32.mrf.mxu1  ;;  %v1591_v7 = vrot.slane %v1589_v19, 2  ;;  %v904_v45 = vrot.slane %v4089_v41, 1 }
 0x108   : > { %v795_v5 = vadd.f32 %v794_v11, %v4299_v38  ;;  %v1362_v28 = vpop.f32.mrf.mxu3 }
 0x109   : > { %v1438_v16 = vadd.f32 %v1352_v20, %v1077_v48  ;;  %v1724_v40 = vpop.f32.mrf.mxu0  ;;  %v1592_v27 = vor.u32 %v1591_v7, %v1588_v60 }
 0x10a   : > { %3562 = vmatmul.msk.bf16.gmra.mxu1 %vm575_vm3, %v4049_v13 }
 0x10b   : > { %3581 = vmatmul.msk.bf16.gmra.mxu2 %vm575_vm3, %v903_v1  ;;  %v4403_v36 = vadd.f32 %v1721_v63, %v1438_v16  ;;  %v1593_v21 = vsel %vm1477_vm5, %v1583_v8, %v1592_v27 }
 0x10c   : > { %3687 = vmatmul.msk.bf16.gmra.mxu0 %vm575_vm3, %v1584_v17  ;;  %v905_v17 = vsel %vm880_vm4, %v902_v59, %v904_v45 }
 0x10d   : > { %3670 = vmatmul.msk.bf16.gmra.mxu3 %vm575_vm3, %v1268_v42 }
 0x10e   : > { %v994_v55 = vpop.f32.mrf.mxu2 }
 0x10f   : > { %v1078_v20 = vadd.f32 %v994_v55, %v795_v5  ;;  %v796_v9 = vpop.f32.mrf.mxu1  ;;  %v1595_v55 = vshrl.u32 %v3870_v62, 16 }
 0x110   : > { %v797_v38 = vadd.f32 %v796_v9, %v4313_v49  ;;  %v1365_v11 = vpop.f32.mrf.mxu3  ;;  %v1269_v49 = vrot.slane %v3871_v33, 1 }
 0x111   : > { %v1439_v52 = vadd.f32 %v1355_v12, %v1078_v20  ;;  %v1726_v13 = vpop.f32.mrf.mxu0  ;;  %v1598_v20 = vshll.u32 %v3870_v62, 16  ;;  %v1597_v60 = vrot.slane %v1595_v55, 1 }
 0x112   : > { %v1270_v8 = vsel %vm880_vm4, %v1267_v26, %v1269_v49  ;;  %v3872_v26 = vld [vmem:[%s4040_s27 + $0x80] sm:$0xff] }
 0x113   : > { %v4409_v63 = vadd.f32 %v1724_v40, %v1439_v52  ;;  %v1600_v7 = vrot.slane %v1598_v20, 2  ;;  %v1604_v20 = vshrl.u32 %v3871_v33, 16 }
 0x115   : > { %v1601_v62 = vor.u32 %v1600_v7, %v1597_v60  ;;  %v908_v7 = vrot.slane %v4160_v56, 1 }
 0x116   : > { %v996_v48 = vpop.f32.mrf.mxu2 }
 0x117   : > { %v1079_v1 = vadd.f32 %v996_v48, %v797_v38  ;;  %v799_v16 = vpop.f32.mrf.mxu1  ;;  %v906_v38 = vrot.slane %v4125_v10, 1 }
 0x118   : > { %v800_v19 = vadd.f32 %v799_v16, %v4325_v61  ;;  %v1367_v9 = vpop.f32.mrf.mxu3 }
 0x119   : > { %v1440_v12 = vadd.f32 %v1357_v31, %v1079_v1  ;;  %v1729_v5 = vpop.f32.mrf.mxu0 }
 0x11a   : > { %3563 = vmatmul.msk.bf16.gmra.mxu1 %vm575_vm3, %v4052_v14 }
 0x11b   : > { %3582 = vmatmul.msk.bf16.gmra.mxu2 %vm575_vm3, %v905_v17  ;;  %v4419_v40 = vadd.f32 %v1726_v13, %v1440_v12  ;;  %v907_v12 = vsel %vm880_vm4, %v904_v45, %v906_v38 }
 0x11c   : > { %3688 = vmatmul.msk.bf16.gmra.mxu0 %vm575_vm3, %v1593_v21 }
 0x11d   : > { %3671 = vmatmul.msk.bf16.gmra.mxu3 %vm575_vm3, %v1270_v8 }
 0x11e   : > { %v999_v59 = vpop.f32.mrf.mxu2 }
 0x11f   : > { %v1080_v31 = vadd.f32 %v999_v59, %v800_v19  ;;  %v801_v42 = vpop.f32.mrf.mxu1  ;;  %v1602_v19 = vsel %vm1477_vm5, %v1592_v27, %v1601_v62  ;;  %v1607_v59 = vshll.u32 %v3871_v33, 16 }
 0x120   : > { %v802_v61 = vadd.f32 %v801_v42, %v4339_v24  ;;  %v1370_v1 = vpop.f32.mrf.mxu3  ;;  %v1271_v24 = vrot.slane %v3872_v26, 1 }
 0x121   : > { %v1441_v52 = vadd.f32 %v1360_v53, %v1080_v31  ;;  %v1731_v14 = vpop.f32.mrf.mxu0  ;;  %v1609_v60 = vrot.slane %v1607_v59, 2  ;;  %v1616_v59 = vshll.u32 %v3872_v26, 16 }
 0x122   : > { %v1272_v27 = vsel %vm880_vm4, %v1269_v49, %v1271_v24  ;;  %v3873_v49 = vld [vmem:[%s4040_s27 + $0x88] sm:$0xff] }
 0x123   : > { %v4425_v13 = vadd.f32 %v1729_v5, %v1441_v52  ;;  %v1606_v52 = vrot.slane %v1604_v20, 1  ;;  %v1613_v20 = vshrl.u32 %v3872_v26, 16 }
 0x125   : > { %v1610_v33 = vor.u32 %v1609_v60, %v1606_v52  ;;  %v910_v52 = vrot.slane %v4076_v34, 1 }
 0x126   : > { %v1001_v48 = vpop.f32.mrf.mxu2 }
 0x127   : > { %v1081_v16 = vadd.f32 %v1001_v48, %v802_v61  ;;  %v804_v17 = vpop.f32.mrf.mxu1 }
 0x128   : > { %v805_v55 = vadd.f32 %v804_v17, %v4349_v43  ;;  %v1372_v31 = vpop.f32.mrf.mxu3 }
 0x129   : > { %v1442_v53 = vadd.f32 %v1362_v28, %v1081_v16  ;;  %v1734_v21 = vpop.f32.mrf.mxu0 }
 0x12a   : > { %3564 = vmatmul.msk.bf16.gmra.mxu1 %vm575_vm3, %v4089_v41 }
 0x12b   : > { %3583 = vmatmul.msk.bf16.gmra.mxu2 %vm575_vm3, %v907_v12  ;;  %v4435_v5 = vadd.f32 %v1731_v14, %v1442_v53  ;;  %v909_v12 = vsel %vm880_vm4, %v906_v38, %v908_v7 }
 0x12c   : > { %3689 = vmatmul.msk.bf16.gmra.mxu0 %vm575_vm3, %v1602_v19  ;;  %v1611_v19 = vsel %vm1477_vm5, %v1601_v62, %v1610_v33 }
 0x12d   : > { %3672 = vmatmul.msk.bf16.gmra.mxu3 %vm575_vm3, %v1272_v27  ;;  %v1615_v27 = vrot.slane %v1613_v20, 1 }
 0x12e   : > { %v1004_v45 = vpop.f32.mrf.mxu2 }
 0x12f   : > { %v1082_v28 = vadd.f32 %v1004_v45, %v805_v55  ;;  %v806_v42 = vpop.f32.mrf.mxu1 }
 0x130   : > { %v807_v43 = vadd.f32 %v806_v42, %v4361_v6  ;;  %v1375_v48 = vpop.f32.mrf.mxu3  ;;  %v1273_v6 = vrot.slane %v3873_v49, 1 }
 0x131   : > { %v1443_v8 = vadd.f32 %v1365_v11, %v1082_v28  ;;  %v1736_v41 = vpop.f32.mrf.mxu0 }
 0x132   : > { %v1274_v62 = vsel %vm880_vm4, %v1271_v24, %v1273_v6  ;;  %v3874_v24 = vld [vmem:[%s4040_s27 + $0x90] sm:$0xff] }
 0x133   : > { %v4441_v14 = vadd.f32 %v1734_v21, %v1443_v8  ;;  %v1618_v8 = vrot.slane %v1616_v59, 2 }
 0x135   : > { %v1619_v26 = vor.u32 %v1618_v8, %v1615_v27 }
 0x136   : > { %v1006_v61 = vpop.f32.mrf.mxu2 }
 0x137   : > { %v1083_v16 = vadd.f32 %v1006_v61, %v807_v43  ;;  %v809_v17 = vpop.f32.mrf.mxu1 }
 0x138   : > { %v810_v55 = vadd.f32 %v809_v17, %v4245_v50  ;;  %v1377_v45 = vpop.f32.mrf.mxu3  ;;  %v911_v17 = vsel %vm880_vm4, %v908_v7, %v910_v52  ;;  %v1622_v7 = vshrl.u32 %v3873_v49, 16 }
 0x139   : > { %v1444_v11 = vadd.f32 %v1367_v9, %v1083_v16  ;;  %v1739_v53 = vpop.f32.mrf.mxu0 }
 0x13a   : > { %3565 = vmatmul.msk.bf16.gmra.mxu1 %vm575_vm3, %v4125_v10 }
 0x13b   : > { %3584 = vmatmul.msk.bf16.gmra.mxu2 %vm575_vm3, %v909_v12  ;;  %v4451_v21 = vadd.f32 %v1736_v41, %v1444_v11  ;;  %v1620_v11 = vsel %vm1477_vm5, %v1610_v33, %v1619_v26 }
 0x13c   : > { %3690 = vmatmul.msk.bf16.gmra.mxu0 %vm575_vm3, %v1611_v19  ;;  %v1625_v19 = vshll.u32 %v3873_v49, 16 }
 0x13d   : > { %3673 = vmatmul.msk.bf16.gmra.mxu3 %vm575_vm3, %v1274_v62  ;;  %v1146_v62 = vld [vmem:[%s4040_s27 + $0x98] sm:$0x1] }
 0x13e   : > { %v1009_v38 = vpop.f32.mrf.mxu2 }
 0x13f   : > { %v1084_v9 = vadd.f32 %v1009_v38, %v810_v55  ;;  %v811_v28 = vpop.f32.mrf.mxu1 }
 0x140   : > { %v812_v50 = vadd.f32 %v811_v28, %v4258_v58  ;;  %v1380_v43 = vpop.f32.mrf.mxu3  ;;  %v1275_v58 = vrot.slane %v3874_v24, 1  ;;  %v1627_v28 = vrot.slane %v1625_v19, 2 }
 0x141   : > { %v1445_v42 = vadd.f32 %v1370_v1, %v1084_v9  ;;  %v1741_v10 = vpop.f32.mrf.mxu0  ;;  %v1624_v9 = vrot.slane %v1622_v7, 1  ;;  %v3932_v7 = vld [vmem:[%s4040_s27 + $0x78] sm:$0xff] }
 0x143   : > { %v4457_v41 = vadd.f32 %v1739_v53, %v1445_v42 }
 0x146   : > { %v1011_v60 = vpop.f32.mrf.mxu2 }
 0x147   : > { %v1085_v61 = vadd.f32 %v1011_v60, %v812_v50  ;;  %v814_v16 = vpop.f32.mrf.mxu1 }
 0x148   : > { %v815_v53 = vadd.f32 %v814_v16, %v4269_v2  ;;  %v4471_v55 = vpop.f32.mrf.mxu3  ;;  %v4479_v2 = vld [vmem:[%s4040_s27 + $0x80] sm:$0xff] }
 0x149   : > { %v1446_v1 = vadd.f32 %v1372_v31, %v1085_v61  ;;  %v1744_v12 = vpop.f32.mrf.mxu0  ;;  %v912_v49 = vrot.slane %v4479_v2, 1 }
 0x14a   : > { %3566 = vmatmul.msk.bf16.gmra.mxu1 %vm575_vm3, %v4160_v56  ;;  %v1276_v56 = vsel %vm880_vm4, %v1273_v6, %v1275_v58  ;;  %v1628_v6 = vor.u32 %v1627_v28, %v1624_v9  ;;  %v4503_v28 = vld [vmem:[%s4040_s27 + $0x18] sm:$0xff] }
 0x14b   : > { %3585 = vmatmul.msk.bf16.gmra.mxu2 %vm575_vm3, %v911_v17  ;;  %v4467_v34 = vadd.f32 %v1741_v10, %v1446_v1  ;;  %v1222_v10 = vunpack.c.l.b16 %v1146_v62  ;;  %v913_v61 = vsel %vm880_vm4, %v910_v52, %v912_v49 }
 0x14c   : > { %3691 = vmatmul.msk.bf16.gmra.mxu0 %vm575_vm3, %v1620_v11  ;;  %v2076_v11 = vld [vmem:[%s4040_s27 + $0x10] sm:$0xc] }
 0x14d   : > { %3674 = vmatmul.msk.bf16.gmra.mxu3 %vm575_vm3, %v1276_v56  ;;  %v1241_v16 = vpack.c.b16 %v1222_v10, %v1222_v10  ;;  %v2152_v52 = vunpack.c.l.b16 %v2076_v11 }
 0x14e   : > { %v1014_v31 = vpop.f32.mrf.mxu2 }
 0x14f   : > { %v1086_v33 = vadd.f32 %v1014_v31, %v815_v53  ;;  %v816_v20 = vpop.f32.mrf.mxu1  ;;  %v4489_v53 = vld [vmem:[%s4040_s27 + $0x14] sm:$0xf]  ;;  %v1277_v19 = vrot.slane %v1241_v16, 1  ;;  %v1631_v31 = vshrl.u32 %v3874_v24, 16 }
 0x150   : > { %v817_v27 = vadd.f32 %v816_v20, %v4284_v15  ;;  %v4483_v8 = vpop.f32.mrf.mxu3 }
 0x151   : > { %v1447_v59 = vadd.f32 %v1375_v48, %v1086_v33  ;;  %v1746_v38 = vpop.f32.mrf.mxu0  ;;  %v1634_v33 = vshll.u32 %v3874_v24, 16 }
 0x153   : > { %v4476_v42 = vadd.f32 %v1744_v12, %v1447_v59  ;;  %v1629_v12 = vsel %vm1477_vm5, %v1619_v26, %v1628_v6 }
 0x156   : > { %v1016_v48 = vpop.f32.mrf.mxu2 }
 0x157   : > { %v1087_v50 = vadd.f32 %v1016_v48, %v817_v27  ;;  %v819_v60 = vpop.f32.mrf.mxu1  ;;  %v1633_v48 = vrot.slane %v1631_v31, 1 }
 0x158   : > { %v820_v26 = vadd.f32 %v819_v60, %v4295_v35  ;;  %v4499_v56 = vpop.f32.mrf.mxu3  ;;  %v1471_v35 = vld [vmem:[%s4040_s27 + $0x98] sm:$0x3]  ;;  %v4511_v60 = vld [vmem:[%s4040_s27 + $0x88] sm:$0xff] }
 0x159   : > { %v1448_v17 = vadd.f32 %v1377_v45, %v1087_v50  ;;  %v1749_v1 = vpop.f32.mrf.mxu0  ;;  %v5392_v45 = vunpack.c.l.b16 %v4489_v53  ;;  %v1636_v50 = vrot.slane %v1634_v33, 2  ;;  %v914_v24 = vrot.slane %v4511_v60, 1 }
 0x15a   : > { %3567 = vmatmul.msk.bf16.gmra.mxu1 %vm575_vm3, %v3932_v7  ;;  %v1475_v7 = vunpack.c.l.b16 %v1471_v35 }
 0x15b   : > { %3586 = vmatmul.msk.bf16.gmra.mxu2 %vm575_vm3, %v913_v61  ;;  %v4494_v15 = vadd.f32 %v1746_v38, %v1448_v17  ;;  %v1278_v38 = vsel %vm880_vm4, %v1275_v58, %v1277_v19  ;;  %v4507_v62 = vpack.c.b16 %v5392_v45, %v2152_v52  ;;  %v2453_v17 = vshrl.u32 %v4503_v28, 16 }
 0x15c   : > { %3692 = vmatmul.msk.bf16.gmra.mxu0 %vm575_vm3, %v1629_v12  ;;  %v1637_v11 = vor.u32 %v1636_v50, %v1633_v48  ;;  %v915_v31 = vsel %vm880_vm4, %v912_v49, %v914_v24 }
 0x15d   : > { %5401 = vst [vmem:[#allocation11_spill] sm:$0xff] %v4494_v15  ;;  %3675 = vmatmul.msk.bf16.gmra.mxu3 %vm575_vm3, %v1278_v38  ;;  %v2445_v58 = vshrl.u32 %v4507_v62, 16  ;;  %v2448_v16 = vshll.u32 %v4507_v62, 16  ;;  %v4527_v15 = vpack.c.b16 %v1475_v7, %v1475_v7  ;;  %v916_v7 = vrot.slane %v4149_v44, 1 }
 0x15e   : > { %v1019_v20 = vpop.f32.mrf.mxu2 }
 0x15f   : > { %v1088_v59 = vadd.f32 %v1019_v20, %v820_v26  ;;  %v821_v9 = vpop.f32.mrf.mxu1  ;;  %v2447_v33 = vrot.slane %v2445_v58, 2  ;;  %v2450_v20 = vrot.slane %v2448_v16, 3 }
 0x160   : > { %v822_v12 = vadd.f32 %v821_v9, %v4310_v4  ;;  %v4522_v52 = vpop.f32.mrf.mxu3 }
 0x161   : > { %v1449_v10 = vadd.f32 %v1380_v43, %v1088_v59  ;;  %v1751_v27 = vpop.f32.mrf.mxu0  ;;  %v2456_v43 = vshll.u32 %v4503_v28, 16  ;;  %v2455_v59 = vrot.slane %v2453_v17, 2  ;;  %v2451_v49 = vor.u32 %v2450_v20, %v2447_v33 }
 0x163   : > { %v4515_v61 = vadd.f32 %v1749_v1, %v1449_v10  ;;  %v2458_v38 = vrot.slane %v2456_v43, 3 }
 0x165   : > { %5402 = vst [vmem:[#allocation12_spill] sm:$0xff] %v4515_v61  ;;  %v1638_v61 = vsel %vm1477_vm5, %v1628_v6, %v1637_v11  ;;  %v2459_v9 = vor.u32 %v2458_v38, %v2455_v59  ;;  %v1643_v6 = vshll.u32 %v4527_v15, 16  ;;  %v917_v38 = vsel %vm880_vm4, %v914_v24, %v916_v7  ;;  %v4572_v7 = vld [vmem:[%s4040_s27 + $0x28] sm:$0xff] }
 0x166   : > { %v1021_v19 = vpop.f32.mrf.mxu2 }
 0x167   : > { %v1089_v26 = vadd.f32 %v1021_v19, %v822_v12  ;;  %v824_v1 = vpop.f32.mrf.mxu1  ;;  %v2460_v16 = vsel %vm2443_vm6, %v2451_v49, %v2459_v9 }
 0x168   : > { %v825_v48 = vadd.f32 %v824_v1, %v4321_v46  ;;  %v4538_v35 = vpop.f32.mrf.mxu3  ;;  %v1645_v46 = vrot.slane %v1643_v6, 2  ;;  %v2806_v6 = vld [vmem:[%s4040_s27 + $0x10] sm:$0x8] }
 0x169   : > { %v1450_v10 = vadd.f32 %v4471_v55, %v1089_v26  ;;  %v1754_v45 = vpop.f32.mrf.mxu0  ;;  %v1640_v55 = vshrl.u32 %v4527_v15, 16 }
 0x16a   : > { %3568 = vmatmul.msk.bf16.gmra.mxu1 %vm575_vm3, %v4479_v2 }
 0x16b   : > { %3587 = vmatmul.msk.bf16.gmra.mxu2 %vm575_vm3, %v915_v31  ;;  %v4532_v4 = vadd.f32 %v1751_v27, %v1450_v10  ;;  %v4542_v27 = vld [vmem:[%s4040_s27 + $0x20] sm:$0xff]  ;;  %v1642_v43 = vrot.slane %v1640_v55, 1  ;;  %v1840_v10 = vld [vmem:[%s4040_s27 + $0x8] sm:$0xc] }
 0x16c   : > { %3693 = vmatmul.msk.bf16.gmra.mxu0 %vm575_vm3, %v1638_v61  ;;  %v2462_v19 = vshrl.u32 %v4542_v27, 16  ;;  %v2465_v26 = vshll.u32 %v4542_v27, 16 }
 0x16d   : > { %3802 = vmatmul.msk.bf16.vlgmr.msra.gmra.mxu3 %vm575_vm3, %v2460_v16  ;;  %v1646_v1 = vor.u32 %v1645_v46, %v1642_v43 }
 0x16e   : > { %v1024_v50 = vpop.f32.mrf.mxu2  ;;  %v2467_v49 = vrot.slane %v2465_v26, 3  ;;  %v5404_v26 = vunpack.c.l.b16 %v4489_v53 }
 0x16f   : > { %v1090_v58 = vadd.f32 %v1024_v50, %v825_v48  ;;  %v826_v2 = vpop.f32.mrf.mxu1  ;;  %v1647_v55 = vsel %vm1477_vm5, %v1637_v11, %v1646_v1  ;;  %v3934_v1 = vld [vmem:[%s4040_s27 + $0x10] sm:$0xff] }
 0x170   : > { %v827_v31 = vadd.f32 %v826_v2, %v4336_v18  ;;  %v1844_v18 = vunpack.c.l.b16 %v1840_v10  ;;  %v2814_v10 = vrot.slane %v4503_v28, 3 }
 0x171   : > { %v1451_v61 = vadd.f32 %v4483_v8, %v1090_v58  ;;  %v1756_v17 = vpop.f32.mrf.mxu0  ;;  %v4552_v8 = vpop.f32.mrf.mxu3 }
 0x173   : > { %v4546_v12 = vadd.f32 %v1754_v45, %v1451_v61  ;;  %v2464_v45 = vrot.slane %v2462_v19, 2  ;;  %v5403_v61 = vunpack.c.l.b16 %v4171_v3  ;;  %v2208_v3 = vrot.slane %v4507_v62, 2 }
 0x175   : > { %v2468_v24 = vor.u32 %v2467_v49, %v2464_v45  ;;  %v1845_v43 = vpack.c.b16 %v5403_v61, %v1844_v18 }
 0x176   : > { %v1026_v33 = vpop.f32.mrf.mxu2 }
 0x177   : > { %v1091_v20 = vadd.f32 %v1026_v33, %v827_v31  ;;  %v829_v59 = vpop.f32.mrf.mxu1  ;;  %v2469_v46 = vsel %vm2443_vm6, %v2459_v9, %v2468_v24  ;;  %v1848_v33 = vrot.slane %v3934_v1, 2  ;;  %v2471_v9 = vshrl.u32 %v4572_v7, 16 }
 0x178   : > { %v830_v58 = vadd.f32 %v829_v59, %v4345_v37  ;;  %v1847_v37 = vrot.slane %v1845_v43, 2  ;;  %v2209_v59 = vrot.slane %v4503_v28, 2 }
 0x179   : > { %v1452_v44 = vadd.f32 %v4499_v56, %v1091_v20  ;;  %v1759_v48 = vpop.f32.mrf.mxu0  ;;  %v2810_v56 = vunpack.c.l.b16 %v2806_v6  ;;  %v4566_v16 = vpop.f32.mrf.mxu3  ;;  %v2473_v6 = vrot.slane %v2471_v9, 2 }
 0x17a   : > { %3569 = vmatmul.msk.bf16.gmra.mxu1 %vm575_vm3, %v4511_v60  ;;  %v2210_v62 = vsel %vm1846_vm7, %v2208_v3, %v2209_v59  ;;  %v2211_v3 = vrot.slane %v4542_v27, 2 }
 0x17b   : > { %3588 = vmatmul.msk.bf16.gmra.mxu2 %vm575_vm3, %v917_v38  ;;  %v4562_v50 = vadd.f32 %v1756_v17, %v1452_v44  ;;  %v2811_v31 = vpack.c.b16 %v5404_v26, %v2810_v56  ;;  %v2474_v38 = vshll.u32 %v4572_v7, 16 }
 0x17c   : > { %3694 = vmatmul.msk.bf16.gmra.mxu0 %vm575_vm3, %v1647_v55  ;;  %v1849_v55 = vsel %vm1846_vm7, %v1847_v37, %v1848_v33  ;;  %v3935_v37 = vld [vmem:[%s4040_s27 + $0x18] sm:$0xff] }
 0x17d   : > { %3803 = vmatmul.msk.bf16.gmra.mxu3 %vm575_vm3, %v2469_v46  ;;  %v2813_v53 = vrot.slane %v2811_v31, 3  ;;  %v2476_v18 = vrot.slane %v2474_v38, 3  ;;  %v1850_v1 = vrot.slane %v3935_v37, 2 }
 0x17e   : > { %v1029_v2 = vpop.f32.mrf.mxu2 }
 0x17f   : > { %v1092_v11 = vadd.f32 %v1029_v2, %v830_v58  ;;  %v831_v60 = vpop.f32.mrf.mxu1  ;;  %v2477_v2 = vor.u32 %v2476_v18, %v2473_v6 }
 0x181   : > { %v1453_v17 = vadd.f32 %v4522_v52, %v1092_v11  ;;  %v1761_v19 = vpop.f32.mrf.mxu0  ;;  %v832_v52 = vadd.f32 %v831_v60, %v4358_v51  ;;  %v1400_v49 = vpop.f32.mrf.mxu3  ;;  %v2815_v51 = vsel %vm2812_vm8, %v2813_v53, %v2814_v10 }
 0x183   : > { %v4579_v20 = vadd.f32 %v1759_v48, %v1453_v17  ;;  %v4599_v17 = vld [vmem:[%s4040_s27 + $0x30] sm:$0xff] }
 0x184   : > { %v2483_v9 = vshll.u32 %v4599_v17, 16 }
 0x186   : > { %v1031_v45 = vpop.f32.mrf.mxu2 }
 0x187   : > { %v1093_v44 = vadd.f32 %v1031_v45, %v832_v52  ;;  %v834_v48 = vpop.f32.mrf.mxu1 }
 0x188   : > { %v835_v11 = vadd.f32 %v834_v48, %v4256_v57  ;;  %v2480_v57 = vshrl.u32 %v4599_v17, 16  ;;  %v2212_v48 = vsel %vm1846_vm7, %v2209_v59, %v2211_v3 }
 0x189   : > { %v1454_v58 = vadd.f32 %v4538_v35, %v1093_v44  ;;  %v1764_v56 = vpop.f32.mrf.mxu0  ;;  %v1402_v43 = vpop.f32.mrf.mxu3  ;;  %v2478_v35 = vsel %vm2443_vm6, %v2468_v24, %v2477_v2  ;;  %v2816_v24 = vrot.slane %v4542_v27, 3  ;;  %v1851_v44 = vsel %vm1846_vm7, %v1848_v33, %v1850_v1 }
 0x18a   : > { %3696 = vmatmul.msk.bf16.vlgmr.msra.gmra.mxu1 %vm575_vm3, %v1849_v55  ;;  %v2482_v55 = vrot.slane %v2480_v57, 2 }
 0x18b   : > { %3783 = vmatmul.msk.bf16.vlgmr.msra.gmra.mxu2 %vm575_vm3, %v2210_v62  ;;  %v4593_v28 = vadd.f32 %v1761_v19, %v1454_v58  ;;  %v2485_v62 = vrot.slane %v2483_v9, 3  ;;  %v2817_v58 = vsel %vm2812_vm8, %v2814_v10, %v2816_v24 }
 0x18c   : > { %3821 = vmatmul.msk.bf16.vlgmr.msra.gmra.mxu0 %vm575_vm3, %v2815_v51 }
 0x18d   : > { %3804 = vmatmul.msk.bf16.gmra.mxu3 %vm575_vm3, %v2478_v35  ;;  %v2486_v27 = vor.u32 %v2485_v62, %v2482_v55  ;;  %v3936_v35 = vld [vmem:[%s4040_s27 + $0x20] sm:$0xff] }
 0x18e   : > { %v1034_v61 = vpop.f32.mrf.mxu2 }
 0x18f   : > { %v1094_v60 = vadd.f32 %v1034_v61, %v835_v11  ;;  %v836_v46 = vpop.f32.mrf.mxu1  ;;  %v4623_v61 = vld [vmem:[%s4040_s27 + $0x38] sm:$0xff] }
 0x190   : > { %v837_v38 = vadd.f32 %v836_v46, %v4265_v0  ;;  %v2492_v37 = vshll.u32 %v4623_v61, 16 }
 0x191   : > { %v1455_v26 = vadd.f32 %v4552_v8, %v1094_v60  ;;  %v1766_v31 = vpop.f32.mrf.mxu0  ;;  %v1405_v53 = vpop.f32.mrf.mxu3 }
 0x193   : > { %v4603_v19 = vadd.f32 %v1764_v56, %v1455_v26  ;;  %v1852_v26 = vrot.slane %v3936_v35, 2 }
 0x196   : > { %v1036_v52 = vpop.f32.mrf.mxu2 }
 0x197   : > { %v1095_v8 = vadd.f32 %v1036_v52, %v837_v38  ;;  %v839_v45 = vpop.f32.mrf.mxu1 }
 0x198   : > { %v840_v33 = vadd.f32 %v839_v45, %v4280_v22  ;;  %v2489_v22 = vshrl.u32 %v4623_v61, 16 }
 0x199   : > { %v1456_v6 = vadd.f32 %v4566_v16, %v1095_v8  ;;  %v1769_v18 = vpop.f32.mrf.mxu0  ;;  %v1407_v56 = vpop.f32.mrf.mxu3  ;;  %v2487_v16 = vsel %vm2443_vm6, %v2477_v2, %v2486_v27  ;;  %v2818_v2 = vrot.slane %v4572_v7, 3  ;;  %v1853_v8 = vsel %vm1846_vm7, %v1850_v1, %v1852_v26 }
 0x19a   : > { %3697 = vmatmul.msk.bf16.gmra.mxu1 %vm575_vm3, %v1851_v44  ;;  %v2491_v44 = vrot.slane %v2489_v22, 2 }
 0x19b   : > { %3784 = vmatmul.msk.bf16.gmra.mxu2 %vm575_vm3, %v2212_v48  ;;  %v4617_v0 = vadd.f32 %v1766_v31, %v1456_v6  ;;  %v2213_v31 = vrot.slane %v4572_v7, 2  ;;  %v2494_v48 = vrot.slane %v2492_v37, 3  ;;  %v2819_v6 = vsel %vm2812_vm8, %v2816_v24, %v2818_v2 }
 0x19c   : > { %3822 = vmatmul.msk.bf16.gmra.mxu0 %vm575_vm3, %v2817_v58 }
 0x19d   : > { %3805 = vmatmul.msk.bf16.gmra.mxu3 %vm575_vm3, %v2487_v16  ;;  %v2214_v45 = vsel %vm1846_vm7, %v2211_v3, %v2213_v31  ;;  %v2495_v7 = vor.u32 %v2494_v48, %v2491_v44  ;;  %v3937_v16 = vld [vmem:[%s4040_s27 + $0x28] sm:$0xff] }
 0x19e   : > { %v1039_v59 = vpop.f32.mrf.mxu2 }
 0x19f   : > { %v1096_v51 = vadd.f32 %v1039_v59, %v840_v33  ;;  %v841_v11 = vpop.f32.mrf.mxu1  ;;  %v4645_v59 = vld [vmem:[%s4040_s27 + $0x40] sm:$0xff] }
 0x1a0   : > { %v842_v57 = vadd.f32 %v841_v11, %v4291_v30  ;;  %v2501_v35 = vshll.u32 %v4645_v59, 16 }
 0x1a1   : > { %v1457_v10 = vadd.f32 %v1400_v49, %v1096_v51  ;;  %v1771_v60 = vpop.f32.mrf.mxu0  ;;  %v1410_v38 = vpop.f32.mrf.mxu3 }
 0x1a3   : > { %v4626_v46 = vadd.f32 %v1769_v18, %v1457_v10  ;;  %v1854_v10 = vrot.slane %v3937_v16, 2 }
 0x1a6   : > { %v1041_v9 = vpop.f32.mrf.mxu2 }
 0x1a7   : > { %v1097_v49 = vadd.f32 %v1041_v9, %v842_v57  ;;  %v844_v52 = vpop.f32.mrf.mxu1 }
 0x1a8   : > { %v845_v1 = vadd.f32 %v844_v52, %v4306_v47  ;;  %v2498_v47 = vshrl.u32 %v4645_v59, 16 }
 0x1a9   : > { %v1458_v55 = vadd.f32 %v1402_v43, %v1097_v49  ;;  %v1774_v62 = vpop.f32.mrf.mxu0  ;;  %v1412_v18 = vpop.f32.mrf.mxu3  ;;  %v2496_v43 = vsel %vm2443_vm6, %v2486_v27, %v2495_v7  ;;  %v2820_v27 = vrot.slane %v4599_v17, 3  ;;  %v1855_v49 = vsel %vm1846_vm7, %v1852_v26, %v1854_v10 }
 0x1aa   : > { %3698 = vmatmul.msk.bf16.gmra.mxu1 %vm575_vm3, %v1853_v8  ;;  %v2500_v8 = vrot.slane %v2498_v47, 2 }
 0x1ab   : > { %3785 = vmatmul.msk.bf16.gmra.mxu2 %vm575_vm3, %v2214_v45  ;;  %v4639_v30 = vadd.f32 %v1771_v60, %v1458_v55  ;;  %v2215_v60 = vrot.slane %v4599_v17, 2  ;;  %v2503_v45 = vrot.slane %v2501_v35, 3  ;;  %v2821_v55 = vsel %vm2812_vm8, %v2818_v2, %v2820_v27 }
 0x1ac   : > { %3823 = vmatmul.msk.bf16.gmra.mxu0 %vm575_vm3, %v2819_v6 }
 0x1ad   : > { %3806 = vmatmul.msk.bf16.gmra.mxu3 %vm575_vm3, %v2496_v43  ;;  %v2216_v52 = vsel %vm1846_vm7, %v2213_v31, %v2215_v60  ;;  %v2504_v17 = vor.u32 %v2503_v45, %v2500_v8  ;;  %v3938_v43 = vld [vmem:[%s4040_s27 + $0x30] sm:$0xff] }
 0x1ae   : > { %v1044_v3 = vpop.f32.mrf.mxu2 }
 0x1af   : > { %v1098_v58 = vadd.f32 %v1044_v3, %v845_v1  ;;  %v846_v33 = vpop.f32.mrf.mxu1  ;;  %v4667_v3 = vld [vmem:[%s4040_s27 + $0x48] sm:$0xff] }
 0x1b0   : > { %v847_v22 = vadd.f32 %v846_v33, %v4317_v54  ;;  %v2510_v16 = vshll.u32 %v4667_v3, 16 }
 0x1b1   : > { %v1459_v24 = vadd.f32 %v1405_v53, %v1098_v58  ;;  %v1776_v51 = vpop.f32.mrf.mxu0  ;;  %v1415_v57 = vpop.f32.mrf.mxu3 }
 0x1b3   : > { %v4648_v11 = vadd.f32 %v1774_v62, %v1459_v24  ;;  %v1856_v24 = vrot.slane %v3938_v43, 2  ;;  %v2219_v43 = vrot.slane %v4645_v59, 2 }
 0x1b6   : > { %v1046_v37 = vpop.f32.mrf.mxu2 }
 0x1b7   : > { %v1099_v53 = vadd.f32 %v1046_v37, %v847_v22  ;;  %v849_v9 = vpop.f32.mrf.mxu1 }
 0x1b8   : > { %v850_v26 = vadd.f32 %v849_v9, %v4332_v25  ;;  %v2507_v25 = vshrl.u32 %v4667_v3, 16 }
 0x1b9   : > { %v1460_v44 = vadd.f32 %v1407_v56, %v1099_v53  ;;  %v1779_v48 = vpop.f32.mrf.mxu0  ;;  %v1417_v62 = vpop.f32.mrf.mxu3  ;;  %v2505_v56 = vsel %vm2443_vm6, %v2495_v7, %v2504_v17  ;;  %v2822_v7 = vrot.slane %v4623_v61, 3  ;;  %v1857_v53 = vsel %vm1846_vm7, %v1854_v10, %v1856_v24  ;;  %v5405_v10 = vld [vmem:[#allocation9_spill] sm:$0xff] }
 0x1ba   : > { %3699 = vmatmul.msk.bf16.gmra.mxu1 %vm575_vm3, %v1855_v49  ;;  %v2509_v49 = vrot.slane %v2507_v25, 2 }
 0x1bb   : > { %3786 = vmatmul.msk.bf16.gmra.mxu2 %vm575_vm3, %v2216_v52  ;;  %v4661_v54 = vadd.f32 %v1776_v51, %v1460_v44  ;;  %v2217_v51 = vrot.slane %v4623_v61, 2  ;;  %v2512_v52 = vrot.slane %v2510_v16, 3  ;;  %v2823_v44 = vsel %vm2812_vm8, %v2820_v27, %v2822_v7 }
 0x1bc   : > { %3824 = vmatmul.msk.bf16.gmra.mxu0 %vm575_vm3, %v2821_v55 }
 0x1bd   : > { %3807 = vmatmul.msk.bf16.gmra.mxu3 %vm575_vm3, %v2505_v56  ;;  %v2218_v9 = vsel %vm1846_vm7, %v2215_v60, %v2217_v51  ;;  %v2513_v61 = vor.u32 %v2512_v52, %v2509_v49  ;;  %v2220_v49 = vsel %vm1846_vm7, %v2217_v51, %v2219_v43 }
 0x1be   : > { %v1049_v31 = vpop.f32.mrf.mxu2 }
 0x1bf   : > { %v1100_v6 = vadd.f32 %v1049_v31, %v850_v26  ;;  %v851_v1 = vpop.f32.mrf.mxu1 }
 0x1c0   : > { %v852_v47 = vadd.f32 %v851_v1, %v4343_v29 }
 0x1c1   : > { %v1461_v2 = vadd.f32 %v1410_v38, %v1100_v6  ;;  %v1781_v58 = vpop.f32.mrf.mxu0  ;;  %v1420_v22 = vpop.f32.mrf.mxu3  ;;  %v4689_v6 = vld [vmem:[%s4040_s27 + $0x50] sm:$0xff] }
 0x1c2   : > { %v2516_v25 = vshrl.u32 %v4689_v6, 16  ;;  %v2519_v16 = vshll.u32 %v4689_v6, 16 }
 0x1c3   : > { %v4670_v33 = vadd.f32 %v1779_v48, %v1461_v2  ;;  %v3939_v2 = vld [vmem:[%s4040_s27 + $0x38] sm:$0xff] }
 0x1c4   : > { %v2518_v52 = vrot.slane %v2516_v25, 2  ;;  %v3940_v25 = vld [vmem:[%s4040_s27 + $0x40] sm:$0xff] }
 0x1c6   : > { %v1051_v35 = vpop.f32.mrf.mxu2 }
 0x1c7   : > { %v1101_v38 = vadd.f32 %v1051_v35, %v852_v47  ;;  %v854_v37 = vpop.f32.mrf.mxu1  ;;  %v5406_v47 = vld [vmem:[#allocation10_spill] sm:$0xff] }
 0x1c8   : > { %v855_v48 = vadd.f32 %v854_v37, %v5405_v10 }
 0x1c9   : > { %v1462_v8 = vadd.f32 %v1412_v18, %v1101_v38  ;;  %v1784_v45 = vpop.f32.mrf.mxu0  ;;  %v1422_v55 = vpop.f32.mrf.mxu3  ;;  %v2514_v18 = vsel %vm2443_vm6, %v2504_v17, %v2513_v61  ;;  %v2824_v17 = vrot.slane %v4645_v59, 3 }
 0x1ca   : > { %3700 = vmatmul.msk.bf16.gmra.mxu1 %vm575_vm3, %v1857_v53 }
 0x1cb   : > { %3787 = vmatmul.msk.bf16.gmra.mxu2 %vm575_vm3, %v2218_v9  ;;  %v4683_v29 = vadd.f32 %v1781_v58, %v1462_v8  ;;  %v1858_v58 = vrot.slane %v3939_v2, 2  ;;  %v2521_v8 = vrot.slane %v2519_v16, 3  ;;  %v2825_v10 = vsel %vm2812_vm8, %v2822_v7, %v2824_v17  ;;  %v4713_v7 = vld [vmem:[%s4040_s27 + $0x58] sm:$0xff] }
 0x1cc   : > { %3825 = vmatmul.msk.bf16.gmra.mxu0 %vm575_vm3, %v2823_v44  ;;  %v1860_v16 = vrot.slane %v3940_v25, 2  ;;  %v4750_v25 = vld [vmem:[%s4040_s27 + $0x60] sm:$0xff] }
 0x1cd   : > { %3808 = vmatmul.msk.bf16.gmra.mxu3 %vm575_vm3, %v2514_v18  ;;  %v1859_v9 = vsel %vm1846_vm7, %v1856_v24, %v1858_v58  ;;  %v5407_v24 = vld [vmem:[#allocation3_spill] sm:$0xff] }
 0x1ce   : > { %v1054_v60 = vpop.f32.mrf.mxu2 }
 0x1cf   : > { %v1102_v26 = vadd.f32 %v1054_v60, %v855_v48  ;;  %v856_v31 = vpop.f32.mrf.mxu1  ;;  %v2522_v48 = vor.u32 %v2521_v8, %v2518_v52  ;;  %v1861_v8 = vsel %vm1846_vm7, %v1858_v58, %v1860_v16  ;;  %v5409_v58 = vld [vmem:[#allocation5_spill] sm:$0xff] }
 0x1d0   : > { %v857_v35 = vadd.f32 %v856_v31, %v5406_v47  ;;  %v2221_v47 = vrot.slane %v4667_v3, 2 }
 0x1d1   : > { %v1463_v27 = vadd.f32 %v1415_v57, %v1102_v26  ;;  %v1786_v1 = vpop.f32.mrf.mxu0  ;;  %v1425_v37 = vpop.f32.mrf.mxu3  ;;  %v2523_v18 = vsel %vm2443_vm6, %v2513_v61, %v2522_v48  ;;  %v2826_v61 = vrot.slane %v4667_v3, 3 }
 0x1d3   : > { %v4692_v56 = vadd.f32 %v1784_v45, %v1463_v27 }
 0x1d6   : > { %v1056_v38 = vpop.f32.mrf.mxu2 }
 0x1d7   : > { %v1103_v57 = vadd.f32 %v1056_v38, %v857_v35  ;;  %v859_v53 = vpop.f32.mrf.mxu1  ;;  %v2525_v35 = vshrl.u32 %v4713_v7, 16  ;;  %v2528_v38 = vshll.u32 %v4713_v7, 16 }
 0x1d8   : > { %v860_v60 = vadd.f32 %v859_v53, %v5407_v24 }
 0x1d9   : > { %v1464_v45 = vadd.f32 %v1417_v62, %v1103_v57  ;;  %v1789_v44 = vpop.f32.mrf.mxu0  ;;  %v4709_v26 = vpop.f32.mrf.mxu3  ;;  %v5408_v57 = vld [vmem:[#allocation4_spill] sm:$0xff] }
 0x1da   : > { %3701 = vmatmul.msk.bf16.gmra.mxu1 %vm575_vm3, %v1859_v9 }
 0x1db   : > { %3788 = vmatmul.msk.bf16.gmra.mxu2 %vm575_vm3, %v2220_v49  ;;  %v4705_v59 = vadd.f32 %v1786_v1, %v1464_v45  ;;  %v2222_v45 = vsel %vm1846_vm7, %v2219_v43, %v2221_v47 }
 0x1dc   : > { %3826 = vmatmul.msk.bf16.gmra.mxu0 %vm575_vm3, %v2825_v10  ;;  %v2530_v10 = vrot.slane %v2528_v38, 3 }
 0x1dd   : > { %3809 = vmatmul.msk.bf16.gmra.mxu3 %vm575_vm3, %v2523_v18 }
 0x1de   : > { %v1059_v51 = vpop.f32.mrf.mxu2 }
 0x1df   : > { %v1104_v31 = vadd.f32 %v1059_v51, %v860_v60  ;;  %v861_v62 = vpop.f32.mrf.mxu1  ;;  %v2827_v51 = vsel %vm2812_vm8, %v2824_v17, %v2826_v61 }
 0x1e0   : > { %v862_v53 = vadd.f32 %v861_v62, %v5408_v57  ;;  %v3977_v62 = vmov 0.0  }
 0x1e1   : > { %v1465_v27 = vadd.f32 %v1420_v22, %v1104_v31  ;;  %v1791_v2 = vpop.f32.mrf.mxu0  ;;  %v4724_v49 = vpop.f32.mrf.mxu3  ;;  %257 = vst.msk [vmem:[#allocation2] sm:$0xff] %vm256_vm9, %v3977_v62 }
 0x1e2   : > { %258 = vst.msk [vmem:[#allocation2 + $0x8] sm:$0xff] %vm256_vm9, %v3977_v62 }
 0x1e3   : > { %v4716_v1 = vadd.f32 %v1789_v44, %v1465_v27  ;;  %v2527_v44 = vrot.slane %v2525_v35, 2  ;;  %259 = vst.msk [vmem:[#allocation2 + $0x10] sm:$0xff] %vm256_vm9, %v3977_v62 }
 0x1e4   : > { %260 = vst.msk [vmem:[#allocation2 + $0x18] sm:$0xff] %vm256_vm9, %v3977_v62 }
 0x1e5   : > { %v4734_v31 = vor.u32 %v2530_v10, %v2527_v44  ;;  %261 = vst.msk [vmem:[#allocation2 + $0x20] sm:$0xff] %vm256_vm9, %v3977_v62 }
 0x1e6   : > { %v1061_v9 = vpop.f32.mrf.mxu2  ;;  %262 = vst.msk [vmem:[#allocation2 + $0x28] sm:$0xff] %vm256_vm9, %v3977_v62 }
 0x1e7   : > { %v1105_v22 = vadd.f32 %v1061_v9, %v862_v53  ;;  %v864_v52 = vpop.f32.mrf.mxu1  ;;  %263 = vst.msk [vmem:[#allocation2 + $0x30] sm:$0xff] %vm256_vm9, %v3977_v62  ;;  %v2534_v9 = vshrl.u32 %v4750_v25, 16 }
 0x1e8   : > { %v865_v43 = vadd.f32 %v864_v52, %v5409_v58  ;;  %264 = vst.msk [vmem:[#allocation2 + $0x38] sm:$0xff] %vm256_vm9, %v3977_v62  ;;  %v5410_v52 = vld [vmem:[#allocation6_spill] sm:$0xff] }
 0x1e9   : > { %v1466_v24 = vadd.f32 %v1422_v55, %v1105_v22  ;;  %v1794_v60 = vpop.f32.mrf.mxu0  ;;  %v4739_v17 = vpop.f32.mrf.mxu3  ;;  %v2537_v22 = vshll.u32 %v4750_v25, 16  ;;  %265 = vst.msk [vmem:[#allocation2 + $0x40] sm:$0xff] %vm256_vm9, %v3977_v62 }
 0x1ea   : > { %3702 = vmatmul.msk.bf16.gmra.mxu1 %vm575_vm3, %v1861_v8  ;;  %266 = vst.msk [vmem:[#allocation2 + $0x48] sm:$0xff] %vm256_vm9, %v3977_v62 }
 0x1eb   : > { %3789 = vmatmul.msk.bf16.gmra.mxu2 %vm575_vm3, %v2222_v45  ;;  %v4731_v3 = vadd.f32 %v1791_v2, %v1466_v24  ;;  %v2532_v2 = vsel %vm2443_vm6, %v2522_v48, %v4734_v31  ;;  %v4762_v48 = vld [vmem:[%s4040_s27 + $0x48] sm:$0xff]  ;;  %v2828_v45 = vrot.slane %v4689_v6, 3  ;;  %267 = vst.msk [vmem:[#allocation2 + $0x50] sm:$0xff] %vm256_vm9, %v3977_v62 }
 0x1ec   : > { %3827 = vmatmul.msk.bf16.gmra.mxu0 %vm575_vm3, %v2827_v51  ;;  %v1862_v53 = vrot.slane %v4762_v48, 2  ;;  %268 = vst.msk [vmem:[#allocation2 + $0x58] sm:$0xff] %vm256_vm9, %v3977_v62 }
 0x1ed   : > { %3810 = vmatmul.msk.bf16.gmra.mxu3 %vm575_vm3, %v2532_v2  ;;  %v2829_v2 = vsel %vm2812_vm8, %v2826_v61, %v2828_v45  ;;  %269 = vst.msk [vmem:[#allocation2 + $0x60] sm:$0xff] %vm256_vm9, %v3977_v62 }
 0x1ee   : > { %v1064_v55 = vpop.f32.mrf.mxu2  ;;  %v1863_v51 = vsel %vm1846_vm7, %v1860_v16, %v1862_v53  ;;  %270 = vst.msk [vmem:[#allocation2 + $0x68] sm:$0xff] %vm256_vm9, %v3977_v62 }
 0x1ef   : > { %v1106_v18 = vadd.f32 %v1064_v55, %v865_v43  ;;  %v866_v27 = vpop.f32.mrf.mxu1  ;;  %v2536_v43 = vrot.slane %v2534_v9, 2  ;;  %v2539_v55 = vrot.slane %v2537_v22, 3  ;;  %271 = vst.msk [vmem:[#allocation2 + $0x70] sm:$0xff] %vm256_vm9, %v3977_v62 }
 0x1f0   : > { %v867_v8 = vadd.f32 %v866_v27, %v5410_v52  ;;  %272 = vst.msk [vmem:[#allocation2 + $0x78] sm:$0xff] %vm256_vm9, %v3977_v62 }
 0x1f1   : > { %v1467_v35 = vadd.f32 %v1425_v37, %v1106_v18  ;;  %v1796_v38 = vpop.f32.mrf.mxu0  ;;  %v2223_v37 = vrot.slane %v4689_v6, 2  ;;  %v4774_v10 = vpop.f32.mrf.mxu3  ;;  %v2540_v16 = vor.u32 %v2539_v55, %v2536_v43  ;;  %273 = vst.msk [vmem:[#allocation2 + $0x80] sm:$0xff] %vm256_vm9, %v3977_v62  ;;  %v5412_v55 = vld [vmem:[#allocation8_spill] sm:$0xff] }
 0x1f2   : > { %274 = vst.msk [vmem:[#allocation2 + $0x88] sm:$0xff] %vm256_vm9, %v3977_v62 }
 0x1f3   : > { %v4759_v57 = vadd.f32 %v1794_v60, %v1467_v35  ;;  %v2224_v58 = vsel %vm1846_vm7, %v2221_v47, %v2223_v37  ;;  %v5411_v47 = vld [vmem:[#allocation7_spill] sm:$0xff]  ;;  %275 = vst.msk [vmem:[#allocation2 + $0x90] sm:$0xff] %vm256_vm9, %v3977_v62  ;;  %v2541_v52 = vsel %vm2443_vm6, %v4734_v31, %v2540_v16 }
 0x1f4   : > { %276 = vst.msk [vmem:[#allocation2 + $0x98] sm:$0xff] %vm256_vm9, %v3977_v62 }
 0x1f5   : > { %277 = vst.msk [vmem:[#allocation2 + $0xa0] sm:$0xff] %vm256_vm9, %v3977_v62 }
 0x1f6   : > { %v1066_v44 = vpop.f32.mrf.mxu2  ;;  %278 = vst.msk [vmem:[#allocation2 + $0xa8] sm:$0xff] %vm256_vm9, %v3977_v62 }
 0x1f7   : > { %v1107_v24 = vadd.f32 %v1066_v44, %v867_v8  ;;  %v869_v60 = vpop.f32.mrf.mxu1  ;;  %v4819_v8 = vld [vmem:[%s4040_s27 + $0x68] sm:$0xff]  ;;  %279 = vst.msk [vmem:[#allocation2 + $0xb0] sm:$0xff] %vm256_vm9, %v3977_v62 }
 0x1f8   : > { %v870_v61 = vadd.f32 %v869_v60, %v5411_v47  ;;  %280 = vst.msk [vmem:[#allocation2 + $0xb8] sm:$0xff] %vm256_vm9, %v3977_v62  ;;  %v2546_v43 = vshll.u32 %v4819_v8, 16 }
 0x1f9   : > { %v1468_v18 = vadd.f32 %v4709_v26, %v1107_v24  ;;  %v1799_v27 = vpop.f32.mrf.mxu0  ;;  %v4810_v9 = vpop.f32.mrf.mxu3  ;;  %281 = vst.msk [vmem:[#allocation2 + $0xc0] sm:$0xff] %vm256_vm9, %v3977_v62 }
 0x1fa   : > { %3703 = vmatmul.msk.bf16.gmra.mxu1 %vm575_vm3, %v1863_v51  ;;  %v4832_v51 = vld [vmem:[%s4040_s27 + $0x50] sm:$0xff]  ;;  %282 = vst.msk [vmem:[#allocation2 + $0xc8] sm:$0xff] %vm256_vm9, %v3977_v62 }
 0x1fb   : > { %3790 = vmatmul.msk.bf16.gmra.mxu2 %vm575_vm3, %v2224_v58  ;;  %v4800_v26 = vadd.f32 %v1796_v38, %v1468_v18  ;;  %v1864_v31 = vrot.slane %v4832_v51, 2  ;;  %v2543_v58 = vshrl.u32 %v4819_v8, 16  ;;  %283 = vst.msk [vmem:[#allocation2 + $0xd0] sm:$0xff] %vm256_vm9, %v3977_v62 }
 0x1fc   : > { %3828 = vmatmul.msk.bf16.gmra.mxu0 %vm575_vm3, %v2829_v2  ;;  %v2830_v2 = vrot.slane %v4713_v7, 3  ;;  %284 = vst.msk [vmem:[#allocation2 + $0xd8] sm:$0xff] %vm256_vm9, %v3977_v62 }
 0x1fd   : > { %3811 = vmatmul.msk.bf16.gmra.mxu3 %vm575_vm3, %v2541_v52  ;;  %v2548_v52 = vrot.slane %v2546_v43, 3  ;;  %285 = vst.msk [vmem:[#allocation2 + $0xe0] sm:$0xff] %vm256_vm9, %v3977_v62 }
 0x1fe   : > { %v1069_v35 = vpop.f32.mrf.mxu2  ;;  %286 = vst.msk [vmem:[#allocation2 + $0xe8] sm:$0xff] %vm256_vm9, %v3977_v62 }
 0x1ff   : > { %v1108_v38 = vadd.f32 %v1069_v35, %v870_v61  ;;  %v871_v22 = vpop.f32.mrf.mxu1  ;;  %287 = vst.msk [vmem:[#allocation2 + $0xf0] sm:$0xff] %vm256_vm9, %v3977_v62 }
 0x200   : > { %v872_v18 = vadd.f32 %v871_v22, %v5412_v55  ;;  %v2545_v22 = vrot.slane %v2543_v58, 2  ;;  %v2831_v55 = vsel %vm2812_vm8, %v2828_v45, %v2830_v2  ;;  %288 = vst.msk [vmem:[#allocation2 + $0xf8] sm:$0xff] %vm256_vm9, %v3977_v62  ;;  %v4888_v58 = vld [vmem:[%s4040_s27 + $0x70] sm:$0xff] }
 0x201   : > { %v1469_v44 = vadd.f32 %v4724_v49, %v1108_v38  ;;  %v1801_v24 = vpop.f32.mrf.mxu0  ;;  %v2225_v49 = vrot.slane %v4713_v7, 2  ;;  %v4846_v47 = vpop.f32.mrf.mxu3  ;;  %v1865_v38 = vsel %vm1846_vm7, %v1862_v53, %v1864_v31  ;;  %289 = vst.msk [vmem:[#allocation2 + $0x100] sm:$0xff] %vm256_vm9, %v3977_v62 }
 0x202   : > { %v2549_v6 = vor.u32 %v2548_v52, %v2545_v22  ;;  %290 = vst.msk [vmem:[#allocation2 + $0x108] sm:$0xff] %vm256_vm9, %v3977_v62  ;;  %v2555_v22 = vshll.u32 %v4888_v58, 16 }
 0x203   : > { %v4829_v60 = vadd.f32 %v1799_v27, %v1469_v44  ;;  %v2226_v7 = vsel %vm1846_vm7, %v2223_v37, %v2225_v49  ;;  %291 = vst.msk [vmem:[#allocation2 + $0x110] sm:$0xff] %vm256_vm9, %v3977_v62 }
 0x204   : > { %292 = vst.msk [vmem:[#allocation2 + $0x118] sm:$0xff] %vm256_vm9, %v3977_v62  ;;  %v2552_v62 = vshrl.u32 %v4888_v58, 16 }
 0x206   : > { %v1071_v27 = vpop.f32.mrf.mxu2 }
 0x207   : > { %v1109_v61 = vadd.f32 %v1071_v27, %v872_v18  ;;  %v1950_v35 = vpop.f32.mrf.mxu1  ;;  %v3042_v27 = vld [vmem:[#allocation2] sm:$0xff] }
 0x208   : > { %v2040_v48 = vadd.f32 %v1950_v35, %v4377_v39  ;;  %v2550_v39 = vsel %vm2443_vm6, %v2540_v16, %v2549_v6  ;;  %v4893_v35 = vld [vmem:[%s4040_s27 + $0x58] sm:$0xff] }
 0x209   : > { %v1470_v44 = vadd.f32 %v4739_v17, %v1109_v61  ;;  %v2916_v51 = vpop.f32.mrf.mxu0  ;;  %v4880_v37 = vpop.f32.mrf.mxu3 }
 0x20a   : > { %3704 = vmatmul.msk.bf16.gmra.mxu1 %vm575_vm3, %v1865_v38  ;;  %v1866_v38 = vrot.slane %v4893_v35, 2 }
 0x20b   : > { %3791 = vmatmul.msk.bf16.gmra.mxu2 %vm575_vm3, %v2226_v7  ;;  %v4870_v17 = vadd.f32 %v1801_v24, %v1470_v44  ;;  %v2227_v7 = vrot.slane %v4750_v25, 2 }
 0x20c   : > { %3829 = vmatmul.msk.bf16.gmra.mxu0 %vm575_vm3, %v2831_v55 }
 0x20d   : > { %3812 = vmatmul.msk.bf16.gmra.mxu3 %vm575_vm3, %v2550_v39  ;;  %v2554_v39 = vrot.slane %v2552_v62, 2 }
 0x20e   : > { %v2311_v53 = vpop.f32.mrf.mxu2 }
 0x20f   : > { %v2401_v45 = vadd.f32 %v2311_v53, %v2040_v48  ;;  %v1952_v24 = vpop.f32.mrf.mxu1  ;;  %v1867_v53 = vsel %vm1846_vm7, %v1864_v31, %v1866_v38 }
 0x210   : > { %v2041_v52 = vadd.f32 %v1952_v24, %v4387_v32  ;;  %v2557_v32 = vrot.slane %v2555_v22, 3 }
 0x211   : > { %v2770_v43 = vadd.f32 %v4774_v10, %v2401_v45  ;;  %v2918_v18 = vpop.f32.mrf.mxu0  ;;  %v2832_v10 = vrot.slane %v4750_v25, 3  ;;  %v4901_v55 = vpop.f32.mrf.mxu3  ;;  %v2228_v45 = vsel %vm1846_vm7, %v2225_v49, %v2227_v7 }
 0x213   : > { %v3006_v61 = vadd.f32 %v2916_v51, %v2770_v43 }
 0x215   : > { %v3078_v16 = vadd.f32 %v3042_v27, %v3006_v61  ;;  %v2833_v27 = vsel %vm2812_vm8, %v2830_v2, %v2832_v10  ;;  %v3043_v61 = vld [vmem:[#allocation2 + $0x8] sm:$0xff] }
 0x216   : > { %v2313_v44 = vpop.f32.mrf.mxu2 }
 0x217   : > { %3115 = vst.msk [vmem:[#allocation2] sm:$0xff] %vm256_vm9, %v3078_v16  ;;  %v2402_v51 = vadd.f32 %v2313_v44, %v2041_v52  ;;  %v1955_v48 = vpop.f32.mrf.mxu1  ;;  %v4917_v16 = vld [vmem:[%s5389_s2] ss:$0 sm:$0xff] }
 0x218   : > { %v2042_v62 = vadd.f32 %v1955_v48, %v4393_v23 }
 0x219   : > { %v2771_v24 = vadd.f32 %v4810_v9, %v2402_v51  ;;  %v2921_v43 = vpop.f32.mrf.mxu0  ;;  %v4922_v9 = vor.u32 %v2557_v32, %v2554_v39  ;;  %v4926_v52 = vpop.f32.mrf.mxu3  ;;  %v3044_v32 = vld [vmem:[#allocation2 + $0x10] sm:$0xff] }
 0x21a   : > { %3705 = vmatmul.msk.bf16.gmra.mxu1 %vm575_vm3, %v1867_v53 }
 0x21b   : > { %v3007_v31 = vadd.f32 %v2918_v18, %v2771_v24  ;;  %3792 = vmatmul.msk.bf16.gmra.mxu2 %vm575_vm3, %v2228_v45  ;;  %v2559_v53 = vsel %vm2443_vm6, %v2549_v6, %v4922_v9  ;;  %v4933_v45 = vld [vmem:[%s4040_s27 + $0x78] sm:$0xff] }
 0x21c   : > { %3830 = vmatmul.msk.bf16.gmra.mxu0 %vm575_vm3, %v2833_v27 }
 0x21d   : > { %v3079_v49 = vadd.f32 %v3043_v61, %v3007_v31  ;;  %3813 = vmatmul.msk.bf16.gmra.mxu3 %vm575_vm3, %v2559_v53  ;;  %v4943_v61 = vld [vmem:[%s4040_s27 + $0x60] sm:$0xff]  ;;  %v2229_v31 = vrot.slane %v4819_v8, 2 }
 0x21e   : > { %v3154_v2 = vld [vmem:[#allocation2] sm:$0xff]  ;;  %v2316_v22 = vpop.f32.mrf.mxu2  ;;  %v1868_v6 = vrot.slane %v4943_v61, 2 }
 0x21f   : > { %v3194_v18 = vadd.f32 %v4917_v16, %v3154_v2  ;;  %3116 = vst.msk [vmem:[#allocation2 + $0x8] sm:$0xff] %vm256_vm9, %v3079_v49  ;;  %v2403_v44 = vadd.f32 %v2316_v22, %v2042_v62  ;;  %v1957_v51 = vpop.f32.mrf.mxu1  ;;  %v2564_v49 = vshll.u32 %v4933_v45, 16  ;;  %v2834_v22 = vrot.slane %v4819_v8, 3 }
 0x220   : > { %v2043_v2 = vadd.f32 %v1957_v51, %v4403_v36  ;;  %v2230_v36 = vsel %vm1846_vm7, %v2227_v7, %v2229_v31 }
 0x221   : > { %v3230_v39 = vmax.f32 %v3194_v18, 0.0  ;;  %v2772_v23 = vadd.f32 %v4846_v47, %v2403_v44  ;;  %v2923_v48 = vpop.f32.mrf.mxu0  ;;  %v2561_v47 = vshrl.u32 %v4933_v45, 16  ;;  %v4953_v44 = vpop.f32.mrf.mxu3  ;;  %v2835_v35 = vsel %vm2812_vm8, %v2832_v10, %v2834_v22 }
 0x223   : > { %v3266_v24 = vpack.c.bf16 %v3230_v39, %v3230_v39  ;;  %v3008_v27 = vadd.f32 %v2921_v43, %v2772_v23  ;;  %v2563_v51 = vrot.slane %v2561_v47, 2 }
 0x225   : > { %3303 = vst.msk [vmem:[%s4939_s19] sm:$0xf] %vm3302_vm10, %v3266_v24  ;;  %v3080_v62 = vadd.f32 %v3044_v32, %v3008_v27  ;;  %v1869_v32 = vsel %vm1846_vm7, %v1866_v38, %v1868_v6  ;;  %v2566_v24 = vrot.slane %v2564_v49, 3 }
 0x226   : > { %v3155_v43 = vld [vmem:[#allocation2 + $0x8] sm:$0xff]  ;;  %v2318_v18 = vpop.f32.mrf.mxu2 }
 0x227   : > { %v3195_v53 = vadd.f32 %v4917_v16, %v3155_v43  ;;  %3117 = vst.msk [vmem:[#allocation2 + $0x10] sm:$0xff] %vm256_vm9, %v3080_v62  ;;  %v2404_v39 = vadd.f32 %v2318_v18, %v2043_v2  ;;  %v1960_v23 = vpop.f32.mrf.mxu1  ;;  %v3045_v43 = vld [vmem:[#allocation2 + $0x18] sm:$0xff]  ;;  %v2567_v7 = vor.u32 %v2566_v24, %v2563_v51  ;;  %v3046_v24 = vld [vmem:[#allocation2 + $0x20] sm:$0xff] }
 0x228   : > { %v2044_v47 = vadd.f32 %v1960_v23, %v4409_v63 }
 0x229   : > { %v3231_v27 = vmax.f32 %v3195_v53, 0.0  ;;  %v2773_v62 = vadd.f32 %v4880_v37, %v2404_v39  ;;  %v2926_v2 = vpop.f32.mrf.mxu0  ;;  %v4979_v10 = vpop.f32.mrf.mxu3 }
 0x22a   : > { %3706 = vmatmul.msk.bf16.gmra.mxu1 %vm575_vm3, %v1869_v32  ;;  %v2568_v32 = vsel %vm2443_vm6, %v4922_v9, %v2567_v7 }
 0x22b   : > { %v3267_v38 = vpack.c.bf16 %v3231_v27, %v3231_v27  ;;  %v3009_v18 = vadd.f32 %v2923_v48, %v2773_v62  ;;  %3793 = vmatmul.msk.bf16.gmra.mxu2 %vm575_vm3, %v2230_v36  ;;  %v4986_v36 = vld [vmem:[%s4040_s27 + $0x80] sm:$0xff] }
 0x22c   : > { %3831 = vmatmul.msk.bf16.gmra.mxu0 %vm575_vm3, %v2835_v35  ;;  %v4991_v35 = vld [vmem:[%s4040_s27 + $0x68] sm:$0xff]  ;;  %v2573_v9 = vshll.u32 %v4986_v36, 16 }
 0x22d   : > { %3304 = vst.msk [vmem:[%s4939_s19 + $0x4] sm:$0xf] %vm3302_vm10, %v3267_v38  ;;  %v3081_v37 = vadd.f32 %v3045_v43, %v3009_v18  ;;  %3814 = vmatmul.msk.bf16.gmra.mxu3 %vm575_vm3, %v2568_v32  ;;  %v1870_v43 = vrot.slane %v4991_v35, 2  ;;  %v2231_v38 = vrot.slane %v4888_v58, 2  ;;  %v2570_v18 = vshrl.u32 %v4986_v36, 16 }
 0x22e   : > { %v3156_v49 = vld [vmem:[#allocation2 + $0x10] sm:$0xff]  ;;  %v2321_v25 = vpop.f32.mrf.mxu2 }
 0x22f   : > { %v3196_v48 = vadd.f32 %v4917_v16, %v3156_v49  ;;  %3118 = vst.msk [vmem:[#allocation2 + $0x18] sm:$0xff] %vm256_vm9, %v3081_v37  ;;  %v2405_v53 = vadd.f32 %v2321_v25, %v2044_v47  ;;  %v1962_v39 = vpop.f32.mrf.mxu1  ;;  %v2836_v47 = vrot.slane %v4888_v58, 3 }
 0x231   : > { %v3232_v51 = vmax.f32 %v3196_v48, 0.0  ;;  %v2774_v63 = vadd.f32 %v4901_v55, %v2405_v53  ;;  %v2928_v23 = vpop.f32.mrf.mxu0  ;;  %v2045_v55 = vadd.f32 %v1962_v39, %v4419_v40  ;;  %v5001_v25 = vpop.f32.mrf.mxu3  ;;  %v2232_v40 = vsel %vm1846_vm7, %v2229_v31, %v2231_v38 }
 0x232   : > { %v2572_v39 = vrot.slane %v2570_v18, 2  ;;  %v2837_v61 = vsel %vm2812_vm8, %v2834_v22, %v2836_v47 }
 0x233   : > { %v3268_v27 = vpack.c.bf16 %v3232_v51, %v3232_v51  ;;  %v3010_v62 = vadd.f32 %v2926_v2, %v2774_v63  ;;  %v1871_v51 = vsel %vm1846_vm7, %v1868_v6, %v1870_v43  ;;  %v2575_v63 = vrot.slane %v2573_v9, 3 }
 0x235   : > { %3305 = vst.msk [vmem:[%s4939_s19 + $0x8] sm:$0xf] %vm3302_vm10, %v3268_v27  ;;  %v3082_v37 = vadd.f32 %v3046_v24, %v3010_v62  ;;  %v2576_v31 = vor.u32 %v2575_v63, %v2572_v39 }
 0x236   : > { %v3157_v2 = vld [vmem:[#allocation2 + $0x18] sm:$0xff]  ;;  %v2323_v49 = vpop.f32.mrf.mxu2 }
 0x237   : > { %v3197_v48 = vadd.f32 %v4917_v16, %v3157_v2  ;;  %3119 = vst.msk [vmem:[#allocation2 + $0x20] sm:$0xff] %vm256_vm9, %v3082_v37  ;;  %v2406_v53 = vadd.f32 %v2323_v49, %v2045_v55  ;;  %v1965_v32 = vpop.f32.mrf.mxu1  ;;  %v3047_v37 = vld [vmem:[#allocation2 + $0x28] sm:$0xff] }
 0x238   : > { %v2046_v18 = vadd.f32 %v1965_v32, %v4425_v13  ;;  %v3048_v32 = vld [vmem:[#allocation2 + $0x30] sm:$0xff] }
 0x239   : > { %v3233_v24 = vmax.f32 %v3197_v48, 0.0  ;;  %v2775_v27 = vadd.f32 %v4926_v52, %v2406_v53  ;;  %v2931_v62 = vpop.f32.mrf.mxu0  ;;  %v5027_v22 = vpop.f32.mrf.mxu3  ;;  %v2577_v48 = vsel %vm2443_vm6, %v2567_v7, %v2576_v31  ;;  %v5033_v53 = vld [vmem:[%s4040_s27 + $0x88] sm:$0xff] }
 0x23a   : > { %3707 = vmatmul.msk.bf16.gmra.mxu1 %vm575_vm3, %v1871_v51  ;;  %v2582_v7 = vshll.u32 %v5033_v53, 16 }
 0x23b   : > { %v3269_v6 = vpack.c.bf16 %v3233_v24, %v3233_v24  ;;  %v3011_v55 = vadd.f32 %v2928_v23, %v2775_v27  ;;  %3794 = vmatmul.msk.bf16.gmra.mxu2 %vm575_vm3, %v2232_v40  ;;  %v5038_v24 = vld [vmem:[%s4040_s27 + $0x70] sm:$0xff] }
 0x23c   : > { %3832 = vmatmul.msk.bf16.gmra.mxu0 %vm575_vm3, %v2837_v61  ;;  %v1872_v27 = vrot.slane %v5038_v24, 2  ;;  %v2233_v61 = vrot.slane %v4933_v45, 2 }
 0x23d   : > { %3306 = vst.msk [vmem:[%s4939_s19 + $0xc] sm:$0xf] %vm3302_vm10, %v3269_v6  ;;  %v3083_v52 = vadd.f32 %v3047_v37, %v3011_v55  ;;  %3815 = vmatmul.msk.bf16.gmra.mxu3 %vm575_vm3, %v2577_v48  ;;  %v2579_v37 = vshrl.u32 %v5033_v53, 16  ;;  %v2838_v55 = vrot.slane %v4933_v45, 3  ;;  %v2584_v48 = vrot.slane %v2582_v7, 3 }
 0x23e   : > { %v3158_v9 = vld [vmem:[#allocation2 + $0x20] sm:$0xff]  ;;  %v2326_v8 = vpop.f32.mrf.mxu2 }
 0x23f   : > { %v3198_v23 = vadd.f32 %v4917_v16, %v3158_v9  ;;  %3120 = vst.msk [vmem:[#allocation2 + $0x28] sm:$0xff] %vm256_vm9, %v3083_v52  ;;  %v2407_v2 = vadd.f32 %v2326_v8, %v2046_v18  ;;  %v1967_v49 = vpop.f32.mrf.mxu1  ;;  %v2839_v35 = vsel %vm2812_vm8, %v2836_v47, %v2838_v55 }
 0x241   : > { %v3234_v51 = vmax.f32 %v3198_v23, 0.0  ;;  %v2776_v40 = vadd.f32 %v4953_v44, %v2407_v2  ;;  %v2933_v13 = vpop.f32.mrf.mxu0  ;;  %v2047_v44 = vadd.f32 %v1967_v49, %v4435_v5  ;;  %v5048_v18 = vpop.f32.mrf.mxu3  ;;  %v1873_v2 = vsel %vm1846_vm7, %v1870_v43, %v1872_v27 }
 0x242   : > { %v2234_v5 = vsel %vm1846_vm7, %v2231_v38, %v2233_v61  ;;  %v2581_v49 = vrot.slane %v2579_v37, 2 }
 0x243   : > { %v3270_v39 = vpack.c.bf16 %v3234_v51, %v3234_v51  ;;  %v3012_v63 = vadd.f32 %v2931_v62, %v2776_v40 }
 0x244   : > { %v2585_v38 = vor.u32 %v2584_v48, %v2581_v49  ;;  %v5085_v49 = vld [vmem:[%s4040_s27 + $0x78] sm:$0xff] }
 0x245   : > { %3307 = vst.msk [vmem:[%s4939_s19 + $0x10] sm:$0xf] %vm3302_vm10, %v3270_v39  ;;  %v3084_v6 = vadd.f32 %v3048_v32, %v3012_v63  ;;  %v3049_v39 = vld [vmem:[#allocation2 + $0x38] sm:$0xff]  ;;  %v1874_v48 = vrot.slane %v5085_v49, 2 }
 0x246   : > { %v3159_v62 = vld [vmem:[#allocation2 + $0x28] sm:$0xff]  ;;  %v2328_v52 = vpop.f32.mrf.mxu2 }
 0x247   : > { %v3199_v9 = vadd.f32 %v4917_v16, %v3159_v62  ;;  %3121 = vst.msk [vmem:[#allocation2 + $0x30] sm:$0xff] %vm256_vm9, %v3084_v6  ;;  %v2408_v8 = vadd.f32 %v2328_v52, %v2047_v44  ;;  %v1970_v23 = vpop.f32.mrf.mxu1  ;;  %v2586_v62 = vsel %vm2443_vm6, %v2576_v31, %v2585_v38  ;;  %v5080_v52 = vld [vmem:[%s4040_s27 + $0x90] sm:$0xff] }
 0x248   : > { %v2048_v37 = vadd.f32 %v1970_v23, %v4441_v14  ;;  %v3050_v23 = vld [vmem:[#allocation2 + $0x40] sm:$0xff]  ;;  %v2591_v31 = vshll.u32 %v5080_v52, 16 }
 0x249   : > { %v3235_v51 = vmax.f32 %v3199_v9, 0.0  ;;  %v2777_v40 = vadd.f32 %v4979_v10, %v2408_v8  ;;  %v2936_v32 = vpop.f32.mrf.mxu0  ;;  %v5074_v47 = vpop.f32.mrf.mxu3 }
 0x24a   : > { %3708 = vmatmul.msk.bf16.gmra.mxu1 %vm575_vm3, %v1873_v2 }
 0x24b   : > { %v3271_v43 = vpack.c.bf16 %v3235_v51, %v3235_v51  ;;  %v3013_v63 = vadd.f32 %v2933_v13, %v2777_v40  ;;  %3795 = vmatmul.msk.bf16.gmra.mxu2 %vm575_vm3, %v2234_v5  ;;  %v2235_v51 = vrot.slane %v4986_v36, 2  ;;  %v2588_v40 = vshrl.u32 %v5080_v52, 16 }
 0x24c   : > { %3833 = vmatmul.msk.bf16.gmra.mxu0 %vm575_vm3, %v2839_v35 }
 0x24d   : > { %3308 = vst.msk [vmem:[%s4939_s19 + $0x14] sm:$0xf] %vm3302_vm10, %v3271_v43  ;;  %v3085_v10 = vadd.f32 %v3049_v39, %v3013_v63  ;;  %3816 = vmatmul.msk.bf16.gmra.mxu3 %vm575_vm3, %v2586_v62  ;;  %v2840_v39 = vrot.slane %v4986_v36, 3 }
 0x24e   : > { %v3160_v7 = vld [vmem:[#allocation2 + $0x30] sm:$0xff]  ;;  %v2331_v58 = vpop.f32.mrf.mxu2 }
 0x24f   : > { %v3200_v13 = vadd.f32 %v4917_v16, %v3160_v7  ;;  %3122 = vst.msk [vmem:[#allocation2 + $0x38] sm:$0xff] %vm256_vm9, %v3085_v10  ;;  %v2409_v6 = vadd.f32 %v2331_v58, %v2048_v37  ;;  %v1972_v44 = vpop.f32.mrf.mxu1  ;;  %v1875_v58 = vsel %vm1846_vm7, %v1872_v27, %v1874_v48  ;;  %v2841_v24 = vsel %vm2812_vm8, %v2838_v55, %v2840_v39 }
 0x251   : > { %v3236_v9 = vmax.f32 %v3200_v13, 0.0  ;;  %v2778_v8 = vadd.f32 %v5001_v25, %v2409_v6  ;;  %v2938_v14 = vpop.f32.mrf.mxu0  ;;  %v2049_v25 = vadd.f32 %v1972_v44, %v4451_v21  ;;  %v5095_v63 = vpop.f32.mrf.mxu3  ;;  %v2236_v21 = vsel %vm1846_vm7, %v2233_v61, %v2235_v51 }
 0x252   : > { %v2590_v13 = vrot.slane %v2588_v40, 2  ;;  %v2593_v6 = vrot.slane %v2591_v31, 3 }
 0x253   : > { %v3272_v2 = vpack.c.bf16 %v3236_v9, %v3236_v9  ;;  %v3014_v5 = vadd.f32 %v2936_v32, %v2778_v8  ;;  %v3051_v8 = vld [vmem:[#allocation2 + $0x48] sm:$0xff] }
 0x254   : > { %v5118_v61 = vor.u32 %v2593_v6, %v2590_v13  ;;  %v2237_v13 = vrot.slane %v5033_v53, 2 }
 0x255   : > { %3309 = vst.msk [vmem:[%s4939_s19 + $0x18] sm:$0xf] %vm3302_vm10, %v3272_v2  ;;  %v3086_v35 = vadd.f32 %v3050_v23, %v3014_v5 }
 0x256   : > { %v3161_v32 = vld [vmem:[#allocation2 + $0x38] sm:$0xff]  ;;  %v2333_v43 = vpop.f32.mrf.mxu2 }
 0x257   : > { %v3201_v10 = vadd.f32 %v4917_v16, %v3161_v32  ;;  %3123 = vst.msk [vmem:[#allocation2 + $0x40] sm:$0xff] %vm256_vm9, %v3086_v35  ;;  %v2410_v37 = vadd.f32 %v2333_v43, %v2049_v25  ;;  %v1975_v7 = vpop.f32.mrf.mxu1  ;;  %v2595_v35 = vsel %vm2443_vm6, %v2585_v38, %v5118_v61  ;;  %v5130_v25 = vld [vmem:[%s4040_s27 + $0x98] sm:$0xff] }
 0x258   : > { %v2050_v2 = vadd.f32 %v1975_v7, %v4457_v41  ;;  %v2597_v6 = vshrl.u32 %v5130_v25, 16  ;;  %v2600_v38 = vshll.u32 %v5130_v25, 16 }
 0x259   : > { %v3237_v44 = vmax.f32 %v3201_v10, 0.0  ;;  %v2779_v62 = vadd.f32 %v5027_v22, %v2410_v37  ;;  %v2941_v9 = vpop.f32.mrf.mxu0  ;;  %v5123_v5 = vpop.f32.mrf.mxu3  ;;  %v3052_v10 = vld [vmem:[#allocation2 + $0x50] sm:$0xff] }
 0x25a   : > { %3709 = vmatmul.msk.bf16.gmra.mxu1 %vm575_vm3, %v1875_v58  ;;  %v5135_v58 = vld [vmem:[%s4040_s27 + $0x80] sm:$0xff] }
 0x25b   : > { %v3273_v27 = vpack.c.bf16 %v3237_v44, %v3237_v44  ;;  %v3015_v23 = vadd.f32 %v2938_v14, %v2779_v62  ;;  %3796 = vmatmul.msk.bf16.gmra.mxu2 %vm575_vm3, %v2236_v21  ;;  %v1876_v21 = vrot.slane %v5135_v58, 2  ;;  %v2842_v62 = vrot.slane %v5033_v53, 3  ;;  %v3055_v58 = vld [vmem:[#allocation2 + $0x68] sm:$0xff] }
 0x25c   : > { %3834 = vmatmul.msk.bf16.gmra.mxu0 %vm575_vm3, %v2841_v24 }
 0x25d   : > { %3310 = vst.msk [vmem:[%s4939_s19 + $0x1c] sm:$0xf] %vm3302_vm10, %v3273_v27  ;;  %v3087_v22 = vadd.f32 %v3051_v8, %v3015_v23  ;;  %3817 = vmatmul.msk.bf16.gmra.mxu3 %vm575_vm3, %v2595_v35  ;;  %v2843_v49 = vsel %vm2812_vm8, %v2840_v39, %v2842_v62  ;;  %v3053_v35 = vld [vmem:[#allocation2 + $0x58] sm:$0xff] }
 0x25e   : > { %v3162_v45 = vld [vmem:[#allocation2 + $0x40] sm:$0xff]  ;;  %v2336_v55 = vpop.f32.mrf.mxu2 }
 0x25f   : > { %v3202_v14 = vadd.f32 %v4917_v16, %v3162_v45  ;;  %3124 = vst.msk [vmem:[#allocation2 + $0x48] sm:$0xff] %vm256_vm9, %v3087_v22  ;;  %v2411_v40 = vadd.f32 %v2336_v55, %v2050_v2  ;;  %v1977_v31 = vpop.f32.mrf.mxu1  ;;  %v1877_v2 = vsel %vm1846_vm7, %v1874_v48, %v1876_v21  ;;  %v2599_v45 = vrot.slane %v2597_v6, 2  ;;  %v2437_v48 = vld [vmem:[%s4040_s27 + $0xa0] sm:$0x7] }
 0x260   : > { %v2602_v55 = vrot.slane %v2600_v38, 3 }
 0x261   : > { %v3238_v32 = vmax.f32 %v3202_v14, 0.0  ;;  %v2780_v41 = vadd.f32 %v5048_v18, %v2411_v40  ;;  %v2943_v43 = vpop.f32.mrf.mxu0  ;;  %v2051_v18 = vadd.f32 %v1977_v31, %v4467_v34  ;;  %v5145_v8 = vpop.f32.mrf.mxu3  ;;  %v2238_v34 = vsel %vm1846_vm7, %v2235_v51, %v2237_v13 }
 0x262   : > { %v5169_v51 = vor.u32 %v2602_v55, %v2599_v45  ;;  %v2239_v45 = vrot.slane %v5080_v52, 2 }
 0x263   : > { %v3274_v37 = vpack.c.bf16 %v3238_v32, %v3238_v32  ;;  %v3016_v7 = vadd.f32 %v2941_v9, %v2780_v41 }
 0x265   : > { %3311 = vst.msk [vmem:[%s4939_s19 + $0x20] sm:$0xf] %vm3302_vm10, %v3274_v37  ;;  %v3088_v44 = vadd.f32 %v3052_v10, %v3016_v7 }
 0x266   : > { %v3163_v9 = vld [vmem:[#allocation2 + $0x48] sm:$0xff]  ;;  %v2338_v24 = vpop.f32.mrf.mxu2 }
 0x267   : > { %v3203_v27 = vadd.f32 %v4917_v16, %v3163_v9  ;;  %3125 = vst.msk [vmem:[#allocation2 + $0x50] sm:$0xff] %vm256_vm9, %v3088_v44  ;;  %v2412_v23 = vadd.f32 %v2338_v24, %v2051_v18  ;;  %v1980_v22 = vpop.f32.mrf.mxu1  ;;  %v2604_v44 = vsel %vm2443_vm6, %v5118_v61, %v5169_v51 }
 0x268   : > { %v2052_v36 = vadd.f32 %v1980_v22, %v4476_v42 }
 0x269   : > { %v3239_v14 = vmax.f32 %v3203_v27, 0.0  ;;  %v2781_v40 = vadd.f32 %v5074_v47, %v2412_v23  ;;  %v2946_v31 = vpop.f32.mrf.mxu0  ;;  %v2441_v47 = vunpack.c.l.b16 %v2437_v48  ;;  %v5174_v7 = vpop.f32.mrf.mxu3  ;;  %v3054_v27 = vld [vmem:[#allocation2 + $0x60] sm:$0xff] }
 0x26a   : > { %3710 = vmatmul.msk.bf16.gmra.mxu1 %vm575_vm3, %v1877_v2  ;;  %v5186_v2 = vld [vmem:[%s4040_s27 + $0x88] sm:$0xff] }
 0x26b   : > { %v3275_v32 = vpack.c.bf16 %v3239_v14, %v3239_v14  ;;  %v3017_v41 = vadd.f32 %v2943_v43, %v2781_v40  ;;  %3797 = vmatmul.msk.bf16.gmra.mxu2 %vm575_vm3, %v2238_v34  ;;  %v5181_v18 = vpack.c.b16 %v2441_v47, %v2441_v47  ;;  %v1878_v34 = vrot.slane %v5186_v2, 2 }
 0x26c   : > { %3835 = vmatmul.msk.bf16.gmra.mxu0 %vm575_vm3, %v2843_v49  ;;  %v2844_v49 = vrot.slane %v5080_v52, 3 }
 0x26d   : > { %3312 = vst.msk [vmem:[%s4939_s19 + $0x24] sm:$0xf] %vm3302_vm10, %v3275_v32  ;;  %v3089_v10 = vadd.f32 %v3053_v35, %v3017_v41  ;;  %3818 = vmatmul.msk.bf16.gmra.mxu3 %vm575_vm3, %v2604_v44  ;;  %v2606_v55 = vshrl.u32 %v5181_v18, 16  ;;  %v2609_v61 = vshll.u32 %v5181_v18, 16 }
 0x26e   : > { %v3164_v37 = vld [vmem:[#allocation2 + $0x50] sm:$0xff]  ;;  %v2341_v39 = vpop.f32.mrf.mxu2  ;;  %v2845_v44 = vsel %vm2812_vm8, %v2842_v62, %v2844_v49 }
 0x26f   : > { %v3204_v43 = vadd.f32 %v4917_v16, %v3164_v37  ;;  %3126 = vst.msk [vmem:[#allocation2 + $0x58] sm:$0xff] %vm256_vm9, %v3089_v10  ;;  %v2413_v6 = vadd.f32 %v2341_v39, %v2052_v36  ;;  %v1982_v38 = vpop.f32.mrf.mxu1  ;;  %v1879_v10 = vsel %vm1846_vm7, %v1876_v21, %v1878_v34  ;;  %v2240_v36 = vsel %vm1846_vm7, %v2237_v13, %v2239_v45 }
 0x270   : > { %v2608_v37 = vrot.slane %v2606_v55, 2  ;;  %v2611_v39 = vrot.slane %v2609_v61, 3 }
 0x271   : > { %v3240_v9 = vmax.f32 %v3204_v43, 0.0  ;;  %v2782_v42 = vadd.f32 %v5095_v63, %v2413_v6  ;;  %v2948_v24 = vpop.f32.mrf.mxu0  ;;  %v5413_v63 = vld [vmem:[#allocation11_spill] sm:$0xff]  ;;  %v5196_v35 = vpop.f32.mrf.mxu3 }
 0x272   : > { %v2053_v40 = vadd.f32 %v1982_v38, %v5413_v63  ;;  %v2612_v21 = vor.u32 %v2611_v39, %v2608_v37 }
 0x273   : > { %v3276_v23 = vpack.c.bf16 %v3240_v9, %v3240_v9  ;;  %v3018_v22 = vadd.f32 %v2946_v31, %v2782_v42 }
 0x274   : > { %v2613_v61 = vsel %vm2443_vm6, %v5169_v51, %v2612_v21  ;;  %v2846_v51 = vrot.slane %v5130_v25, 3 }
 0x275   : > { %3313 = vst.msk [vmem:[%s4939_s19 + $0x28] sm:$0xf] %vm3302_vm10, %v3276_v23  ;;  %v3090_v14 = vadd.f32 %v3054_v27, %v3018_v22  ;;  %v5414_v27 = vld [vmem:[#allocation12_spill] sm:$0xff] }
 0x276   : > { %v3165_v31 = vld [vmem:[#allocation2 + $0x58] sm:$0xff]  ;;  %v2343_v48 = vpop.f32.mrf.mxu2  ;;  %v2847_v21 = vsel %vm2812_vm8, %v2844_v49, %v2846_v51 }
 0x277   : > { %v3205_v32 = vadd.f32 %v4917_v16, %v3165_v31  ;;  %3127 = vst.msk [vmem:[#allocation2 + $0x60] sm:$0xff] %vm256_vm9, %v3090_v14  ;;  %v2414_v41 = vadd.f32 %v2343_v48, %v2053_v40  ;;  %v1985_v47 = vpop.f32.mrf.mxu1  ;;  %v3056_v31 = vld [vmem:[#allocation2 + $0x70] sm:$0xff] }
 0x279   : > { %v3241_v43 = vmax.f32 %v3205_v32, 0.0  ;;  %v2783_v6 = vadd.f32 %v5123_v5, %v2414_v41  ;;  %v2951_v38 = vpop.f32.mrf.mxu0  ;;  %v2054_v5 = vadd.f32 %v1985_v47, %v5414_v27  ;;  %v5220_v22 = vpop.f32.mrf.mxu3  ;;  %v3950_v41 = vld [vmem:[%s4040_s27 + $0x90] sm:$0xff]  ;;  %v3057_v27 = vld [vmem:[#allocation2 + $0x78] sm:$0xff] }
 0x27a   : > { %3711 = vmatmul.msk.bf16.gmra.mxu1 %vm575_vm3, %v1879_v10  ;;  %v1880_v47 = vrot.slane %v3950_v41, 2  ;;  %v2241_v10 = vrot.slane %v5130_v25, 2 }
 0x27b   : > { %v3277_v9 = vpack.c.bf16 %v3241_v43, %v3241_v43  ;;  %v3019_v42 = vadd.f32 %v2948_v24, %v2783_v6  ;;  %3798 = vmatmul.msk.bf16.gmra.mxu2 %vm575_vm3, %v2240_v36 }
 0x27c   : > { %3836 = vmatmul.msk.bf16.gmra.mxu0 %vm575_vm3, %v2845_v44 }
 0x27d   : > { %3314 = vst.msk [vmem:[%s4939_s19 + $0x2c] sm:$0xf] %vm3302_vm10, %v3277_v9  ;;  %v3091_v13 = vadd.f32 %v3055_v58, %v3019_v42  ;;  %3819 = vmatmul.msk.bf16.gmra.mxu3 %vm575_vm3, %v2613_v61  ;;  %v1881_v58 = vsel %vm1846_vm7, %v1878_v34, %v1880_v47 }
 0x27e   : > { %v3166_v23 = vld [vmem:[#allocation2 + $0x60] sm:$0xff]  ;;  %v2346_v53 = vpop.f32.mrf.mxu2 }
 0x27f   : > { %v3206_v62 = vadd.f32 %v4917_v16, %v3166_v23  ;;  %3128 = vst.msk [vmem:[#allocation2 + $0x68] sm:$0xff] %vm256_vm9, %v3091_v13  ;;  %v2415_v24 = vadd.f32 %v2346_v53, %v2054_v5  ;;  %v1987_v55 = vpop.f32.mrf.mxu1  ;;  %v2112_v13 = vld [vmem:[%s4040_s27 + $0xa0] sm:$0x3] }
 0x280   : > { %v2055_v37 = vadd.f32 %v1987_v55, %v4532_v4  ;;  %v2242_v4 = vsel %vm1846_vm7, %v2239_v45, %v2241_v10  ;;  %v2188_v2 = vunpack.c.l.b16 %v2112_v13 }
 0x281   : > { %v3242_v14 = vmax.f32 %v3206_v62, 0.0  ;;  %v2784_v63 = vadd.f32 %v5145_v8, %v2415_v24  ;;  %v2953_v40 = vpop.f32.mrf.mxu0  ;;  %v5234_v43 = vpop.f32.mrf.mxu3 }
 0x282   : > { %v2207_v55 = vpack.c.b16 %v2188_v2, %v2188_v2 }
 0x283   : > { %v3278_v48 = vpack.c.bf16 %v3242_v14, %v3242_v14  ;;  %v3020_v32 = vadd.f32 %v2951_v38, %v2784_v63 }
 0x285   : > { %3315 = vst.msk [vmem:[%s4939_s19 + $0x30] sm:$0xf] %vm3302_vm10, %v3278_v48  ;;  %v3092_v36 = vadd.f32 %v3056_v31, %v3020_v32  ;;  %v2243_v32 = vrot.slane %v2207_v55, 2 }
 0x286   : > { %v3167_v39 = vld [vmem:[#allocation2 + $0x68] sm:$0xff]  ;;  %v2348_v8 = vpop.f32.mrf.mxu2 }
 0x287   : > { %v3207_v6 = vadd.f32 %v4917_v16, %v3167_v39  ;;  %3129 = vst.msk [vmem:[#allocation2 + $0x70] sm:$0xff] %vm256_vm9, %v3092_v36  ;;  %v2416_v38 = vadd.f32 %v2348_v8, %v2055_v37  ;;  %v1990_v44 = vpop.f32.mrf.mxu1  ;;  %v2848_v37 = vrot.slane %v5181_v18, 3 }
 0x288   : > { %v2056_v34 = vadd.f32 %v1990_v44, %v4546_v12  ;;  %v1882_v12 = vrot.slane %v4527_v15, 2 }
 0x289   : > { %v3243_v25 = vmax.f32 %v3207_v6, 0.0  ;;  %v2785_v9 = vadd.f32 %v5174_v7, %v2416_v38  ;;  %v2956_v42 = vpop.f32.mrf.mxu0  ;;  %v5253_v49 = vpop.f32.mrf.mxu3  ;;  %v2849_v18 = vsel %vm2812_vm8, %v2846_v51, %v2848_v37 }
 0x28a   : > { %3712 = vmatmul.msk.bf16.gmra.mxu1 %vm575_vm3, %v1881_v58  ;;  %v1883_v15 = vsel %vm1846_vm7, %v1880_v47, %v1882_v12  ;;  %v2244_v58 = vsel %vm1846_vm7, %v2241_v10, %v2243_v32  ;;  %v3061_v12 = vld [vmem:[#allocation2 + $0x98] sm:$0xff] }
 0x28b   : > { %v3279_v5 = vpack.c.bf16 %v3243_v25, %v3243_v25  ;;  %v3021_v23 = vadd.f32 %v2953_v40, %v2785_v9  ;;  %3799 = vmatmul.msk.bf16.gmra.mxu2 %vm575_vm3, %v2242_v4  ;;  %v3058_v40 = vld [vmem:[#allocation2 + $0x80] sm:$0xff]  ;;  %v3059_v9 = vld [vmem:[#allocation2 + $0x88] sm:$0xff] }
 0x28c   : > { %3837 = vmatmul.msk.bf16.gmra.mxu0 %vm575_vm3, %v2847_v21 }
 0x28d   : > { %3316 = vst.msk [vmem:[%s4939_s19 + $0x34] sm:$0xf] %vm3302_vm10, %v3279_v5  ;;  %v3093_v52 = vadd.f32 %v3057_v27, %v3021_v23 }
 0x28e   : > { %v3168_v7 = vld [vmem:[#allocation2 + $0x70] sm:$0xff]  ;;  %v2351_v45 = vpop.f32.mrf.mxu2 }
 0x28f   : > { %v3208_v53 = vadd.f32 %v4917_v16, %v3168_v7  ;;  %3130 = vst.msk [vmem:[#allocation2 + $0x78] sm:$0xff] %vm256_vm9, %v3093_v52  ;;  %v2417_v62 = vadd.f32 %v2351_v45, %v2056_v34  ;;  %v1992_v24 = vpop.f32.mrf.mxu1  ;;  %v3060_v7 = vld [vmem:[#allocation2 + $0x90] sm:$0xff] }
 0x290   : > { %v2057_v36 = vadd.f32 %v1992_v24, %v4562_v50 }
 0x291   : > { %v3244_v61 = vmax.f32 %v3208_v53, 0.0  ;;  %v2786_v14 = vadd.f32 %v5196_v35, %v2417_v62  ;;  %v2958_v63 = vpop.f32.mrf.mxu0  ;;  %v2730_v6 = vpop.f32.mrf.mxu3 }
 0x293   : > { %v3280_v31 = vpack.c.bf16 %v3244_v61, %v3244_v61  ;;  %v3022_v48 = vadd.f32 %v2956_v42, %v2786_v14 }
 0x295   : > { %3317 = vst.msk [vmem:[%s4939_s19 + $0x38] sm:$0xf] %vm3302_vm10, %v3280_v31  ;;  %v3094_v41 = vadd.f32 %v3058_v40, %v3022_v48 }
 0x296   : > { %v3169_v39 = vld [vmem:[#allocation2 + $0x78] sm:$0xff]  ;;  %v2353_v8 = vpop.f32.mrf.mxu2 }
 0x297   : > { %v3209_v38 = vadd.f32 %v4917_v16, %v3169_v39  ;;  %3131 = vst.msk [vmem:[#allocation2 + $0x80] sm:$0xff] %vm256_vm9, %v3094_v41  ;;  %v2418_v35 = vadd.f32 %v2353_v8, %v2057_v36  ;;  %v1995_v44 = vpop.f32.mrf.mxu1 }
 0x298   : > { %v2058_v10 = vadd.f32 %v1995_v44, %v4579_v20 }
 0x299   : > { %v3245_v4 = vmax.f32 %v3209_v38, 0.0  ;;  %v2787_v25 = vadd.f32 %v5220_v22, %v2418_v35  ;;  %v2961_v50 = vpop.f32.mrf.mxu0  ;;  %v2732_v27 = vpop.f32.mrf.mxu3 }
 0x29a   : > { %3713 = vmatmul.msk.bf16.gmra.mxu1 %vm575_vm3, %v1883_v15 }
 0x29b   : > { %v3281_v42 = vpack.c.bf16 %v3245_v4, %v3245_v4  ;;  %v3023_v21 = vadd.f32 %v2958_v63, %v2787_v25  ;;  %3800 = vmatmul.msk.bf16.gmra.mxu2 %vm575_vm3, %v2244_v58  ;;  %v3062_v4 = vld [vmem:[#allocation2 + $0xa0] sm:$0xff] }
 0x29c   : > { %3838 = vmatmul.msk.bf16.gmra.mxu0 %vm575_vm3, %v2849_v18 }
 0x29d   : > { %3318 = vst.msk [vmem:[%s4939_s19 + $0x3c] sm:$0xf] %vm3302_vm10, %v3281_v42  ;;  %v3095_v47 = vadd.f32 %v3059_v9, %v3023_v21 }
 0x29e   : > { %v3170_v13 = vld [vmem:[#allocation2 + $0x80] sm:$0xff]  ;;  %v2356_v22 = vpop.f32.mrf.mxu2 }
 0x29f   : > { %v3210_v51 = vadd.f32 %v4917_v16, %v3170_v13  ;;  %3132 = vst.msk [vmem:[#allocation2 + $0x88] sm:$0xff] %vm256_vm9, %v3095_v47  ;;  %v2419_v5 = vadd.f32 %v2356_v22, %v2058_v10  ;;  %v1997_v23 = vpop.f32.mrf.mxu1 }
 0x2a0   : > { %v2059_v62 = vadd.f32 %v1997_v23, %v4593_v28 }
 0x2a1   : > { %v3246_v2 = vmax.f32 %v3210_v51, 0.0  ;;  %v2788_v52 = vadd.f32 %v5234_v43, %v2419_v5  ;;  %v2963_v34 = vpop.f32.mrf.mxu0  ;;  %v2735_v61 = vpop.f32.mrf.mxu3  ;;  %v3063_v51 = vld [vmem:[#allocation2 + $0xa8] sm:$0xff] }
 0x2a3   : > { %v3282_v45 = vpack.c.bf16 %v3246_v2, %v3246_v2  ;;  %v3024_v53 = vadd.f32 %v2961_v50, %v2788_v52 }
 0x2a5   : > { %3319 = vst.msk [vmem:[%s4939_s19 + $0x40] sm:$0xf] %vm3302_vm10, %v3282_v45  ;;  %v3096_v20 = vadd.f32 %v3060_v7, %v3024_v53 }
 0x2a6   : > { %v3171_v24 = vld [vmem:[#allocation2 + $0x88] sm:$0xff]  ;;  %v2358_v55 = vpop.f32.mrf.mxu2 }
 0x2a7   : > { %v3211_v14 = vadd.f32 %v4917_v16, %v3171_v24  ;;  %3133 = vst.msk [vmem:[#allocation2 + $0x90] sm:$0xff] %vm256_vm9, %v3096_v20  ;;  %v2420_v63 = vadd.f32 %v2358_v55, %v2059_v62  ;;  %v2000_v40 = vpop.f32.mrf.mxu1  ;;  %v3064_v55 = vld [vmem:[#allocation2 + $0xb0] sm:$0xff] }
 0x2a8   : > { %v2060_v36 = vadd.f32 %v2000_v40, %v4603_v19 }
 0x2a9   : > { %v3247_v43 = vmax.f32 %v3211_v14, 0.0  ;;  %v2789_v31 = vadd.f32 %v5253_v49, %v2420_v63  ;;  %v2966_v48 = vpop.f32.mrf.mxu0  ;;  %v2737_v44 = vpop.f32.mrf.mxu3 }
 0x2ab   : > { %v3283_v32 = vpack.c.bf16 %v3247_v43, %v3247_v43  ;;  %v3025_v41 = vadd.f32 %v2963_v34, %v2789_v31 }
 0x2ad   : > { %3320 = vst.msk [vmem:[%s4939_s19 + $0x44] sm:$0xf] %vm3302_vm10, %v3283_v32  ;;  %v3097_v28 = vadd.f32 %v3061_v12, %v3025_v41 }
 0x2ae   : > { %v3172_v37 = vld [vmem:[#allocation2 + $0x90] sm:$0xff]  ;;  %v2361_v39 = vpop.f32.mrf.mxu2 }
 0x2af   : > { %v3212_v8 = vadd.f32 %v4917_v16, %v3172_v37  ;;  %3134 = vst.msk [vmem:[#allocation2 + $0x98] sm:$0xff] %vm256_vm9, %v3097_v28  ;;  %v2421_v38 = vadd.f32 %v2361_v39, %v2060_v36  ;;  %v2002_v35 = vpop.f32.mrf.mxu1  ;;  %v3065_v37 = vld [vmem:[#allocation2 + $0xb8] sm:$0xff] }
 0x2b0   : > { %v2061_v19 = vadd.f32 %v2002_v35, %v4617_v0 }
 0x2b1   : > { %v3248_v49 = vmax.f32 %v3212_v8, 0.0  ;;  %v2790_v15 = vadd.f32 %v2730_v6, %v2421_v38  ;;  %v2968_v58 = vpop.f32.mrf.mxu0  ;;  %v2740_v5 = vpop.f32.mrf.mxu3 }
 0x2b3   : > { %v3284_v25 = vpack.c.bf16 %v3248_v49, %v3248_v49  ;;  %v3026_v50 = vadd.f32 %v2966_v48, %v2790_v15 }
 0x2b5   : > { %3321 = vst.msk [vmem:[%s4939_s19 + $0x48] sm:$0xf] %vm3302_vm10, %v3284_v25  ;;  %v3098_v18 = vadd.f32 %v3062_v4, %v3026_v50 }
 0x2b6   : > { %v3173_v9 = vld [vmem:[#allocation2 + $0x98] sm:$0xff]  ;;  %v2363_v42 = vpop.f32.mrf.mxu2 }
 0x2b7   : > { %v3213_v21 = vadd.f32 %v4917_v16, %v3173_v9  ;;  %3135 = vst.msk [vmem:[#allocation2 + $0xa0] sm:$0xff] %vm256_vm9, %v3098_v18  ;;  %v2422_v47 = vadd.f32 %v2363_v42, %v2061_v19  ;;  %v2005_v10 = vpop.f32.mrf.mxu1  ;;  %v3066_v19 = vld [vmem:[#allocation2 + $0xc0] sm:$0xff] }
 0x2b8   : > { %v2062_v0 = vadd.f32 %v2005_v10, %v4626_v46 }
 0x2b9   : > { %v3249_v13 = vmax.f32 %v3213_v21, 0.0  ;;  %v2791_v6 = vadd.f32 %v2732_v27, %v2422_v47  ;;  %v2971_v22 = vpop.f32.mrf.mxu0  ;;  %v2742_v40 = vpop.f32.mrf.mxu3 }
 0x2bb   : > { %v3285_v23 = vpack.c.bf16 %v3249_v13, %v3249_v13  ;;  %v3027_v2 = vadd.f32 %v2968_v58, %v2791_v6 }
 0x2bd   : > { %3322 = vst.msk [vmem:[%s4939_s19 + $0x4c] sm:$0xf] %vm3302_vm10, %v3285_v23  ;;  %v3099_v52 = vadd.f32 %v3063_v51, %v3027_v2 }
 0x2be   : > { %v3174_v34 = vld [vmem:[#allocation2 + $0xa0] sm:$0xff]  ;;  %v2366_v7 = vpop.f32.mrf.mxu2 }
 0x2bf   : > { %v3214_v45 = vadd.f32 %v4917_v16, %v3174_v34  ;;  %3136 = vst.msk [vmem:[#allocation2 + $0xa8] sm:$0xff] %vm256_vm9, %v3099_v52  ;;  %v2423_v53 = vadd.f32 %v2366_v7, %v2062_v0  ;;  %v2007_v20 = vpop.f32.mrf.mxu1  ;;  %v3067_v52 = vld [vmem:[#allocation2 + $0xc8] sm:$0xff] }
 0x2c0   : > { %v2063_v46 = vadd.f32 %v2007_v20, %v4639_v30 }
 0x2c1   : > { %v3250_v27 = vmax.f32 %v3214_v45, 0.0  ;;  %v2792_v62 = vadd.f32 %v2735_v61, %v2423_v53  ;;  %v2973_v24 = vpop.f32.mrf.mxu0  ;;  %v2745_v15 = vpop.f32.mrf.mxu3 }
 0x2c3   : > { %v3286_v14 = vpack.c.bf16 %v3250_v27, %v3250_v27  ;;  %v3028_v63 = vadd.f32 %v2971_v22, %v2792_v62 }
 0x2c5   : > { %3323 = vst.msk [vmem:[%s4939_s19 + $0x50] sm:$0xf] %vm3302_vm10, %v3286_v14  ;;  %v3100_v43 = vadd.f32 %v3064_v55, %v3028_v63  ;;  %v3068_v63 = vld [vmem:[#allocation2 + $0xd0] sm:$0xff] }
 0x2c6   : > { %v3175_v31 = vld [vmem:[#allocation2 + $0xa8] sm:$0xff]  ;;  %v2368_v48 = vpop.f32.mrf.mxu2 }
 0x2c7   : > { %v3215_v12 = vadd.f32 %v4917_v16, %v3175_v31  ;;  %3137 = vst.msk [vmem:[#allocation2 + $0xb0] sm:$0xff] %vm256_vm9, %v3100_v43  ;;  %v2424_v32 = vadd.f32 %v2368_v48, %v2063_v46  ;;  %v2010_v41 = vpop.f32.mrf.mxu1 }
 0x2c8   : > { %v2064_v30 = vadd.f32 %v2010_v41, %v4648_v11 }
 0x2c9   : > { %v3251_v61 = vmax.f32 %v3215_v12, 0.0  ;;  %v2793_v28 = vadd.f32 %v2737_v44, %v2424_v32  ;;  %v2976_v36 = vpop.f32.mrf.mxu0  ;;  %v2747_v51 = vpop.f32.mrf.mxu3 }
 0x2cb   : > { %v3287_v39 = vpack.c.bf16 %v3251_v61, %v3251_v61  ;;  %v3029_v8 = vadd.f32 %v2973_v24, %v2793_v28 }
 0x2cd   : > { %3324 = vst.msk [vmem:[%s4939_s19 + $0x54] sm:$0xf] %vm3302_vm10, %v3287_v39  ;;  %v3101_v38 = vadd.f32 %v3065_v37, %v3029_v8  ;;  %v3069_v39 = vld [vmem:[#allocation2 + $0xd8] sm:$0xff] }
 0x2ce   : > { %v3176_v35 = vld [vmem:[#allocation2 + $0xb0] sm:$0xff]  ;;  %v2371_v49 = vpop.f32.mrf.mxu2 }
 0x2cf   : > { %v3216_v58 = vadd.f32 %v4917_v16, %v3176_v35  ;;  %3138 = vst.msk [vmem:[#allocation2 + $0xb8] sm:$0xff] %vm256_vm9, %v3101_v38  ;;  %v2425_v4 = vadd.f32 %v2371_v49, %v2064_v30  ;;  %v2012_v25 = vpop.f32.mrf.mxu1 }
 0x2d0   : > { %v2065_v11 = vadd.f32 %v2012_v25, %v4661_v54 }
 0x2d1   : > { %v3252_v44 = vmax.f32 %v3216_v58, 0.0  ;;  %v2794_v50 = vadd.f32 %v2740_v5, %v2425_v4  ;;  %v2978_v18 = vpop.f32.mrf.mxu0 }
 0x2d3   : > { %v3288_v9 = vpack.c.bf16 %v3252_v44, %v3252_v44  ;;  %v3030_v42 = vadd.f32 %v2976_v36, %v2794_v50 }
 0x2d5   : > { %3325 = vst.msk [vmem:[%s4939_s19 + $0x58] sm:$0xf] %vm3302_vm10, %v3288_v9  ;;  %v3102_v21 = vadd.f32 %v3066_v19, %v3030_v42  ;;  %v3070_v19 = vld [vmem:[#allocation2 + $0xe0] sm:$0xff] }
 0x2d6   : > { %v3177_v47 = vld [vmem:[#allocation2 + $0xb8] sm:$0xff]  ;;  %v2373_v10 = vpop.f32.mrf.mxu2 }
 0x2d7   : > { %v3217_v13 = vadd.f32 %v4917_v16, %v3177_v47  ;;  %3139 = vst.msk [vmem:[#allocation2 + $0xc0] sm:$0xff] %vm256_vm9, %v3102_v21  ;;  %v2426_v6 = vadd.f32 %v2373_v10, %v2065_v11  ;;  %v2015_v22 = vpop.f32.mrf.mxu1  ;;  %v5320_v16 = vld [vmem:[%s5389_s2] ss:$0 sm:$0xff] }
 0x2d8   : > { %v2066_v54 = vadd.f32 %v2015_v22, %v4670_v33 }
 0x2d9   : > { %v3253_v5 = vmax.f32 %v3217_v13, 0.0  ;;  %v2795_v23 = vadd.f32 %v2742_v40, %v2426_v6  ;;  %v2981_v2 = vpop.f32.mrf.mxu0  ;;  %v2750_v40 = vpop.f32.mrf.mxu3 }
 0x2db   : > { %v3289_v0 = vpack.c.bf16 %v3253_v5, %v3253_v5  ;;  %v3031_v34 = vadd.f32 %v2978_v18, %v2795_v23 }
 0x2dd   : > { %3326 = vst.msk [vmem:[%s4939_s19 + $0x5c] sm:$0xf] %vm3302_vm10, %v3289_v0  ;;  %v3103_v7 = vadd.f32 %v3067_v52, %v3031_v34 }
 0x2de   : > { %v3178_v45 = vld [vmem:[#allocation2 + $0xc0] sm:$0xff]  ;;  %v2376_v53 = vpop.f32.mrf.mxu2 }
 0x2df   : > { %v3218_v20 = vadd.f32 %v5320_v16, %v3178_v45  ;;  %3140 = vst.msk [vmem:[#allocation2 + $0xc8] sm:$0xff] %vm256_vm9, %v3103_v7  ;;  %v2427_v27 = vadd.f32 %v2376_v53, %v2066_v54  ;;  %v2017_v62 = vpop.f32.mrf.mxu1 }
 0x2e0   : > { %v2067_v31 = vadd.f32 %v2017_v62, %v4683_v29 }
 0x2e1   : > { %v3254_v24 = vmax.f32 %v3218_v20, 0.0  ;;  %v2796_v55 = vadd.f32 %v2745_v15, %v2427_v27  ;;  %v2983_v14 = vpop.f32.mrf.mxu0  ;;  %v2752_v30 = vpop.f32.mrf.mxu3 }
 0x2e3   : > { %v3290_v43 = vpack.c.bf16 %v3254_v24, %v3254_v24  ;;  %v3032_v33 = vadd.f32 %v2981_v2, %v2796_v55  ;;  %v3071_v2 = vld [vmem:[#allocation2 + $0xe8] sm:$0xff]  ;;  %v3072_v55 = vld [vmem:[#allocation2 + $0xf0] sm:$0xff] }
 0x2e5   : > { %3327 = vst.msk [vmem:[%s4939_s19 + $0x60] sm:$0xf] %vm3302_vm10, %v3290_v43  ;;  %v3104_v46 = vadd.f32 %v3068_v63, %v3032_v33 }
 0x2e6   : > { %v3179_v48 = vld [vmem:[#allocation2 + $0xc8] sm:$0xff]  ;;  %v2378_v12 = vpop.f32.mrf.mxu2 }
 0x2e7   : > { %v3219_v32 = vadd.f32 %v5320_v16, %v3179_v48  ;;  %3141 = vst.msk [vmem:[#allocation2 + $0xd0] sm:$0xff] %vm256_vm9, %v3104_v46  ;;  %v2428_v41 = vadd.f32 %v2378_v12, %v2067_v31  ;;  %v2020_v61 = vpop.f32.mrf.mxu1 }
 0x2e8   : > { %v2068_v29 = vadd.f32 %v2020_v61, %v4692_v56  ;;  %v3073_v61 = vld [vmem:[#allocation2 + $0xf8] sm:$0xff] }
 0x2e9   : > { %v3255_v28 = vmax.f32 %v3219_v32, 0.0  ;;  %v2797_v36 = vadd.f32 %v2747_v51, %v2428_v41  ;;  %v2986_v37 = vpop.f32.mrf.mxu0  ;;  %v2755_v10 = vpop.f32.mrf.mxu3 }
 0x2eb   : > { %v3291_v8 = vpack.c.bf16 %v3255_v28, %v3255_v28  ;;  %v3033_v38 = vadd.f32 %v2983_v14, %v2797_v36 }
 0x2ed   : > { %3328 = vst.msk [vmem:[%s4939_s19 + $0x64] sm:$0xf] %vm3302_vm10, %v3291_v8  ;;  %v3105_v35 = vadd.f32 %v3069_v39, %v3033_v38 }
 0x2ee   : > { %v3180_v49 = vld [vmem:[#allocation2 + $0xd0] sm:$0xff]  ;;  %v2381_v15 = vpop.f32.mrf.mxu2 }
 0x2ef   : > { %v3220_v58 = vadd.f32 %v5320_v16, %v3180_v49  ;;  %3142 = vst.msk [vmem:[#allocation2 + $0xd8] sm:$0xff] %vm256_vm9, %v3105_v35  ;;  %v2429_v4 = vadd.f32 %v2381_v15, %v2068_v29  ;;  %v2022_v25 = vpop.f32.mrf.mxu1 }
 0x2f0   : > { %v2069_v56 = vadd.f32 %v2022_v25, %v4705_v59 }
 0x2f1   : > { %v3256_v44 = vmax.f32 %v3220_v58, 0.0  ;;  %v2798_v50 = vadd.f32 %v2750_v40, %v2429_v4  ;;  %v2988_v18 = vpop.f32.mrf.mxu0  ;;  %v2757_v27 = vpop.f32.mrf.mxu3  ;;  %v3074_v4 = vld [vmem:[#allocation2 + $0x100] sm:$0xff] }
 0x2f3   : > { %v3292_v9 = vpack.c.bf16 %v3256_v44, %v3256_v44  ;;  %v3034_v42 = vadd.f32 %v2986_v37, %v2798_v50 }
 0x2f5   : > { %3329 = vst.msk [vmem:[%s4939_s19 + $0x68] sm:$0xf] %vm3302_vm10, %v3292_v9  ;;  %v3106_v21 = vadd.f32 %v3070_v19, %v3034_v42 }
 0x2f6   : > { %v3181_v11 = vld [vmem:[#allocation2 + $0xd8] sm:$0xff]  ;;  %v2383_v47 = vpop.f32.mrf.mxu2 }
 0x2f7   : > { %v3221_v13 = vadd.f32 %v5320_v16, %v3181_v11  ;;  %3143 = vst.msk [vmem:[#allocation2 + $0xe0] sm:$0xff] %vm256_vm9, %v3106_v21  ;;  %v2430_v6 = vadd.f32 %v2383_v47, %v2069_v56  ;;  %v2025_v22 = vpop.f32.mrf.mxu1 }
 0x2f8   : > { %v2070_v59 = vadd.f32 %v2025_v22, %v4716_v1 }
 0x2f9   : > { %v3257_v51 = vmax.f32 %v3221_v13, 0.0  ;;  %v2799_v5 = vadd.f32 %v2752_v30, %v2430_v6  ;;  %v2991_v23 = vpop.f32.mrf.mxu0  ;;  %v2760_v28 = vpop.f32.mrf.mxu3  ;;  %v3075_v13 = vld [vmem:[#allocation2 + $0x108] sm:$0xff] }
 0x2fb   : > { %v3293_v52 = vpack.c.bf16 %v3257_v51, %v3257_v51  ;;  %v3035_v0 = vadd.f32 %v2988_v18, %v2799_v5 }
 0x2fd   : > { %3330 = vst.msk [vmem:[%s4939_s19 + $0x6c] sm:$0xf] %vm3302_vm10, %v3293_v52  ;;  %v3107_v34 = vadd.f32 %v3071_v2, %v3035_v0 }
 0x2fe   : > { %v3182_v7 = vld [vmem:[#allocation2 + $0xe0] sm:$0xff]  ;;  %v2386_v54 = vpop.f32.mrf.mxu2 }
 0x2ff   : > { %v3222_v45 = vadd.f32 %v5320_v16, %v3182_v7  ;;  %3144 = vst.msk [vmem:[#allocation2 + $0xe8] sm:$0xff] %vm256_vm9, %v3107_v34  ;;  %v2431_v53 = vadd.f32 %v2386_v54, %v2070_v59  ;;  %v2027_v20 = vpop.f32.mrf.mxu1  ;;  %v3076_v54 = vld [vmem:[#allocation2 + $0x110] sm:$0xff] }
 0x300   : > { %v2071_v1 = vadd.f32 %v2027_v20, %v4731_v3 }
 0x301   : > { %v3258_v62 = vmax.f32 %v3222_v45, 0.0  ;;  %v2800_v24 = vadd.f32 %v2755_v10, %v2431_v53  ;;  %v2993_v14 = vpop.f32.mrf.mxu0  ;;  %v2762_v50 = vpop.f32.mrf.mxu3 }
 0x303   : > { %v3294_v63 = vpack.c.bf16 %v3258_v62, %v3258_v62  ;;  %v3036_v40 = vadd.f32 %v2991_v23, %v2800_v24 }
 0x305   : > { %3331 = vst.msk [vmem:[%s4939_s19 + $0x70] sm:$0xf] %vm3302_vm10, %v3294_v63  ;;  %v3108_v43 = vadd.f32 %v3072_v55, %v3036_v40 }
 0x306   : > { %v3183_v33 = vld [vmem:[#allocation2 + $0xe8] sm:$0xff]  ;;  %v2388_v46 = vpop.f32.mrf.mxu2 }
 0x307   : > { %v3223_v31 = vadd.f32 %v5320_v16, %v3183_v33  ;;  %3145 = vst.msk [vmem:[#allocation2 + $0xf0] sm:$0xff] %vm256_vm9, %v3108_v43  ;;  %v2432_v48 = vadd.f32 %v2388_v46, %v2071_v1  ;;  %v2030_v12 = vpop.f32.mrf.mxu1  ;;  %v3077_v33 = vld [vmem:[#allocation2 + $0x118] sm:$0xff] }
 0x308   : > { %v2072_v3 = vadd.f32 %v2030_v12, %v4759_v57 }
 0x309   : > { %v3259_v32 = vmax.f32 %v3223_v31, 0.0  ;;  %v2801_v41 = vadd.f32 %v2757_v27, %v2432_v48  ;;  %v2996_v39 = vpop.f32.mrf.mxu0  ;;  %v2765_v23 = vpop.f32.mrf.mxu3 }
 0x30b   : > { %v3295_v36 = vpack.c.bf16 %v3259_v32, %v3259_v32  ;;  %v3037_v37 = vadd.f32 %v2993_v14, %v2801_v41 }
 0x30d   : > { %3332 = vst.msk [vmem:[%s4939_s19 + $0x74] sm:$0xf] %vm3302_vm10, %v3295_v36  ;;  %v3109_v8 = vadd.f32 %v3073_v61, %v3037_v37 }
 0x30e   : > { %v3184_v38 = vld [vmem:[#allocation2 + $0xf0] sm:$0xff]  ;;  %v2391_v30 = vpop.f32.mrf.mxu2 }
 0x30f   : > { %v3224_v35 = vadd.f32 %v5320_v16, %v3184_v38  ;;  %3146 = vst.msk [vmem:[#allocation2 + $0xf8] sm:$0xff] %vm256_vm9, %v3109_v8  ;;  %v2433_v29 = vadd.f32 %v2391_v30, %v2072_v3  ;;  %v2032_v49 = vpop.f32.mrf.mxu1 }
 0x310   : > { %v2073_v57 = vadd.f32 %v2032_v49, %v4800_v26 }
 0x311   : > { %v3260_v15 = vmax.f32 %v3224_v35, 0.0  ;;  %v2802_v58 = vadd.f32 %v2760_v28, %v2433_v29  ;;  %v2998_v9 = vpop.f32.mrf.mxu0  ;;  %v2767_v63 = vpop.f32.mrf.mxu3 }
 0x313   : > { %v3296_v25 = vpack.c.bf16 %v3260_v15, %v3260_v15  ;;  %v3038_v44 = vadd.f32 %v2996_v39, %v2802_v58 }
 0x315   : > { %3333 = vst.msk [vmem:[%s4939_s19 + $0x78] sm:$0xf] %vm3302_vm10, %v3296_v25  ;;  %v3110_v18 = vadd.f32 %v3074_v4, %v3038_v44 }
 0x316   : > { %v3185_v19 = vld [vmem:[#allocation2 + $0xf8] sm:$0xff]  ;;  %v2393_v42 = vpop.f32.mrf.mxu2 }
 0x317   : > { %v3225_v21 = vadd.f32 %v5320_v16, %v3185_v19  ;;  %3147 = vst.msk [vmem:[#allocation2 + $0x100] sm:$0xff] %vm256_vm9, %v3110_v18  ;;  %v2434_v56 = vadd.f32 %v2393_v42, %v2073_v57  ;;  %v2035_v11 = vpop.f32.mrf.mxu1 }
 0x318   : > { %v2074_v26 = vadd.f32 %v2035_v11, %v4829_v60 }
 0x319   : > { %v3261_v47 = vmax.f32 %v3225_v21, 0.0  ;;  %v2803_v10 = vadd.f32 %v2762_v50, %v2434_v56  ;;  %v3001_v34 = vpop.f32.mrf.mxu0 }
 0x31b   : > { %v3297_v6 = vpack.c.bf16 %v3261_v47, %v3261_v47  ;;  %v3039_v22 = vadd.f32 %v2998_v9, %v2803_v10 }
 0x31d   : > { %3334 = vst.msk [vmem:[%s4939_s19 + $0x7c] sm:$0xf] %vm3302_vm10, %v3297_v6  ;;  %v3111_v51 = vadd.f32 %v3075_v13, %v3039_v22 }
 0x31e   : > { %v3186_v5 = vld [vmem:[#allocation2 + $0x100] sm:$0xff]  ;;  %v2396_v2 = vpop.f32.mrf.mxu2 }
 0x31f   : > { %v3226_v52 = vadd.f32 %v5320_v16, %v3186_v5  ;;  %3148 = vst.msk [vmem:[#allocation2 + $0x108] sm:$0xff] %vm256_vm9, %v3111_v51  ;;  %v2435_v0 = vadd.f32 %v2396_v2, %v2074_v26  ;;  %v2037_v45 = vpop.f32.mrf.mxu1 }
 0x320   : > { %v2075_v60 = vadd.f32 %v2037_v45, %v4870_v17 }
 0x321   : > { %v3262_v59 = vmax.f32 %v3226_v52, 0.0  ;;  %v2804_v7 = vadd.f32 %v2765_v23, %v2435_v0  ;;  %v3003_v1 = vpop.f32.mrf.mxu0 }
 0x323   : > { %v3298_v53 = vpack.c.bf16 %v3262_v59, %v3262_v59  ;;  %v3040_v20 = vadd.f32 %v3001_v34, %v2804_v7 }
 0x325   : > { %3335 = vst.msk [vmem:[%s4939_s19 + $0x80] sm:$0xf] %vm3302_vm10, %v3298_v53  ;;  %v3112_v27 = vadd.f32 %v3076_v54, %v3040_v20 }
 0x326   : > { %v3187_v62 = vld [vmem:[#allocation2 + $0x108] sm:$0xff]  ;;  %v2398_v24 = vpop.f32.mrf.mxu2 }
 0x327   : > { %v3227_v55 = vadd.f32 %v5320_v16, %v3187_v62  ;;  %3149 = vst.msk [vmem:[#allocation2 + $0x110] sm:$0xff] %vm256_vm9, %v3112_v27  ;;  %v2436_v14 = vadd.f32 %v2398_v24, %v2075_v60 }
 0x329   : > { %v3263_v40 = vmax.f32 %v3227_v55, 0.0  ;;  %v2805_v43 = vadd.f32 %v2767_v63, %v2436_v14 }
 0x32b   : > { %v3299_v46 = vpack.c.bf16 %v3263_v40, %v3263_v40  ;;  %v3041_v31 = vadd.f32 %v3003_v1, %v2805_v43 }
 0x32d   : > { %3336 = vst.msk [vmem:[%s4939_s19 + $0x84] sm:$0xf] %vm3302_vm10, %v3299_v46  ;;  %v3113_v48 = vadd.f32 %v3077_v33, %v3041_v31 }
 0x32e   : > { %v3188_v17 = vld [vmem:[#allocation2 + $0x110] sm:$0xff] }
 0x32f   : > { %v3228_v12 = vadd.f32 %v5320_v16, %v3188_v17  ;;  %3150 = vst.msk [vmem:[#allocation2 + $0x118] sm:$0xff] %vm256_vm9, %v3113_v48 }
 0x331   : > { %v3264_v32 = vmax.f32 %v3228_v12, 0.0 }
 0x333   : > { %v3300_v41 = vpack.c.bf16 %v3264_v32, %v3264_v32 }
 0x335   : > { %3337 = vst.msk [vmem:[%s4939_s19 + $0x88] sm:$0xf] %vm3302_vm10, %v3300_v41 }
 0x336   : > { %v3189_v61 = vld [vmem:[#allocation2 + $0x118] sm:$0xff] }
 0x337   : > { %v3229_v28 = vadd.f32 %v5320_v16, %v3189_v61 }
 0x339   : > { %v3265_v36 = vmax.f32 %v3229_v28, 0.0 }
 0x33b   : > { %v3301_v37 = vpack.c.bf16 %v3265_v36, %v3265_v36 }
 0x33d   : > { %3338 = vst.msk [vmem:[%s4939_s19 + $0x8c] sm:$0xf] %vm3302_vm10, %v3301_v37 }
 0x33e PF: > { %s13_s14 = sadd.s32 1, %s3974_s14   ;;  %s5415_s12 = smov %s3970_s13 }
 0x33f   : > { %p10_p5 = scmp.ge.s32.totalorder %s13_s14, 4   ;;  %s5416_s13 = smov %s5418_s15 }
 0x341   :  { %12 = sbr.rel (!%p10_p5) target bundleno = 2 (0x2), region = 84 }

</bundles_post_ra>
